<compile_context>
chip_gen: v7x
topology: tpu7x:2x2x1
jax: 0.10.0
libtpu: 0.0.40
codegen_flags: <defaults>
</compile_context>

<pallas_src>
import functools

import jax
import jax.numpy as jnp
import numpy as np
from jax import lax
from jax.experimental import pallas as pl
from jax.experimental.pallas import tpu as pltpu

INPUT_SIZE = 300
HIDDEN = 256
NUM_CLASSES = 2

K_PAD = 384        # 300 -> 3*128: lane-aligned contraction for the MXU
N_FC_PAD = 128     # 2 -> 128: lane-dense output block, sliced in the wrapper


def _round_up(x, m):
    return (x + m - 1) // m * m


def _sigmoid(x):
    # exp -> EUP, approximate reciprocal -> EUP; keeps the VALU free.
    return pl.reciprocal(1.0 + jnp.exp(-x), approx=True)


# -----------------------------------------------------------------------------
# Fused kernel: per grid step (bg, ci)
#   1) chunk-wide input projection  g = x_chunk @ W_ih_pad + (b_ih + b_hh)
#      one (chunk*bg, 384) @ (384, 1024) bf16 MXU matmul into f32 VMEM scratch
#   2) `chunk` LSTM time steps (in-kernel fori_loop); per step only
#      h @ W_hh^T remains on the MXU; h/c carried in f32 scratch across chunks
#   3) on the last chunk: logits = h_T @ W_fc_pad + b_fc, sigmoid, store.
# -----------------------------------------------------------------------------
def lstm_kernel(x_ref, w_ih_ref, b_ref, w_hh_ref, w_fc_ref, b_fc_ref,
                out_ref, g_ref, h_ref, c_ref, *, chunk, bg_size, seq_len):
    """
    x_ref:    (chunk*bg_size, K_PAD)   bf16  time-major rows for this chunk
    w_ih_ref: (K_PAD, 4*HIDDEN)        bf16
    b_ref:    (1, 4*HIDDEN)            f32   b_ih + b_hh
    w_hh_ref: (HIDDEN, 4*HIDDEN)       bf16
    w_fc_ref: (HIDDEN, N_FC_PAD)       bf16
    b_fc_ref: (1, N_FC_PAD)            f32
    out_ref:  (bg_size, N_FC_PAD)      f32   written on last chunk only
    g_ref:    (chunk*bg_size, 4*HIDDEN) f32  scratch: hoisted input projection
    h_ref/c_ref: (bg_size, HIDDEN)     f32   scratch carried across chunks
    """
    ci = pl.program_id(1)

    @pl.when(ci == 0)
    def _():
        h_ref[...] = jnp.zeros_like(h_ref)
        c_ref[...] = jnp.zeros_like(c_ref)

    # --- hoisted input projection for the whole chunk (one big MXU matmul) ---
    g_ref[...] = (
        jnp.dot(x_ref[...], w_ih_ref[...], preferred_element_type=jnp.float32)
        + b_ref[...]
    )

    H = HIDDEN

    def step(s, carry):
        h, c = carry
        row = pl.multiple_of(s * bg_size, 8)           # sublane-aligned start
        gates = g_ref[pl.ds(row, bg_size), :] + jnp.dot(
            h.astype(jnp.bfloat16), w_hh_ref[...],
            preferred_element_type=jnp.float32)
        i_g = _sigmoid(gates[:, 0 * H:1 * H])
        f_g = _sigmoid(gates[:, 1 * H:2 * H])
        g_g = jnp.tanh(gates[:, 2 * H:3 * H])
        o_g = _sigmoid(gates[:, 3 * H:4 * H])
        c_new = f_g * c + i_g * g_g
        h_new = o_g * jnp.tanh(c_new)
        return h_new, c_new

    init = (h_ref[...], c_ref[...])
    if seq_len % chunk == 0:
        # Static trip count: partially unroll for LLO scheduler visibility.
        h, c = lax.fori_loop(0, chunk, step, init, unroll=min(chunk, 8))
    else:
        # Ragged last chunk: only process the valid time steps.
        n_valid = jnp.minimum(chunk, seq_len - ci * chunk)
        h, c = lax.fori_loop(0, n_valid, step, init)

    h_ref[...] = h
    c_ref[...] = c

    @pl.when(ci == pl.num_programs(1) - 1)
    def _():
        logits = (jnp.dot(h.astype(jnp.bfloat16), w_fc_ref[...],
                          preferred_element_type=jnp.float32)
                  + b_fc_ref[...])
        out_ref[...] = _sigmoid(logits)


@jax.jit
def lstm_forward(x, w_ih, w_hh, b_ih, b_hh, w_fc, b_fc):
    """x: (B, T, 300) f32. Returns sigmoid(fc(h_T)): (B, 2) f32."""
    B, T, _ = x.shape

    # --- batch grouping: pad to sublanes; split big batches for megacore -----
    B_pad = _round_up(max(B, 8), 8)
    if B_pad > 128:
        bg_size = _round_up(pl.cdiv(B_pad, 2), 8)   # 2 groups -> 2 TensorCores
        num_bg = 2
        B_pad = num_bg * bg_size
    else:
        bg_size, num_bg = B_pad, 1

    # --- time chunking: amortize per-grid-step overhead, bound VMEM scratch --
    chunk = min(T, max(1, 512 // bg_size))          # gates scratch <= 2 MB
    num_chunks = pl.cdiv(T, chunk)
    T_pad = num_chunks * chunk

    # --- weight prep: bf16 MXU operands, f32 biases ---------------------------
    w_ih_pad = jnp.zeros((K_PAD, 4 * HIDDEN), jnp.bfloat16)
    w_ih_pad = w_ih_pad.at[:INPUT_SIZE, :].set(w_ih.T.astype(jnp.bfloat16))
    bias = (b_ih + b_hh).reshape(1, 4 * HIDDEN).astype(jnp.float32)
    w_hh_bf = w_hh.T.astype(jnp.bfloat16)                       # (H, 4H)
    w_fc_pad = jnp.zeros((HIDDEN, N_FC_PAD), jnp.bfloat16)
    w_fc_pad = w_fc_pad.at[:, :NUM_CLASSES].set(w_fc.T.astype(jnp.bfloat16))
    b_fc_pad = jnp.zeros((1, N_FC_PAD), jnp.float32)
    b_fc_pad = b_fc_pad.at[0, :NUM_CLASSES].set(b_fc.astype(jnp.float32))

    # --- input prep: (B,T,300) -> (num_bg, T_pad*bg_size, 384) bf16 ----------
    # Batch-group outermost, time-major inside a group so one grid step's rows
    # (chunk*bg_size, K_PAD) are a contiguous lane-aligned slab.
    x_tbd = jnp.transpose(x, (1, 0, 2)).astype(jnp.bfloat16)    # (T, B, 300)
    x_padded = jnp.zeros((T_pad, B_pad, K_PAD), jnp.bfloat16)
    x_padded = x_padded.at[:T, :B, :INPUT_SIZE].set(x_tbd)
    x_grp = (x_padded.reshape(T_pad, num_bg, bg_size, K_PAD)
             .transpose(1, 0, 2, 3)
             .reshape(num_bg, T_pad * bg_size, K_PAD))

    # VMEM footprint (default 2x buffering): x block + gates scratch + weights
    # stays well under the 16/32 MiB scoped defaults -> no override needed.
    kern = functools.partial(lstm_kernel, chunk=chunk, bg_size=bg_size,
                             seq_len=T)
    out_grp = pl.pallas_call(
        kern,
        out_shape=jax.ShapeDtypeStruct((num_bg, bg_size, N_FC_PAD),
                                       jnp.float32),
        grid_spec=pltpu.PrefetchScalarGridSpec(
            num_scalar_prefetch=0,
            grid=(num_bg, num_chunks),
            in_specs=[
                pl.BlockSpec((None, chunk * bg_size, K_PAD),
                             lambda bg, ci: (bg, ci, 0)),
                pl.BlockSpec((K_PAD, 4 * HIDDEN), lambda bg, ci: (0, 0)),
                pl.BlockSpec((1, 4 * HIDDEN), lambda bg, ci: (0, 0)),
                pl.BlockSpec((HIDDEN, 4 * HIDDEN), lambda bg, ci: (0, 0)),
                pl.BlockSpec((HIDDEN, N_FC_PAD), lambda bg, ci: (0, 0)),
                pl.BlockSpec((1, N_FC_PAD), lambda bg, ci: (0, 0)),
            ],
            out_specs=pl.BlockSpec((None, bg_size, N_FC_PAD),
                                   lambda bg, ci: (bg, 0, 0)),
            scratch_shapes=[
                pltpu.VMEM((chunk * bg_size, 4 * HIDDEN), jnp.float32),  # gates
                pltpu.VMEM((bg_size, HIDDEN), jnp.float32),              # h
                pltpu.VMEM((bg_size, HIDDEN), jnp.float32),              # c
            ],
        ),
        compiler_params=pltpu.CompilerParams(
            dimension_semantics=("parallel", "arbitrary")),
    )(x_grp, w_ih_pad, bias, w_hh_bf, w_fc_pad, b_fc_pad)

    out = out_grp.reshape(num_bg * bg_size, N_FC_PAD)
    return out[:B, :NUM_CLASSES]


def lstm_reference(x, w_ih, w_hh, b_ih, b_hh, w_fc, b_fc):
    """Pure-JAX f32 reference mirroring torch.nn.LSTM semantics."""
    B, T, _ = x.shape
    h = jnp.zeros((B, HIDDEN), jnp.float32)
    c = jnp.zeros((B, HIDDEN), jnp.float32)

    def step(carry, x_t):
        h, c = carry
        gates = x_t @ w_ih.T + b_ih + h @ w_hh.T + b_hh
        i, f, g, o = jnp.split(gates, 4, axis=-1)
        i, f, o = jax.nn.sigmoid(i), jax.nn.sigmoid(f), jax.nn.sigmoid(o)
        g = jnp.tanh(g)
        c = f * c + i * g
        h = o * jnp.tanh(c)
        return (h, c), None

    (h, c), _ = jax.lax.scan(step, (h, c), jnp.transpose(x, (1, 0, 2)))
    return jax.nn.sigmoid(h @ w_fc.T + b_fc)


if __name__ == "__main__":
    B, T = 2, 8
    key = jax.random.PRNGKey(0)
    ks = jax.random.split(key, 7)

    k_lstm = 1.0 / np.sqrt(HIDDEN)
    k_fc = 1.0 / np.sqrt(HIDDEN)

    x = jax.random.normal(ks[0], (B, T, INPUT_SIZE), jnp.float32)
    w_ih = jax.random.uniform(ks[1], (4 * HIDDEN, INPUT_SIZE), jnp.float32,
                              -k_lstm, k_lstm)
    w_hh = jax.random.uniform(ks[2], (4 * HIDDEN, HIDDEN), jnp.float32,
                              -k_lstm, k_lstm)
    b_ih = jax.random.uniform(ks[3], (4 * HIDDEN,), jnp.float32, -k_lstm, k_lstm)
    b_hh = jax.random.uniform(ks[4], (4 * HIDDEN,), jnp.float32, -k_lstm, k_lstm)
    w_fc = jax.random.uniform(ks[5], (NUM_CLASSES, HIDDEN), jnp.float32,
                              -k_fc, k_fc)
    b_fc = jax.random.uniform(ks[6], (NUM_CLASSES,), jnp.float32, -k_fc, k_fc)

    out = lstm_forward(x, w_ih, w_hh, b_ih, b_hh, w_fc, b_fc)
    out = jax.block_until_ready(out)

    ref = lstm_reference(x, w_ih, w_hh, b_ih, b_hh, w_fc, b_fc)
    # Tolerance loosened vs pure-f32: matmul operands are bf16 and sigmoids use
    # the approximate EUP reciprocal (state/accumulation remain f32).
    np.testing.assert_allclose(np.asarray(out), np.asarray(ref),
                               rtol=2e-2, atol=2e-2)
    assert out.shape == (B, NUM_CLASSES)
    print("KERNEL_OK")
</pallas_src>

<mosaic_0001>
module attributes {stable_mosaic.version = 11 : i64} {
  func.func @lstm_kernel(%arg0: i32, %arg1: i32, %arg2: memref<1x64x384xbf16, #tpu.memory_space<vmem>>, %arg3: memref<384x1024xbf16, #tpu.memory_space<vmem>>, %arg4: memref<1x1024xf32, #tpu.memory_space<vmem>>, %arg5: memref<256x1024xbf16, #tpu.memory_space<vmem>>, %arg6: memref<256x128xbf16, #tpu.memory_space<vmem>>, %arg7: memref<1x128xf32, #tpu.memory_space<vmem>>, %arg8: memref<1x8x128xf32, #tpu.memory_space<vmem>>, %arg9: memref<64x1024xf32, #tpu.memory_space<vmem>>, %arg10: memref<8x256xf32, #tpu.memory_space<vmem>>, %arg11: memref<8x256xf32, #tpu.memory_space<vmem>>) attributes {dimension_semantics = [#tpu.dimension_semantics<parallel>, #tpu.dimension_semantics<arbitrary>], iteration_bounds = array<i64: 1, 1>, scalar_prefetch = 0 : i64, scratch_operands = 3 : i64, tpu.core_type = #tpu.core_type<tc>, window_params = [{transform_indices = @transform_0, window_bounds = array<i64: 1, 64, 384>}, {pipeline_mode = #tpu.pipeline_mode<synchronous>, transform_indices = @transform_1, window_bounds = array<i64: 384, 1024>}, {pipeline_mode = #tpu.pipeline_mode<synchronous>, transform_indices = @transform_2, window_bounds = array<i64: 1, 1024>}, {pipeline_mode = #tpu.pipeline_mode<synchronous>, transform_indices = @transform_3, window_bounds = array<i64: 256, 1024>}, {pipeline_mode = #tpu.pipeline_mode<synchronous>, transform_indices = @transform_4, window_bounds = array<i64: 256, 128>}, {pipeline_mode = #tpu.pipeline_mode<synchronous>, transform_indices = @transform_5, window_bounds = array<i64: 1, 128>}, {transform_indices = @transform_6, window_bounds = array<i64: 1, 8, 128>}]} {
    %c0_i32 = arith.constant 0 : i32
    %0 = arith.cmpi eq, %arg1, %c0_i32 : i32
    %1 = arith.extui %0 : i1 to i32
    %c0_i32_0 = arith.constant 0 : i32
    %2 = arith.cmpi ne, %1, %c0_i32_0 : i32
    scf.if %2 {
      %cst_108 = arith.constant 0.000000e+00 : f32
      %306 = vector.broadcast %cst_108 : f32 to vector<8x256xf32>
      %c0_109 = arith.constant 0 : index
      %c0_110 = arith.constant 0 : index
      %307 = vector.load %arg10[%c0_109, %c0_110] : memref<8x256xf32, #tpu.memory_space<vmem>>, vector<8x256xf32>
      tpu.vector_store %arg10[%c0_109, %c0_110], %306 {strides = array<i32>} : memref<8x256xf32, #tpu.memory_space<vmem>>, vector<8x256xf32>,
      %cst_111 = arith.constant 0.000000e+00 : f32
      %308 = vector.broadcast %cst_111 : f32 to vector<8x256xf32>
      %c0_112 = arith.constant 0 : index
      %c0_113 = arith.constant 0 : index
      %309 = vector.load %arg11[%c0_112, %c0_113] : memref<8x256xf32, #tpu.memory_space<vmem>>, vector<8x256xf32>
      tpu.vector_store %arg11[%c0_112, %c0_113], %308 {strides = array<i32>} : memref<8x256xf32, #tpu.memory_space<vmem>>, vector<8x256xf32>,
    } else {
    }
    %c0 = arith.constant 0 : index
    %c0_1 = arith.constant 0 : index
    %c0_2 = arith.constant 0 : index
    %3 = vector.load %arg2[%c0, %c0_1, %c0_2] : memref<1x64x384xbf16, #tpu.memory_space<vmem>>, vector<1x64x384xbf16>
    %4 = vector.shape_cast %3 : vector<1x64x384xbf16> to vector<64x384xbf16>
    %c0_3 = arith.constant 0 : index
    %c0_4 = arith.constant 0 : index
    %5 = vector.load %arg3[%c0_3, %c0_4] : memref<384x1024xbf16, #tpu.memory_space<vmem>>, vector<384x1024xbf16>
    %cst = arith.constant dense<0.000000e+00> : vector<64x1024xf32>
    %6 = tpu.matmul %4, %5, %cst {dimension_numbers = #tpu.dot_dimension_numbers<[1], [0], [0], [1], [0, 0, 1, 1], [], []>} : vector<64x384xbf16>, vector<384x1024xbf16>, vector<64x1024xf32> -> vector<64x1024xf32>
    %c0_5 = arith.constant 0 : index
    %c0_6 = arith.constant 0 : index
    %7 = vector.load %arg4[%c0_5, %c0_6] : memref<1x1024xf32, #tpu.memory_space<vmem>>, vector<1x1024xf32>
    %8 = vector.broadcast %7 : vector<1x1024xf32> to vector<64x1024xf32>
    %9 = arith.addf %6, %8 : vector<64x1024xf32>
    %c0_7 = arith.constant 0 : index
    %c0_8 = arith.constant 0 : index
    %10 = vector.load %arg9[%c0_7, %c0_8] : memref<64x1024xf32, #tpu.memory_space<vmem>>, vector<64x1024xf32>
    tpu.vector_store %arg9[%c0_7, %c0_8], %9 {strides = array<i32>} : memref<64x1024xf32, #tpu.memory_space<vmem>>, vector<64x1024xf32>,
    %c0_9 = arith.constant 0 : index
    %c0_10 = arith.constant 0 : index
    %11 = vector.load %arg10[%c0_9, %c0_10] : memref<8x256xf32, #tpu.memory_space<vmem>>, vector<8x256xf32>
    %c0_11 = arith.constant 0 : index
    %c0_12 = arith.constant 0 : index
    %12 = vector.load %arg11[%c0_11, %c0_12] : memref<8x256xf32, #tpu.memory_space<vmem>>, vector<8x256xf32>
    %c0_i32_13 = arith.constant 0 : i32
    %c8_i32 = arith.constant 8 : i32
    %13 = arith.muli %c0_i32_13, %c8_i32 : i32
    %14 = tpu.assume_multiple %13, 8 : i32
    %15 = arith.index_cast %14 : i32 to index
    %c0_14 = arith.constant 0 : index
    %16 = vector.load %arg9[%15, %c0_14] : memref<64x1024xf32, #tpu.memory_space<vmem>>, vector<8x1024xf32>
    %17 = arith.truncf %11 : vector<8x256xf32> to vector<8x256xbf16>
    %c0_15 = arith.constant 0 : index
    %c0_16 = arith.constant 0 : index
    %18 = vector.load %arg5[%c0_15, %c0_16] : memref<256x1024xbf16, #tpu.memory_space<vmem>>, vector<256x1024xbf16>
    %cst_17 = arith.constant dense<0.000000e+00> : vector<8x1024xf32>
    %19 = tpu.matmul %17, %18, %cst_17 {dimension_numbers = #tpu.dot_dimension_numbers<[1], [0], [0], [1], [0, 0, 1, 1], [], []>} : vector<8x256xbf16>, vector<256x1024xbf16>, vector<8x1024xf32> -> vector<8x1024xf32>
    %20 = arith.addf %16, %19 : vector<8x1024xf32>
    %21 = vector.extract_strided_slice %20 {offsets = [0, 0], sizes = [8, 256], strides = [1, 1]} : vector<8x1024xf32> to vector<8x256xf32>
    %cst_18 = arith.constant 0.000000e+00 : f32
    %22 = vector.broadcast %cst_18 : f32 to vector<8x256xf32>
    %23 = arith.subf %22, %21 : vector<8x256xf32>
    %24 = math.exp %23 : vector<8x256xf32>
    %cst_19 = arith.constant 1.000000e+00 : f32
    %25 = vector.broadcast %cst_19 : f32 to vector<8x256xf32>
    %26 = arith.addf %25, %24 : vector<8x256xf32>
    %27 = tpu.reciprocal %26 {approx = true} : vector<8x256xf32> -> vector<8x256xf32>
    %28 = vector.extract_strided_slice %20 {offsets = [0, 256], sizes = [8, 256], strides = [1, 1]} : vector<8x1024xf32> to vector<8x256xf32>
    %cst_20 = arith.constant 0.000000e+00 : f32
    %29 = vector.broadcast %cst_20 : f32 to vector<8x256xf32>
    %30 = arith.subf %29, %28 : vector<8x256xf32>
    %31 = math.exp %30 : vector<8x256xf32>
    %cst_21 = arith.constant 1.000000e+00 : f32
    %32 = vector.broadcast %cst_21 : f32 to vector<8x256xf32>
    %33 = arith.addf %32, %31 : vector<8x256xf32>
    %34 = tpu.reciprocal %33 {approx = true} : vector<8x256xf32> -> vector<8x256xf32>
    %35 = vector.extract_strided_slice %20 {offsets = [0, 512], sizes = [8, 256], strides = [1, 1]} : vector<8x1024xf32> to vector<8x256xf32>
    %36 = math.tanh %35 : vector<8x256xf32>
    %37 = vector.extract_strided_slice %20 {offsets = [0, 768], sizes = [8, 256], strides = [1, 1]} : vector<8x1024xf32> to vector<8x256xf32>
    %cst_22 = arith.constant 0.000000e+00 : f32
    %38 = vector.broadcast %cst_22 : f32 to vector<8x256xf32>
    %39 = arith.subf %38, %37 : vector<8x256xf32>
    %40 = math.exp %39 : vector<8x256xf32>
    %cst_23 = arith.constant 1.000000e+00 : f32
    %41 = vector.broadcast %cst_23 : f32 to vector<8x256xf32>
    %42 = arith.addf %41, %40 : vector<8x256xf32>
    %43 = tpu.reciprocal %42 {approx = true} : vector<8x256xf32> -> vector<8x256xf32>
    %44 = arith.mulf %34, %12 : vector<8x256xf32>
    %45 = arith.mulf %27, %36 : vector<8x256xf32>
    %46 = arith.addf %44, %45 : vector<8x256xf32>
    %47 = math.tanh %46 : vector<8x256xf32>
    %48 = arith.mulf %43, %47 : vector<8x256xf32>
    %c1_i32 = arith.constant 1 : i32
    %c8_i32_24 = arith.constant 8 : i32
    %49 = arith.muli %c1_i32, %c8_i32_24 : i32
    %50 = tpu.assume_multiple %49, 8 : i32
    %51 = arith.index_cast %50 : i32 to index
    %c0_25 = arith.constant 0 : index
    %52 = vector.load %arg9[%51, %c0_25] : memref<64x1024xf32, #tpu.memory_space<vmem>>, vector<8x1024xf32>
    %53 = arith.truncf %48 : vector<8x256xf32> to vector<8x256xbf16>
    %c0_26 = arith.constant 0 : index
    %c0_27 = arith.constant 0 : index
    %54 = vector.load %arg5[%c0_26, %c0_27] : memref<256x1024xbf16, #tpu.memory_space<vmem>>, vector<256x1024xbf16>
    %cst_28 = arith.constant dense<0.000000e+00> : vector<8x1024xf32>
    %55 = tpu.matmul %53, %54, %cst_28 {dimension_numbers = #tpu.dot_dimension_numbers<[1], [0], [0], [1], [0, 0, 1, 1], [], []>} : vector<8x256xbf16>, vector<256x1024xbf16>, vector<8x1024xf32> -> vector<8x1024xf32>
    %56 = arith.addf %52, %55 : vector<8x1024xf32>
    %57 = vector.extract_strided_slice %56 {offsets = [0, 0], sizes = [8, 256], strides = [1, 1]} : vector<8x1024xf32> to vector<8x256xf32>
    %cst_29 = arith.constant 0.000000e+00 : f32
    %58 = vector.broadcast %cst_29 : f32 to vector<8x256xf32>
    %59 = arith.subf %58, %57 : vector<8x256xf32>
    %60 = math.exp %59 : vector<8x256xf32>
    %cst_30 = arith.constant 1.000000e+00 : f32
    %61 = vector.broadcast %cst_30 : f32 to vector<8x256xf32>
    %62 = arith.addf %61, %60 : vector<8x256xf32>
    %63 = tpu.reciprocal %62 {approx = true} : vector<8x256xf32> -> vector<8x256xf32>
    %64 = vector.extract_strided_slice %56 {offsets = [0, 256], sizes = [8, 256], strides = [1, 1]} : vector<8x1024xf32> to vector<8x256xf32>
    %cst_31 = arith.constant 0.000000e+00 : f32
    %65 = vector.broadcast %cst_31 : f32 to vector<8x256xf32>
    %66 = arith.subf %65, %64 : vector<8x256xf32>
    %67 = math.exp %66 : vector<8x256xf32>
    %cst_32 = arith.constant 1.000000e+00 : f32
    %68 = vector.broadcast %cst_32 : f32 to vector<8x256xf32>
    %69 = arith.addf %68, %67 : vector<8x256xf32>
    %70 = tpu.reciprocal %69 {approx = true} : vector<8x256xf32> -> vector<8x256xf32>
    %71 = vector.extract_strided_slice %56 {offsets = [0, 512], sizes = [8, 256], strides = [1, 1]} : vector<8x1024xf32> to vector<8x256xf32>
    %72 = math.tanh %71 : vector<8x256xf32>
    %73 = vector.extract_strided_slice %56 {offsets = [0, 768], sizes = [8, 256], strides = [1, 1]} : vector<8x1024xf32> to vector<8x256xf32>
    %cst_33 = arith.constant 0.000000e+00 : f32
    %74 = vector.broadcast %cst_33 : f32 to vector<8x256xf32>
    %75 = arith.subf %74, %73 : vector<8x256xf32>
    %76 = math.exp %75 : vector<8x256xf32>
    %cst_34 = arith.constant 1.000000e+00 : f32
    %77 = vector.broadcast %cst_34 : f32 to vector<8x256xf32>
    %78 = arith.addf %77, %76 : vector<8x256xf32>
    %79 = tpu.reciprocal %78 {approx = true} : vector<8x256xf32> -> vector<8x256xf32>
    %80 = arith.mulf %70, %46 : vector<8x256xf32>
    %81 = arith.mulf %63, %72 : vector<8x256xf32>
    %82 = arith.addf %80, %81 : vector<8x256xf32>
    %83 = math.tanh %82 : vector<8x256xf32>
    %84 = arith.mulf %79, %83 : vector<8x256xf32>
    %c2_i32 = arith.constant 2 : i32
    %c8_i32_35 = arith.constant 8 : i32
    %85 = arith.muli %c2_i32, %c8_i32_35 : i32
    %86 = tpu.assume_multiple %85, 8 : i32
    %87 = arith.index_cast %86 : i32 to index
    %c0_36 = arith.constant 0 : index
    %88 = vector.load %arg9[%87, %c0_36] : memref<64x1024xf32, #tpu.memory_space<vmem>>, vector<8x1024xf32>
    %89 = arith.truncf %84 : vector<8x256xf32> to vector<8x256xbf16>
    %c0_37 = arith.constant 0 : index
    %c0_38 = arith.constant 0 : index
    %90 = vector.load %arg5[%c0_37, %c0_38] : memref<256x1024xbf16, #tpu.memory_space<vmem>>, vector<256x1024xbf16>
    %cst_39 = arith.constant dense<0.000000e+00> : vector<8x1024xf32>
    %91 = tpu.matmul %89, %90, %cst_39 {dimension_numbers = #tpu.dot_dimension_numbers<[1], [0], [0], [1], [0, 0, 1, 1], [], []>} : vector<8x256xbf16>, vector<256x1024xbf16>, vector<8x1024xf32> -> vector<8x1024xf32>
    %92 = arith.addf %88, %91 : vector<8x1024xf32>
    %93 = vector.extract_strided_slice %92 {offsets = [0, 0], sizes = [8, 256], strides = [1, 1]} : vector<8x1024xf32> to vector<8x256xf32>
    %cst_40 = arith.constant 0.000000e+00 : f32
    %94 = vector.broadcast %cst_40 : f32 to vector<8x256xf32>
    %95 = arith.subf %94, %93 : vector<8x256xf32>
    %96 = math.exp %95 : vector<8x256xf32>
    %cst_41 = arith.constant 1.000000e+00 : f32
    %97 = vector.broadcast %cst_41 : f32 to vector<8x256xf32>
    %98 = arith.addf %97, %96 : vector<8x256xf32>
    %99 = tpu.reciprocal %98 {approx = true} : vector<8x256xf32> -> vector<8x256xf32>
    %100 = vector.extract_strided_slice %92 {offsets = [0, 256], sizes = [8, 256], strides = [1, 1]} : vector<8x1024xf32> to vector<8x256xf32>
    %cst_42 = arith.constant 0.000000e+00 : f32
    %101 = vector.broadcast %cst_42 : f32 to vector<8x256xf32>
    %102 = arith.subf %101, %100 : vector<8x256xf32>
    %103 = math.exp %102 : vector<8x256xf32>
    %cst_43 = arith.constant 1.000000e+00 : f32
    %104 = vector.broadcast %cst_43 : f32 to vector<8x256xf32>
    %105 = arith.addf %104, %103 : vector<8x256xf32>
    %106 = tpu.reciprocal %105 {approx = true} : vector<8x256xf32> -> vector<8x256xf32>
    %107 = vector.extract_strided_slice %92 {offsets = [0, 512], sizes = [8, 256], strides = [1, 1]} : vector<8x1024xf32> to vector<8x256xf32>
    %108 = math.tanh %107 : vector<8x256xf32>
    %109 = vector.extract_strided_slice %92 {offsets = [0, 768], sizes = [8, 256], strides = [1, 1]} : vector<8x1024xf32> to vector<8x256xf32>
    %cst_44 = arith.constant 0.000000e+00 : f32
    %110 = vector.broadcast %cst_44 : f32 to vector<8x256xf32>
    %111 = arith.subf %110, %109 : vector<8x256xf32>
    %112 = math.exp %111 : vector<8x256xf32>
    %cst_45 = arith.constant 1.000000e+00 : f32
    %113 = vector.broadcast %cst_45 : f32 to vector<8x256xf32>
    %114 = arith.addf %113, %112 : vector<8x256xf32>
    %115 = tpu.reciprocal %114 {approx = true} : vector<8x256xf32> -> vector<8x256xf32>
    %116 = arith.mulf %106, %82 : vector<8x256xf32>
    %117 = arith.mulf %99, %108 : vector<8x256xf32>
    %118 = arith.addf %116, %117 : vector<8x256xf32>
    %119 = math.tanh %118 : vector<8x256xf32>
    %120 = arith.mulf %115, %119 : vector<8x256xf32>
    %c3_i32 = arith.constant 3 : i32
    %c8_i32_46 = arith.constant 8 : i32
    %121 = arith.muli %c3_i32, %c8_i32_46 : i32
    %122 = tpu.assume_multiple %121, 8 : i32
    %123 = arith.index_cast %122 : i32 to index
    %c0_47 = arith.constant 0 : index
    %124 = vector.load %arg9[%123, %c0_47] : memref<64x1024xf32, #tpu.memory_space<vmem>>, vector<8x1024xf32>
    %125 = arith.truncf %120 : vector<8x256xf32> to vector<8x256xbf16>
    %c0_48 = arith.constant 0 : index
    %c0_49 = arith.constant 0 : index
    %126 = vector.load %arg5[%c0_48, %c0_49] : memref<256x1024xbf16, #tpu.memory_space<vmem>>, vector<256x1024xbf16>
    %cst_50 = arith.constant dense<0.000000e+00> : vector<8x1024xf32>
    %127 = tpu.matmul %125, %126, %cst_50 {dimension_numbers = #tpu.dot_dimension_numbers<[1], [0], [0], [1], [0, 0, 1, 1], [], []>} : vector<8x256xbf16>, vector<256x1024xbf16>, vector<8x1024xf32> -> vector<8x1024xf32>
    %128 = arith.addf %124, %127 : vector<8x1024xf32>
    %129 = vector.extract_strided_slice %128 {offsets = [0, 0], sizes = [8, 256], strides = [1, 1]} : vector<8x1024xf32> to vector<8x256xf32>
    %cst_51 = arith.constant 0.000000e+00 : f32
    %130 = vector.broadcast %cst_51 : f32 to vector<8x256xf32>
    %131 = arith.subf %130, %129 : vector<8x256xf32>
    %132 = math.exp %131 : vector<8x256xf32>
    %cst_52 = arith.constant 1.000000e+00 : f32
    %133 = vector.broadcast %cst_52 : f32 to vector<8x256xf32>
    %134 = arith.addf %133, %132 : vector<8x256xf32>
    %135 = tpu.reciprocal %134 {approx = true} : vector<8x256xf32> -> vector<8x256xf32>
    %136 = vector.extract_strided_slice %128 {offsets = [0, 256], sizes = [8, 256], strides = [1, 1]} : vector<8x1024xf32> to vector<8x256xf32>
    %cst_53 = arith.constant 0.000000e+00 : f32
    %137 = vector.broadcast %cst_53 : f32 to vector<8x256xf32>
    %138 = arith.subf %137, %136 : vector<8x256xf32>
    %139 = math.exp %138 : vector<8x256xf32>
    %cst_54 = arith.constant 1.000000e+00 : f32
    %140 = vector.broadcast %cst_54 : f32 to vector<8x256xf32>
    %141 = arith.addf %140, %139 : vector<8x256xf32>
    %142 = tpu.reciprocal %141 {approx = true} : vector<8x256xf32> -> vector<8x256xf32>
    %143 = vector.extract_strided_slice %128 {offsets = [0, 512], sizes = [8, 256], strides = [1, 1]} : vector<8x1024xf32> to vector<8x256xf32>
    %144 = math.tanh %143 : vector<8x256xf32>
    %145 = vector.extract_strided_slice %128 {offsets = [0, 768], sizes = [8, 256], strides = [1, 1]} : vector<8x1024xf32> to vector<8x256xf32>
    %cst_55 = arith.constant 0.000000e+00 : f32
    %146 = vector.broadcast %cst_55 : f32 to vector<8x256xf32>
    %147 = arith.subf %146, %145 : vector<8x256xf32>
    %148 = math.exp %147 : vector<8x256xf32>
    %cst_56 = arith.constant 1.000000e+00 : f32
    %149 = vector.broadcast %cst_56 : f32 to vector<8x256xf32>
    %150 = arith.addf %149, %148 : vector<8x256xf32>
    %151 = tpu.reciprocal %150 {approx = true} : vector<8x256xf32> -> vector<8x256xf32>
    %152 = arith.mulf %142, %118 : vector<8x256xf32>
    %153 = arith.mulf %135, %144 : vector<8x256xf32>
    %154 = arith.addf %152, %153 : vector<8x256xf32>
    %155 = math.tanh %154 : vector<8x256xf32>
    %156 = arith.mulf %151, %155 : vector<8x256xf32>
    %c4_i32 = arith.constant 4 : i32
    %c8_i32_57 = arith.constant 8 : i32
    %157 = arith.muli %c4_i32, %c8_i32_57 : i32
    %158 = tpu.assume_multiple %157, 8 : i32
    %159 = arith.index_cast %158 : i32 to index
    %c0_58 = arith.constant 0 : index
    %160 = vector.load %arg9[%159, %c0_58] : memref<64x1024xf32, #tpu.memory_space<vmem>>, vector<8x1024xf32>
    %161 = arith.truncf %156 : vector<8x256xf32> to vector<8x256xbf16>
    %c0_59 = arith.constant 0 : index
    %c0_60 = arith.constant 0 : index
    %162 = vector.load %arg5[%c0_59, %c0_60] : memref<256x1024xbf16, #tpu.memory_space<vmem>>, vector<256x1024xbf16>
    %cst_61 = arith.constant dense<0.000000e+00> : vector<8x1024xf32>
    %163 = tpu.matmul %161, %162, %cst_61 {dimension_numbers = #tpu.dot_dimension_numbers<[1], [0], [0], [1], [0, 0, 1, 1], [], []>} : vector<8x256xbf16>, vector<256x1024xbf16>, vector<8x1024xf32> -> vector<8x1024xf32>
    %164 = arith.addf %160, %163 : vector<8x1024xf32>
    %165 = vector.extract_strided_slice %164 {offsets = [0, 0], sizes = [8, 256], strides = [1, 1]} : vector<8x1024xf32> to vector<8x256xf32>
    %cst_62 = arith.constant 0.000000e+00 : f32
    %166 = vector.broadcast %cst_62 : f32 to vector<8x256xf32>
    %167 = arith.subf %166, %165 : vector<8x256xf32>
    %168 = math.exp %167 : vector<8x256xf32>
    %cst_63 = arith.constant 1.000000e+00 : f32
    %169 = vector.broadcast %cst_63 : f32 to vector<8x256xf32>
    %170 = arith.addf %169, %168 : vector<8x256xf32>
    %171 = tpu.reciprocal %170 {approx = true} : vector<8x256xf32> -> vector<8x256xf32>
    %172 = vector.extract_strided_slice %164 {offsets = [0, 256], sizes = [8, 256], strides = [1, 1]} : vector<8x1024xf32> to vector<8x256xf32>
    %cst_64 = arith.constant 0.000000e+00 : f32
    %173 = vector.broadcast %cst_64 : f32 to vector<8x256xf32>
    %174 = arith.subf %173, %172 : vector<8x256xf32>
    %175 = math.exp %174 : vector<8x256xf32>
    %cst_65 = arith.constant 1.000000e+00 : f32
    %176 = vector.broadcast %cst_65 : f32 to vector<8x256xf32>
    %177 = arith.addf %176, %175 : vector<8x256xf32>
    %178 = tpu.reciprocal %177 {approx = true} : vector<8x256xf32> -> vector<8x256xf32>
    %179 = vector.extract_strided_slice %164 {offsets = [0, 512], sizes = [8, 256], strides = [1, 1]} : vector<8x1024xf32> to vector<8x256xf32>
    %180 = math.tanh %179 : vector<8x256xf32>
    %181 = vector.extract_strided_slice %164 {offsets = [0, 768], sizes = [8, 256], strides = [1, 1]} : vector<8x1024xf32> to vector<8x256xf32>
    %cst_66 = arith.constant 0.000000e+00 : f32
    %182 = vector.broadcast %cst_66 : f32 to vector<8x256xf32>
    %183 = arith.subf %182, %181 : vector<8x256xf32>
    %184 = math.exp %183 : vector<8x256xf32>
    %cst_67 = arith.constant 1.000000e+00 : f32
    %185 = vector.broadcast %cst_67 : f32 to vector<8x256xf32>
    %186 = arith.addf %185, %184 : vector<8x256xf32>
    %187 = tpu.reciprocal %186 {approx = true} : vector<8x256xf32> -> vector<8x256xf32>
    %188 = arith.mulf %178, %154 : vector<8x256xf32>
    %189 = arith.mulf %171, %180 : vector<8x256xf32>
    %190 = arith.addf %188, %189 : vector<8x256xf32>
    %191 = math.tanh %190 : vector<8x256xf32>
    %192 = arith.mulf %187, %191 : vector<8x256xf32>
    %c5_i32 = arith.constant 5 : i32
    %c8_i32_68 = arith.constant 8 : i32
    %193 = arith.muli %c5_i32, %c8_i32_68 : i32
    %194 = tpu.assume_multiple %193, 8 : i32
    %195 = arith.index_cast %194 : i32 to index
    %c0_69 = arith.constant 0 : index
    %196 = vector.load %arg9[%195, %c0_69] : memref<64x1024xf32, #tpu.memory_space<vmem>>, vector<8x1024xf32>
    %197 = arith.truncf %192 : vector<8x256xf32> to vector<8x256xbf16>
    %c0_70 = arith.constant 0 : index
    %c0_71 = arith.constant 0 : index
    %198 = vector.load %arg5[%c0_70, %c0_71] : memref<256x1024xbf16, #tpu.memory_space<vmem>>, vector<256x1024xbf16>
    %cst_72 = arith.constant dense<0.000000e+00> : vector<8x1024xf32>
    %199 = tpu.matmul %197, %198, %cst_72 {dimension_numbers = #tpu.dot_dimension_numbers<[1], [0], [0], [1], [0, 0, 1, 1], [], []>} : vector<8x256xbf16>, vector<256x1024xbf16>, vector<8x1024xf32> -> vector<8x1024xf32>
    %200 = arith.addf %196, %199 : vector<8x1024xf32>
    %201 = vector.extract_strided_slice %200 {offsets = [0, 0], sizes = [8, 256], strides = [1, 1]} : vector<8x1024xf32> to vector<8x256xf32>
    %cst_73 = arith.constant 0.000000e+00 : f32
    %202 = vector.broadcast %cst_73 : f32 to vector<8x256xf32>
    %203 = arith.subf %202, %201 : vector<8x256xf32>
    %204 = math.exp %203 : vector<8x256xf32>
    %cst_74 = arith.constant 1.000000e+00 : f32
    %205 = vector.broadcast %cst_74 : f32 to vector<8x256xf32>
    %206 = arith.addf %205, %204 : vector<8x256xf32>
    %207 = tpu.reciprocal %206 {approx = true} : vector<8x256xf32> -> vector<8x256xf32>
    %208 = vector.extract_strided_slice %200 {offsets = [0, 256], sizes = [8, 256], strides = [1, 1]} : vector<8x1024xf32> to vector<8x256xf32>
    %cst_75 = arith.constant 0.000000e+00 : f32
    %209 = vector.broadcast %cst_75 : f32 to vector<8x256xf32>
    %210 = arith.subf %209, %208 : vector<8x256xf32>
    %211 = math.exp %210 : vector<8x256xf32>
    %cst_76 = arith.constant 1.000000e+00 : f32
    %212 = vector.broadcast %cst_76 : f32 to vector<8x256xf32>
    %213 = arith.addf %212, %211 : vector<8x256xf32>
    %214 = tpu.reciprocal %213 {approx = true} : vector<8x256xf32> -> vector<8x256xf32>
    %215 = vector.extract_strided_slice %200 {offsets = [0, 512], sizes = [8, 256], strides = [1, 1]} : vector<8x1024xf32> to vector<8x256xf32>
    %216 = math.tanh %215 : vector<8x256xf32>
    %217 = vector.extract_strided_slice %200 {offsets = [0, 768], sizes = [8, 256], strides = [1, 1]} : vector<8x1024xf32> to vector<8x256xf32>
    %cst_77 = arith.constant 0.000000e+00 : f32
    %218 = vector.broadcast %cst_77 : f32 to vector<8x256xf32>
    %219 = arith.subf %218, %217 : vector<8x256xf32>
    %220 = math.exp %219 : vector<8x256xf32>
    %cst_78 = arith.constant 1.000000e+00 : f32
    %221 = vector.broadcast %cst_78 : f32 to vector<8x256xf32>
    %222 = arith.addf %221, %220 : vector<8x256xf32>
    %223 = tpu.reciprocal %222 {approx = true} : vector<8x256xf32> -> vector<8x256xf32>
    %224 = arith.mulf %214, %190 : vector<8x256xf32>
    %225 = arith.mulf %207, %216 : vector<8x256xf32>
    %226 = arith.addf %224, %225 : vector<8x256xf32>
    %227 = math.tanh %226 : vector<8x256xf32>
    %228 = arith.mulf %223, %227 : vector<8x256xf32>
    %c6_i32 = arith.constant 6 : i32
    %c8_i32_79 = arith.constant 8 : i32
    %229 = arith.muli %c6_i32, %c8_i32_79 : i32
    %230 = tpu.assume_multiple %229, 8 : i32
    %231 = arith.index_cast %230 : i32 to index
    %c0_80 = arith.constant 0 : index
    %232 = vector.load %arg9[%231, %c0_80] : memref<64x1024xf32, #tpu.memory_space<vmem>>, vector<8x1024xf32>
    %233 = arith.truncf %228 : vector<8x256xf32> to vector<8x256xbf16>
    %c0_81 = arith.constant 0 : index
    %c0_82 = arith.constant 0 : index
    %234 = vector.load %arg5[%c0_81, %c0_82] : memref<256x1024xbf16, #tpu.memory_space<vmem>>, vector<256x1024xbf16>
    %cst_83 = arith.constant dense<0.000000e+00> : vector<8x1024xf32>
    %235 = tpu.matmul %233, %234, %cst_83 {dimension_numbers = #tpu.dot_dimension_numbers<[1], [0], [0], [1], [0, 0, 1, 1], [], []>} : vector<8x256xbf16>, vector<256x1024xbf16>, vector<8x1024xf32> -> vector<8x1024xf32>
    %236 = arith.addf %232, %235 : vector<8x1024xf32>
    %237 = vector.extract_strided_slice %236 {offsets = [0, 0], sizes = [8, 256], strides = [1, 1]} : vector<8x1024xf32> to vector<8x256xf32>
    %cst_84 = arith.constant 0.000000e+00 : f32
    %238 = vector.broadcast %cst_84 : f32 to vector<8x256xf32>
    %239 = arith.subf %238, %237 : vector<8x256xf32>
    %240 = math.exp %239 : vector<8x256xf32>
    %cst_85 = arith.constant 1.000000e+00 : f32
    %241 = vector.broadcast %cst_85 : f32 to vector<8x256xf32>
    %242 = arith.addf %241, %240 : vector<8x256xf32>
    %243 = tpu.reciprocal %242 {approx = true} : vector<8x256xf32> -> vector<8x256xf32>
    %244 = vector.extract_strided_slice %236 {offsets = [0, 256], sizes = [8, 256], strides = [1, 1]} : vector<8x1024xf32> to vector<8x256xf32>
    %cst_86 = arith.constant 0.000000e+00 : f32
    %245 = vector.broadcast %cst_86 : f32 to vector<8x256xf32>
    %246 = arith.subf %245, %244 : vector<8x256xf32>
    %247 = math.exp %246 : vector<8x256xf32>
    %cst_87 = arith.constant 1.000000e+00 : f32
    %248 = vector.broadcast %cst_87 : f32 to vector<8x256xf32>
    %249 = arith.addf %248, %247 : vector<8x256xf32>
    %250 = tpu.reciprocal %249 {approx = true} : vector<8x256xf32> -> vector<8x256xf32>
    %251 = vector.extract_strided_slice %236 {offsets = [0, 512], sizes = [8, 256], strides = [1, 1]} : vector<8x1024xf32> to vector<8x256xf32>
    %252 = math.tanh %251 : vector<8x256xf32>
    %253 = vector.extract_strided_slice %236 {offsets = [0, 768], sizes = [8, 256], strides = [1, 1]} : vector<8x1024xf32> to vector<8x256xf32>
    %cst_88 = arith.constant 0.000000e+00 : f32
    %254 = vector.broadcast %cst_88 : f32 to vector<8x256xf32>
    %255 = arith.subf %254, %253 : vector<8x256xf32>
    %256 = math.exp %255 : vector<8x256xf32>
    %cst_89 = arith.constant 1.000000e+00 : f32
    %257 = vector.broadcast %cst_89 : f32 to vector<8x256xf32>
    %258 = arith.addf %257, %256 : vector<8x256xf32>
    %259 = tpu.reciprocal %258 {approx = true} : vector<8x256xf32> -> vector<8x256xf32>
    %260 = arith.mulf %250, %226 : vector<8x256xf32>
    %261 = arith.mulf %243, %252 : vector<8x256xf32>
    %262 = arith.addf %260, %261 : vector<8x256xf32>
    %263 = math.tanh %262 : vector<8x256xf32>
    %264 = arith.mulf %259, %263 : vector<8x256xf32>
    %c7_i32 = arith.constant 7 : i32
    %c8_i32_90 = arith.constant 8 : i32
    %265 = arith.muli %c7_i32, %c8_i32_90 : i32
    %266 = tpu.assume_multiple %265, 8 : i32
    %267 = arith.index_cast %266 : i32 to index
    %c0_91 = arith.constant 0 : index
    %268 = vector.load %arg9[%267, %c0_91] : memref<64x1024xf32, #tpu.memory_space<vmem>>, vector<8x1024xf32>
    %269 = arith.truncf %264 : vector<8x256xf32> to vector<8x256xbf16>
    %c0_92 = arith.constant 0 : index
    %c0_93 = arith.constant 0 : index
    %270 = vector.load %arg5[%c0_92, %c0_93] : memref<256x1024xbf16, #tpu.memory_space<vmem>>, vector<256x1024xbf16>
    %cst_94 = arith.constant dense<0.000000e+00> : vector<8x1024xf32>
    %271 = tpu.matmul %269, %270, %cst_94 {dimension_numbers = #tpu.dot_dimension_numbers<[1], [0], [0], [1], [0, 0, 1, 1], [], []>} : vector<8x256xbf16>, vector<256x1024xbf16>, vector<8x1024xf32> -> vector<8x1024xf32>
    %272 = arith.addf %268, %271 : vector<8x1024xf32>
    %273 = vector.extract_strided_slice %272 {offsets = [0, 0], sizes = [8, 256], strides = [1, 1]} : vector<8x1024xf32> to vector<8x256xf32>
    %cst_95 = arith.constant 0.000000e+00 : f32
    %274 = vector.broadcast %cst_95 : f32 to vector<8x256xf32>
    %275 = arith.subf %274, %273 : vector<8x256xf32>
    %276 = math.exp %275 : vector<8x256xf32>
    %cst_96 = arith.constant 1.000000e+00 : f32
    %277 = vector.broadcast %cst_96 : f32 to vector<8x256xf32>
    %278 = arith.addf %277, %276 : vector<8x256xf32>
    %279 = tpu.reciprocal %278 {approx = true} : vector<8x256xf32> -> vector<8x256xf32>
    %280 = vector.extract_strided_slice %272 {offsets = [0, 256], sizes = [8, 256], strides = [1, 1]} : vector<8x1024xf32> to vector<8x256xf32>
    %cst_97 = arith.constant 0.000000e+00 : f32
    %281 = vector.broadcast %cst_97 : f32 to vector<8x256xf32>
    %282 = arith.subf %281, %280 : vector<8x256xf32>
    %283 = math.exp %282 : vector<8x256xf32>
    %cst_98 = arith.constant 1.000000e+00 : f32
    %284 = vector.broadcast %cst_98 : f32 to vector<8x256xf32>
    %285 = arith.addf %284, %283 : vector<8x256xf32>
    %286 = tpu.reciprocal %285 {approx = true} : vector<8x256xf32> -> vector<8x256xf32>
    %287 = vector.extract_strided_slice %272 {offsets = [0, 512], sizes = [8, 256], strides = [1, 1]} : vector<8x1024xf32> to vector<8x256xf32>
    %288 = math.tanh %287 : vector<8x256xf32>
    %289 = vector.extract_strided_slice %272 {offsets = [0, 768], sizes = [8, 256], strides = [1, 1]} : vector<8x1024xf32> to vector<8x256xf32>
    %cst_99 = arith.constant 0.000000e+00 : f32
    %290 = vector.broadcast %cst_99 : f32 to vector<8x256xf32>
    %291 = arith.subf %290, %289 : vector<8x256xf32>
    %292 = math.exp %291 : vector<8x256xf32>
    %cst_100 = arith.constant 1.000000e+00 : f32
    %293 = vector.broadcast %cst_100 : f32 to vector<8x256xf32>
    %294 = arith.addf %293, %292 : vector<8x256xf32>
    %295 = tpu.reciprocal %294 {approx = true} : vector<8x256xf32> -> vector<8x256xf32>
    %296 = arith.mulf %286, %262 : vector<8x256xf32>
    %297 = arith.mulf %279, %288 : vector<8x256xf32>
    %298 = arith.addf %296, %297 : vector<8x256xf32>
    %299 = math.tanh %298 : vector<8x256xf32>
    %300 = arith.mulf %295, %299 : vector<8x256xf32>
    %c8_i32_101 = arith.constant 8 : i32
    %c0_102 = arith.constant 0 : index
    %c0_103 = arith.constant 0 : index
    %301 = vector.load %arg10[%c0_102, %c0_103] : memref<8x256xf32, #tpu.memory_space<vmem>>, vector<8x256xf32>
    tpu.vector_store %arg10[%c0_102, %c0_103], %300 {strides = array<i32>} : memref<8x256xf32, #tpu.memory_space<vmem>>, vector<8x256xf32>,
    %c0_104 = arith.constant 0 : index
    %c0_105 = arith.constant 0 : index
    %302 = vector.load %arg11[%c0_104, %c0_105] : memref<8x256xf32, #tpu.memory_space<vmem>>, vector<8x256xf32>
    tpu.vector_store %arg11[%c0_104, %c0_105], %298 {strides = array<i32>} : memref<8x256xf32, #tpu.memory_space<vmem>>, vector<8x256xf32>,
    %c0_i32_106 = arith.constant 0 : i32
    %303 = arith.cmpi eq, %arg1, %c0_i32_106 : i32
    %304 = arith.extui %303 : i1 to i32
    %c0_i32_107 = arith.constant 0 : i32
    %305 = arith.cmpi ne, %304, %c0_i32_107 : i32
    scf.if %305 {
      %306 = arith.truncf %300 : vector<8x256xf32> to vector<8x256xbf16>
      %c0_108 = arith.constant 0 : index
      %c0_109 = arith.constant 0 : index
      %307 = vector.load %arg6[%c0_108, %c0_109] : memref<256x128xbf16, #tpu.memory_space<vmem>>, vector<256x128xbf16>
      %cst_110 = arith.constant dense<0.000000e+00> : vector<8x128xf32>
      %308 = tpu.matmul %306, %307, %cst_110 {dimension_numbers = #tpu.dot_dimension_numbers<[1], [0], [0], [1], [0, 0, 1, 1], [], []>} : vector<8x256xbf16>, vector<256x128xbf16>, vector<8x128xf32> -> vector<8x128xf32>
      %c0_111 = arith.constant 0 : index
      %c0_112 = arith.constant 0 : index
      %309 = vector.load %arg7[%c0_111, %c0_112] : memref<1x128xf32, #tpu.memory_space<vmem>>, vector<1x128xf32>
      %310 = vector.broadcast %309 : vector<1x128xf32> to vector<8x128xf32>
      %311 = arith.addf %308, %310 : vector<8x128xf32>
      %cst_113 = arith.constant 0.000000e+00 : f32
      %312 = vector.broadcast %cst_113 : f32 to vector<8x128xf32>
      %313 = arith.subf %312, %311 : vector<8x128xf32>
      %314 = math.exp %313 : vector<8x128xf32>
      %cst_114 = arith.constant 1.000000e+00 : f32
      %315 = vector.broadcast %cst_114 : f32 to vector<8x128xf32>
      %316 = arith.addf %315, %314 : vector<8x128xf32>
      %317 = tpu.reciprocal %316 {approx = true} : vector<8x128xf32> -> vector<8x128xf32>
      %c0_115 = arith.constant 0 : index
      %c0_116 = arith.constant 0 : index
      %c0_117 = arith.constant 0 : index
      %318 = vector.load %arg8[%c0_115, %c0_116, %c0_117] : memref<1x8x128xf32, #tpu.memory_space<vmem>>, vector<1x8x128xf32>
      %319 = vector.shape_cast %318 : vector<1x8x128xf32> to vector<8x128xf32>
      %320 = vector.shape_cast %317 : vector<8x128xf32> to vector<1x8x128xf32>
      tpu.vector_store %arg8[%c0_115, %c0_116, %c0_117], %320 {strides = array<i32>} : memref<1x8x128xf32, #tpu.memory_space<vmem>>, vector<1x8x128xf32>,
    } else {
    }
    return
  }
  func.func @transform_0(%arg0: i32, %arg1: i32) -> (i32, i32, i32) {
    %c0_i32 = arith.constant 0 : i32
    %c0_i32_0 = arith.constant 0 : i32
    return %arg0, %arg1, %c0_i32 : i32, i32, i32
  }
  func.func @transform_1(%arg0: i32, %arg1: i32) -> (i32, i32) {
    %c0_i32 = arith.constant 0 : i32
    %c0_i32_0 = arith.constant 0 : i32
    %c0_i32_1 = arith.constant 0 : i32
    return %c0_i32, %c0_i32_0 : i32, i32
  }
  func.func @transform_2(%arg0: i32, %arg1: i32) -> (i32, i32) {
    %c0_i32 = arith.constant 0 : i32
    %c0_i32_0 = arith.constant 0 : i32
    %c0_i32_1 = arith.constant 0 : i32
    return %c0_i32, %c0_i32_0 : i32, i32
  }
  func.func @transform_3(%arg0: i32, %arg1: i32) -> (i32, i32) {
    %c0_i32 = arith.constant 0 : i32
    %c0_i32_0 = arith.constant 0 : i32
    %c0_i32_1 = arith.constant 0 : i32
    return %c0_i32, %c0_i32_0 : i32, i32
  }
  func.func @transform_4(%arg0: i32, %arg1: i32) -> (i32, i32) {
    %c0_i32 = arith.constant 0 : i32
    %c0_i32_0 = arith.constant 0 : i32
    %c0_i32_1 = arith.constant 0 : i32
    return %c0_i32, %c0_i32_0 : i32, i32
  }
  func.func @transform_5(%arg0: i32, %arg1: i32) -> (i32, i32) {
    %c0_i32 = arith.constant 0 : i32
    %c0_i32_0 = arith.constant 0 : i32
    %c0_i32_1 = arith.constant 0 : i32
    return %c0_i32, %c0_i32_0 : i32, i32
  }
  func.func @transform_6(%arg0: i32, %arg1: i32) -> (i32, i32, i32) {
    %c0_i32 = arith.constant 0 : i32
    %c0_i32_0 = arith.constant 0 : i32
    %c0_i32_1 = arith.constant 0 : i32
    return %arg0, %c0_i32, %c0_i32_0 : i32, i32, i32
  }
}

</mosaic_0001>

<bundles_post_ra>
// kernel: lstm_forward.1
= control target key start
LH: loop header
LB: loop body
LE: loop exit
PB: predicated region body
PF: predicated region fallthrough
CT: control target
= control target key end

     0   :  { %s8392_s1 = inlined_call_operand.vmem [shape: bf16[384,1024], index: 1, kind: input, shape index: {}]   ;;  %s8393_s0 = inlined_call_operand.vmem [shape: bf16[1,64,384], index: 0, kind: input, shape index: {}]   ;;  %s8394_s3 = inlined_call_operand.vmem [shape: bf16[256,1024], index: 3, kind: input, shape index: {}]   ;;  %s8395_s2 = inlined_call_operand.vmem [shape: f32[1,1024], index: 2, kind: input, shape index: {}]   ;;  %s8396_s4 = inlined_call_operand.vmem [shape: bf16[256,128], index: 4, kind: input, shape index: {}]   ;;  %s8397_s5 = inlined_call_operand.vmem [shape: f32[1,128], index: 5, kind: input, shape index: {}]   ;;  %s8398_s6 = inlined_call_operand.vmem [shape: f32[1,8,128], index: 6, kind: output, shape index: {}]  }
   0x1   :  { %v48_v0 = vld [vmem:[%s8392_s1] sm:$0xff]  ;;  %v49_v2 = vld [vmem:[%s8392_s1 + $0x8] sm:$0xff] }
   0x2   :  { %v52_v1 = vld [vmem:[%s8392_s1 + $0x20] sm:$0xff]  ;;  %v53_v4 = vld [vmem:[%s8392_s1 + $0x28] sm:$0xff] }
   0x3   :  { %v4756_v3 = vcombine.high %v48_v0, %v52_v1  ;;  %v4755_v5 = vcombine.low %v48_v0, %v52_v1  ;;  %v56_v6 = vld [vmem:[%s8392_s1 + $0x40] sm:$0xff]  ;;  %v4758_v8 = vcombine.high %v49_v2, %v53_v4  ;;  %v4757_v9 = vcombine.low %v49_v2, %v53_v4  ;;  %v57_v11 = vld [vmem:[%s8392_s1 + $0x48] sm:$0xff] }
   0x4   :  { %v60_v7 = vld [vmem:[%s8392_s1 + $0x60] sm:$0xff]  ;;  %v61_v12 = vld [vmem:[%s8392_s1 + $0x68] sm:$0xff] }
   0x5   :  { %v4764_v10 = vcombine.high %v56_v6, %v60_v7  ;;  %v64_v13 = vld [vmem:[%s8392_s1 + $0x80] sm:$0xff]  ;;  %1306 = vmatprep.subr.bf16.mxu0 %v4756_v3  ;;  %v4766_v14 = vcombine.high %v57_v11, %v61_v12  ;;  %v65_v16 = vld [vmem:[%s8392_s1 + $0x88] sm:$0xff]  ;;  %1452 = vmatprep.subr.bf16.mxu1 %v4758_v8  ;;  %v4763_v18 = vcombine.low %v56_v6, %v60_v7 }
   0x6   :  { %v68_v15 = vld [vmem:[%s8392_s1 + $0xa0] sm:$0xff]  ;;  %v69_v17 = vld [vmem:[%s8392_s1 + $0xa8] sm:$0xff]  ;;  %1307 = vmatpush1.bf16.msra.mxu0 %v4755_v5  ;;  %1453 = vmatpush1.bf16.msra.mxu1 %v4757_v9  ;;  %v4765_v19 = vcombine.low %v57_v11, %v61_v12 }
   0x7   :  { %1308 = vmatprep.subr.bf16.mxu0 %v4764_v10  ;;  %v4772_v20 = vcombine.high %v64_v13, %v68_v15  ;;  %1454 = vmatprep.subr.bf16.mxu1 %v4766_v14  ;;  %v4774_v21 = vcombine.high %v65_v16, %v69_v17  ;;  %v72_v22 = vld [vmem:[%s8392_s1 + $0xc0] sm:$0xff]  ;;  %v73_v24 = vld [vmem:[%s8392_s1 + $0xc8] sm:$0xff]  ;;  %v4771_v26 = vcombine.low %v64_v13, %v68_v15 }
   0x8   :  { %v76_v23 = vld [vmem:[%s8392_s1 + $0xe0] sm:$0xff]  ;;  %v77_v25 = vld [vmem:[%s8392_s1 + $0xe8] sm:$0xff]  ;;  %v4773_v27 = vcombine.low %v65_v16, %v69_v17 }
   0x9   :  { %v4780_v28 = vcombine.high %v72_v22, %v76_v23  ;;  %v4782_v29 = vcombine.high %v73_v24, %v77_v25  ;;  %v80_v30 = vld [vmem:[%s8392_s1 + $0x100] sm:$0xff]  ;;  %v81_v32 = vld [vmem:[%s8392_s1 + $0x108] sm:$0xff]  ;;  %v4779_v34 = vcombine.low %v72_v22, %v76_v23  ;;  %v4781_v35 = vcombine.low %v73_v24, %v77_v25 }
   0xa   :  { %1309 = vmatpush1.bf16.msra.mxu0 %v4763_v18  ;;  %1455 = vmatpush1.bf16.msra.mxu1 %v4765_v19  ;;  %v84_v31 = vld [vmem:[%s8392_s1 + $0x120] sm:$0xff]  ;;  %v85_v33 = vld [vmem:[%s8392_s1 + $0x128] sm:$0xff] }
   0xb   :  { %1310 = vmatprep.subr.bf16.mxu0 %v4772_v20  ;;  %1456 = vmatprep.subr.bf16.mxu1 %v4774_v21  ;;  %v4788_v36 = vcombine.high %v80_v30, %v84_v31  ;;  %v4790_v37 = vcombine.high %v81_v32, %v85_v33  ;;  %v88_v38 = vld [vmem:[%s8392_s1 + $0x140] sm:$0xff]  ;;  %v89_v40 = vld [vmem:[%s8392_s1 + $0x148] sm:$0xff]  ;;  %v4787_v42 = vcombine.low %v80_v30, %v84_v31 }
   0xc   :  { %v92_v39 = vld [vmem:[%s8392_s1 + $0x160] sm:$0xff]  ;;  %v93_v41 = vld [vmem:[%s8392_s1 + $0x168] sm:$0xff]  ;;  %v4789_v43 = vcombine.low %v81_v32, %v85_v33 }
   0xd   :  { %v4796_v44 = vcombine.high %v88_v38, %v92_v39  ;;  %v4798_v45 = vcombine.high %v89_v40, %v93_v41  ;;  %v96_v46 = vld [vmem:[%s8392_s1 + $0x180] sm:$0xff]  ;;  %v97_v48 = vld [vmem:[%s8392_s1 + $0x188] sm:$0xff]  ;;  %v4795_v50 = vcombine.low %v88_v38, %v92_v39  ;;  %v4797_v51 = vcombine.low %v89_v40, %v93_v41 }
   0xe   :  { %1311 = vmatpush1.bf16.msra.mxu0 %v4771_v26  ;;  %1457 = vmatpush1.bf16.msra.mxu1 %v4773_v27  ;;  %v100_v47 = vld [vmem:[%s8392_s1 + $0x1a0] sm:$0xff]  ;;  %v101_v49 = vld [vmem:[%s8392_s1 + $0x1a8] sm:$0xff] }
   0xf   :  { %1312 = vmatprep.subr.bf16.mxu0 %v4780_v28  ;;  %1458 = vmatprep.subr.bf16.mxu1 %v4782_v29  ;;  %v4804_v52 = vcombine.high %v96_v46, %v100_v47  ;;  %v4806_v53 = vcombine.high %v97_v48, %v101_v49  ;;  %v104_v54 = vld [vmem:[%s8392_s1 + $0x1c0] sm:$0xff]  ;;  %v105_v57 = vld [vmem:[%s8392_s1 + $0x1c8] sm:$0xff]  ;;  %v4803_v59 = vcombine.low %v96_v46, %v100_v47 }
  0x10   :  { %v108_v55 = vld [vmem:[%s8392_s1 + $0x1e0] sm:$0xff]  ;;  %v109_v58 = vld [vmem:[%s8392_s1 + $0x1e8] sm:$0xff]  ;;  %v4805_v60 = vcombine.low %v97_v48, %v101_v49 }
  0x11   :  { %v5666_v56 = vld [vmem:[%s8393_s0 + $0x4] ss:$12 sps:$4 sm:$0xff]   ;;  %v4812_v61 = vcombine.high %v104_v54, %v108_v55  ;;  %v4814_v62 = vcombine.high %v105_v57, %v109_v58  ;;  %v113_v1 = vld [vmem:[%s8392_s1 + $0x208] sm:$0xff]  ;;  %v4811_v3 = vcombine.low %v104_v54, %v108_v55  ;;  %v4813_v4 = vcombine.low %v105_v57, %v109_v58 }
  0x12   :  { %1313 = vmatpush1.bf16.msra.mxu0 %v4779_v34  ;;  %1459 = vmatpush1.bf16.msra.mxu1 %v4781_v35  ;;  %v112_v63 = vld [vmem:[%s8392_s1 + $0x200] sm:$0xff]  ;;  %v117_v2 = vld [vmem:[%s8392_s1 + $0x228] sm:$0xff] }
  0x13   :  { %1314 = vmatprep.subr.bf16.mxu0 %v4788_v36  ;;  %1460 = vmatprep.subr.bf16.mxu1 %v4790_v37  ;;  %v116_v0 = vld [vmem:[%s8392_s1 + $0x220] sm:$0xff]  ;;  %v4822_v6 = vcombine.high %v113_v1, %v117_v2  ;;  %v121_v9 = vld [vmem:[%s8392_s1 + $0x248] sm:$0xff]  ;;  %v4821_v12 = vcombine.low %v113_v1, %v117_v2 }
  0x14   :  { %1338 = vmatprep.mubr.bf16.mxu0 %v5666_v56  ;;  %1484 = vmatprep.mubr.bf16.mxu1 %v5666_v56  ;;  %v4820_v5 = vcombine.high %v112_v63, %v116_v0  ;;  %v120_v7 = vld [vmem:[%s8392_s1 + $0x240] sm:$0xff]  ;;  %v125_v10 = vld [vmem:[%s8392_s1 + $0x268] sm:$0xff]  ;;  %v4819_v11 = vcombine.low %v112_v63, %v116_v0 }
  0x15   :  { %v124_v8 = vld [vmem:[%s8392_s1 + $0x260] sm:$0xff]  ;;  %v4830_v14 = vcombine.high %v121_v9, %v125_v10  ;;  %v129_v17 = vld [vmem:[%s8392_s1 + $0x288] sm:$0xff]  ;;  %v4829_v20 = vcombine.low %v121_v9, %v125_v10 }
  0x16   :  { %1315 = vmatpush1.bf16.msra.mxu0 %v4787_v42  ;;  %1461 = vmatpush1.bf16.msra.mxu1 %v4789_v43  ;;  %v4828_v13 = vcombine.high %v120_v7, %v124_v8  ;;  %v128_v15 = vld [vmem:[%s8392_s1 + $0x280] sm:$0xff]  ;;  %v133_v18 = vld [vmem:[%s8392_s1 + $0x2a8] sm:$0xff]  ;;  %v4827_v19 = vcombine.low %v120_v7, %v124_v8 }
  0x17   :  { %1316 = vmatprep.subr.bf16.mxu0 %v4796_v44  ;;  %1462 = vmatprep.subr.bf16.mxu1 %v4798_v45  ;;  %v132_v16 = vld [vmem:[%s8392_s1 + $0x2a0] sm:$0xff]  ;;  %v4838_v22 = vcombine.high %v129_v17, %v133_v18  ;;  %v137_v25 = vld [vmem:[%s8392_s1 + $0x2c8] sm:$0xff]  ;;  %v4837_v28 = vcombine.low %v129_v17, %v133_v18 }
  0x18   :  { %v4836_v21 = vcombine.high %v128_v15, %v132_v16  ;;  %v136_v23 = vld [vmem:[%s8392_s1 + $0x2c0] sm:$0xff]  ;;  %v141_v26 = vld [vmem:[%s8392_s1 + $0x2e8] sm:$0xff]  ;;  %v4835_v27 = vcombine.low %v128_v15, %v132_v16 }
  0x19   :  { %v140_v24 = vld [vmem:[%s8392_s1 + $0x2e0] sm:$0xff]  ;;  %v4846_v30 = vcombine.high %v137_v25, %v141_v26  ;;  %v145_v33 = vld [vmem:[%s8392_s1 + $0x308] sm:$0xff]  ;;  %v4845_v36 = vcombine.low %v137_v25, %v141_v26 }
  0x1a   :  { %1317 = vmatpush1.bf16.msra.mxu0 %v4795_v50  ;;  %1463 = vmatpush1.bf16.msra.mxu1 %v4797_v51  ;;  %v4844_v29 = vcombine.high %v136_v23, %v140_v24  ;;  %v144_v31 = vld [vmem:[%s8392_s1 + $0x300] sm:$0xff]  ;;  %v149_v34 = vld [vmem:[%s8392_s1 + $0x328] sm:$0xff]  ;;  %v4843_v35 = vcombine.low %v136_v23, %v140_v24 }
  0x1b   :  { %1318 = vmatprep.subr.bf16.mxu0 %v4804_v52  ;;  %1464 = vmatprep.subr.bf16.mxu1 %v4806_v53  ;;  %v148_v32 = vld [vmem:[%s8392_s1 + $0x320] sm:$0xff]  ;;  %v4854_v38 = vcombine.high %v145_v33, %v149_v34  ;;  %v153_v41 = vld [vmem:[%s8392_s1 + $0x348] sm:$0xff]  ;;  %v4853_v44 = vcombine.low %v145_v33, %v149_v34 }
  0x1c   :  { %v4852_v37 = vcombine.high %v144_v31, %v148_v32  ;;  %v152_v39 = vld [vmem:[%s8392_s1 + $0x340] sm:$0xff]  ;;  %v157_v42 = vld [vmem:[%s8392_s1 + $0x368] sm:$0xff]  ;;  %v4851_v43 = vcombine.low %v144_v31, %v148_v32 }
  0x1d   :  { %v156_v40 = vld [vmem:[%s8392_s1 + $0x360] sm:$0xff]  ;;  %v4862_v46 = vcombine.high %v153_v41, %v157_v42  ;;  %v161_v49 = vld [vmem:[%s8392_s1 + $0x388] sm:$0xff]  ;;  %v4861_v52 = vcombine.low %v153_v41, %v157_v42 }
  0x1e   :  { %1319 = vmatpush1.bf16.msra.mxu0 %v4803_v59  ;;  %1465 = vmatpush1.bf16.msra.mxu1 %v4805_v60  ;;  %v4860_v45 = vcombine.high %v152_v39, %v156_v40  ;;  %v160_v47 = vld [vmem:[%s8392_s1 + $0x380] sm:$0xff]  ;;  %v165_v50 = vld [vmem:[%s8392_s1 + $0x3a8] sm:$0xff]  ;;  %v4859_v51 = vcombine.low %v152_v39, %v156_v40 }
  0x1f   :  { %1320 = vmatprep.subr.bf16.mxu0 %v4812_v61  ;;  %1466 = vmatprep.subr.bf16.mxu1 %v4814_v62  ;;  %v164_v48 = vld [vmem:[%s8392_s1 + $0x3a0] sm:$0xff]  ;;  %v4870_v54 = vcombine.high %v161_v49, %v165_v50  ;;  %v169_v58 = vld [vmem:[%s8392_s1 + $0x3c8] sm:$0xff]  ;;  %v4869_v61 = vcombine.low %v161_v49, %v165_v50 }
  0x20   :  { %v4868_v53 = vcombine.high %v160_v47, %v164_v48  ;;  %v168_v55 = vld [vmem:[%s8392_s1 + $0x3c0] sm:$0xff]  ;;  %v173_v59 = vld [vmem:[%s8392_s1 + $0x3e8] sm:$0xff]  ;;  %v4867_v60 = vcombine.low %v160_v47, %v164_v48 }
  0x21   :  { %v172_v57 = vld [vmem:[%s8392_s1 + $0x3e0] sm:$0xff]  ;;  %v4878_v63 = vcombine.high %v169_v58, %v173_v59  ;;  %v177_v2 = vld [vmem:[%s8392_s1 + $0x408] sm:$0xff] }
  0x22   :  { %1321 = vmatpush1.bf16.msra.mxu0 %v4811_v3  ;;  %1467 = vmatpush1.bf16.msra.mxu1 %v4813_v4  ;;  %v4876_v62 = vcombine.high %v168_v55, %v172_v57  ;;  %v176_v0 = vld [vmem:[%s8392_s1 + $0x400] sm:$0xff]  ;;  %v181_v3 = vld [vmem:[%s8392_s1 + $0x428] sm:$0xff]  ;;  %v4875_v4 = vcombine.low %v168_v55, %v172_v57 }
  0x23   :  { %1322 = vmatprep.subr.bf16.mxu0 %v4820_v5  ;;  %1468 = vmatprep.subr.bf16.mxu1 %v4822_v6  ;;  %v180_v1 = vld [vmem:[%s8392_s1 + $0x420] sm:$0xff]  ;;  %v4877_v5 = vcombine.low %v169_v58, %v173_v59  ;;  %v4886_v7 = vcombine.high %v177_v2, %v181_v3  ;;  %v5804_v17 = vld [vmem:[%s8393_s0 + $0x1c] ss:$12 sps:$4 sm:$0xff]  }
  0x24   :  { %v4884_v6 = vcombine.high %v176_v0, %v180_v1  ;;  %v184_v8 = vld [vmem:[%s8392_s1 + $0x440] sm:$0xff]  ;;  %v213_v39 = vld [vmem:[%s8392_s1 + $0x528] sm:$0xff] }
  0x25   :  { %v188_v9 = vld [vmem:[%s8392_s1 + $0x460] sm:$0xff]  ;;  %v217_v47 = vld [vmem:[%s8392_s1 + $0x548] sm:$0xff] }
  0x26   :  { %1323 = vmatpush1.bf16.msra.mxu0 %v4819_v11  ;;  %1469 = vmatpush1.bf16.msra.mxu1 %v4821_v12  ;;  %v5793_v10 = vld [vmem:[%s8393_s0] ss:$12 sps:$4 sm:$0xff]   ;;  %v4892_v15 = vcombine.high %v184_v8, %v188_v9 }
  0x27   :  { %1324 = vmatprep.subr.bf16.mxu0 %v4828_v13  ;;  %1470 = vmatprep.subr.bf16.mxu1 %v4830_v14  ;;  %v185_v11 = vld [vmem:[%s8392_s1 + $0x448] sm:$0xff]  ;;  %v4883_v13 = vcombine.low %v176_v0, %v180_v1  ;;  %v4885_v14 = vcombine.low %v177_v2, %v181_v3  ;;  %v192_v18 = vld [vmem:[%s8392_s1 + $0x480] sm:$0xff] }
  0x28   :  { %v189_v12 = vld [vmem:[%s8392_s1 + $0x468] sm:$0xff]  ;;  %v200_v26 = vld [vmem:[%s8392_s1 + $0x4c0] sm:$0xff] }
  0x29   :  { %v4894_v16 = vcombine.high %v185_v11, %v189_v12  ;;  %v4893_v23 = vcombine.low %v185_v11, %v189_v12  ;;  %v221_v48 = vld [vmem:[%s8392_s1 + $0x568] sm:$0xff]  ;;  %v228_v55 = vld [vmem:[%s8392_s1 + $0x5a0] sm:$0xff]  ;;  %v51_v11 = vld [vmem:[%s8392_s1 + $0x18] sm:$0xff] }
  0x2a   :  { %1325 = vmatpush1.bf16.msra.mxu0 %v4827_v19  ;;  %1471 = vmatpush1.bf16.msra.mxu1 %v4829_v20  ;;  %v196_v19 = vld [vmem:[%s8392_s1 + $0x4a0] sm:$0xff]  ;;  %v193_v20 = vld [vmem:[%s8392_s1 + $0x488] sm:$0xff]  ;;  %v55_v12 = vld [vmem:[%s8392_s1 + $0x38] sm:$0xff] }
  0x2b   :  { %1326 = vmatprep.subr.bf16.mxu0 %v4836_v21  ;;  %1472 = vmatprep.subr.bf16.mxu1 %v4838_v22  ;;  %v197_v21 = vld [vmem:[%s8392_s1 + $0x4a8] sm:$0xff]  ;;  %v4891_v22 = vcombine.low %v184_v8, %v188_v9  ;;  %v4900_v24 = vcombine.high %v192_v18, %v196_v19  ;;  %v4899_v31 = vcombine.low %v192_v18, %v196_v19  ;;  %v236_v0 = vld [vmem:[%s8392_s1 + $0x5e0] sm:$0xff]  ;;  %v50_v8 = vld [vmem:[%s8392_s1 + $0x10] sm:$0xff] }
  0x2c   :  { %v4902_v25 = vcombine.high %v193_v20, %v197_v21  ;;  %v4901_v32 = vcombine.low %v193_v20, %v197_v21  ;;  %v225_v57 = vld [vmem:[%s8392_s1 + $0x588] sm:$0xff]  ;;  %v54_v9 = vld [vmem:[%s8392_s1 + $0x30] sm:$0xff]  ;;  %v4762_v18 = vcombine.high %v51_v11, %v55_v12 }
  0x2d   :  { %v229_v58 = vld [vmem:[%s8392_s1 + $0x5a8] sm:$0xff]  ;;  %v58_v19 = vld [vmem:[%s8392_s1 + $0x50] sm:$0xff] }
  0x2e   :  { %1327 = vmatpush1.bf16.msra.mxu0 %v4835_v27  ;;  %1473 = vmatpush1.bf16.msra.mxu1 %v4837_v28  ;;  %v204_v27 = vld [vmem:[%s8392_s1 + $0x4e0] sm:$0xff]  ;;  %v5907_v1 = vld [vmem:[%s8393_s0 + $0x48] ss:$12 sps:$4 sm:$0xff]  }
  0x2f   :  { %1328 = vmatprep.subr.bf16.mxu0 %v4844_v29  ;;  %1474 = vmatprep.subr.bf16.mxu1 %v4846_v30  ;;  %v5831_v28 = vld [vmem:[%s8393_s0 + $0x18] ss:$12 sps:$4 sm:$0xff]   ;;  %v201_v29 = vld [vmem:[%s8392_s1 + $0x4c8] sm:$0xff]  ;;  %v4908_v33 = vcombine.high %v200_v26, %v204_v27  ;;  %v4907_v40 = vcombine.low %v200_v26, %v204_v27  ;;  %v62_v20 = vld [vmem:[%s8392_s1 + $0x70] sm:$0xff] }
  0x30   :  { %v205_v30 = vld [vmem:[%s8392_s1 + $0x4e8] sm:$0xff]  ;;  %v4768_v26 = vcombine.high %v58_v19, %v62_v20 }
  0x31   :  { %v4910_v34 = vcombine.high %v201_v29, %v205_v30  ;;  %v4909_v41 = vcombine.low %v201_v29, %v205_v30  ;;  %v233_v2 = vld [vmem:[%s8392_s1 + $0x5c8] sm:$0xff]  ;;  %v66_v29 = vld [vmem:[%s8392_s1 + $0x90] sm:$0xff] }
  0x32   :  { %1329 = vmatpush1.bf16.msra.mxu0 %v4843_v35  ;;  %1475 = vmatpush1.bf16.msra.mxu1 %v4845_v36  ;;  %v5842_v35 = vld [vmem:[%s8393_s0 + $0x34] ss:$12 sps:$4 sm:$0xff]   ;;  %v237_v3 = vld [vmem:[%s8392_s1 + $0x5e8] sm:$0xff] }
  0x33   :  { %1330 = vmatprep.subr.bf16.mxu0 %v4852_v37  ;;  %1476 = vmatprep.subr.bf16.mxu1 %v4854_v38  ;;  %v208_v36 = vld [vmem:[%s8392_s1 + $0x500] sm:$0xff]  ;;  %v209_v38 = vld [vmem:[%s8392_s1 + $0x508] sm:$0xff]  ;;  %v70_v30 = vld [vmem:[%s8392_s1 + $0xb0] sm:$0xff] }
  0x34   :  { %v212_v37 = vld [vmem:[%s8392_s1 + $0x520] sm:$0xff]  ;;  %v4917_v50 = vcombine.low %v209_v38, %v213_v39  ;;  %v5940_v21 = vld [vmem:[%s8393_s0 + $0x8] ss:$12 sps:$4 sm:$0xff]  }
  0x35   :  { %v4916_v42 = vcombine.high %v208_v36, %v212_v37  ;;  %v4915_v49 = vcombine.low %v208_v36, %v212_v37  ;;  %v4776_v36 = vcombine.high %v66_v29, %v70_v30 }
  0x36   :  { %1331 = vmatpush1.bf16.msra.mxu0 %v4851_v43  ;;  %1477 = vmatpush1.bf16.msra.mxu1 %v4853_v44  ;;  %v4918_v43 = vcombine.high %v209_v38, %v213_v39  ;;  %v216_v44 = vld [vmem:[%s8392_s1 + $0x540] sm:$0xff]  ;;  %v74_v38 = vld [vmem:[%s8392_s1 + $0xd0] sm:$0xff] }
  0x37   :  { %1332 = vmatprep.subr.bf16.mxu0 %v4860_v45  ;;  %1478 = vmatprep.subr.bf16.mxu1 %v4862_v46  ;;  %v220_v45 = vld [vmem:[%s8392_s1 + $0x560] sm:$0xff]  ;;  %v5869_v46 = vld [vmem:[%s8393_s0 + $0x30] ss:$12 sps:$4 sm:$0xff]  }
  0x38   :  { %v4923_v59 = vcombine.low %v216_v44, %v220_v45  ;;  %v78_v39 = vld [vmem:[%s8392_s1 + $0xf0] sm:$0xff] }
  0x3a   :  { %1333 = vmatpush1.bf16.msra.mxu0 %v4859_v51  ;;  %1479 = vmatpush1.bf16.msra.mxu1 %v4861_v52  ;;  %v4924_v51 = vcombine.high %v216_v44, %v220_v45  ;;  %v4926_v52 = vcombine.high %v217_v47, %v221_v48  ;;  %v4784_v45 = vcombine.high %v74_v38, %v78_v39 }
  0x3b   :  { %1334 = vmatprep.subr.bf16.mxu0 %v4868_v53  ;;  %1480 = vmatprep.subr.bf16.mxu1 %v4870_v54  ;;  %v5880_v53 = vld [vmem:[%s8393_s0 + $0x4c] ss:$12 sps:$4 sm:$0xff]   ;;  %v224_v54 = vld [vmem:[%s8392_s1 + $0x580] sm:$0xff] }
  0x3e   :  { %1335 = vmatpush1.bf16.msra.mxu0 %v4867_v60  ;;  %1481 = vmatpush1.bf16.msra.mxu1 %v4869_v61  ;;  %v4925_v60 = vcombine.low %v217_v47, %v221_v48  ;;  %v4932_v61 = vcombine.high %v224_v54, %v228_v55  ;;  %v82_v48 = vld [vmem:[%s8392_s1 + $0x110] sm:$0xff] }
  0x3f   :  { %1336 = vmatprep.subr.bf16.mxu0 %v4876_v62  ;;  %1482 = vmatprep.subr.bf16.mxu1 %v4878_v63  ;;  %v4934_v62 = vcombine.high %v225_v57, %v229_v58  ;;  %v232_v63 = vld [vmem:[%s8392_s1 + $0x5c0] sm:$0xff] }
  0x42   :  { %1337 = vmatpush1.bf16.msra.mxu0 %v4875_v4  ;;  %1483 = vmatpush1.bf16.msra.mxu1 %v4877_v5  ;;  %v4931_v4 = vcombine.low %v224_v54, %v228_v55  ;;  %v4933_v5 = vcombine.low %v225_v57, %v229_v58  ;;  %v90_v58 = vld [vmem:[%s8392_s1 + $0x150] sm:$0xff] }
  0x43   :  { %1379 = vmatprep.subr.bf16.mxu0 %v4884_v6  ;;  %1525 = vmatprep.subr.bf16.mxu1 %v4886_v7  ;;  %v4940_v6 = vcombine.high %v232_v63, %v236_v0  ;;  %v4942_v7 = vcombine.high %v233_v2, %v237_v3 }
  0x45   :  { %1339 = vmatmul.mubr.bf16.vlgmr.msra.gmra.mrb[0].mxu0 %v5793_v10  ;;  %1485 = vmatmul.mubr.bf16.vlgmr.msra.gmra.mrb[0].mxu1 %v5793_v10 }
  0x46   :  { %1380 = vmatpush1.bf16.msra.mxu0 %v4883_v13  ;;  %1526 = vmatpush1.bf16.msra.mxu1 %v4885_v14  ;;  %v4939_v13 = vcombine.low %v232_v63, %v236_v0  ;;  %v4941_v14 = vcombine.low %v233_v2, %v237_v3 }
  0x47   :  { %1381 = vmatprep.subr.bf16.mxu0 %v4892_v15  ;;  %1527 = vmatprep.subr.bf16.mxu1 %v4894_v16  ;;  %v4760_v15 = vcombine.high %v50_v8, %v54_v9  ;;  %v5536_v16 = vmov 0  }
  0x48   :  { %1348 = vmatprep.mubr.bf16.mxu0 %v5804_v17  ;;  %1494 = vmatprep.mubr.bf16.mxu1 %v5804_v17 }
  0x4a   :  { %1382 = vmatpush1.bf16.msra.mxu0 %v4891_v22  ;;  %1528 = vmatpush1.bf16.msra.mxu1 %v4893_v23  ;;  %v59_v22 = vld [vmem:[%s8392_s1 + $0x58] sm:$0xff] }
  0x4b   :  { %1383 = vmatprep.subr.bf16.mxu0 %v4900_v24  ;;  %1529 = vmatprep.subr.bf16.mxu1 %v4902_v25  ;;  %v63_v23 = vld [vmem:[%s8392_s1 + $0x78] sm:$0xff]  ;;  %v4759_v24 = vcombine.low %v50_v8, %v54_v9  ;;  %v4761_v25 = vcombine.low %v51_v11, %v55_v12 }
  0x4c   :  { %v4770_v27 = vcombine.high %v59_v22, %v63_v23 }
  0x4d   :  { %1349 = vmatmul.mubr.bf16.gmra.mrb[4].mxu0 %v5831_v28  ;;  %1495 = vmatmul.mubr.bf16.gmra.mrb[4].mxu1 %v5831_v28 }
  0x4e   :  { %1384 = vmatpush1.bf16.msra.mxu0 %v4899_v31  ;;  %1530 = vmatpush1.bf16.msra.mxu1 %v4901_v32  ;;  %v67_v31 = vld [vmem:[%s8392_s1 + $0x98] sm:$0xff] }
  0x4f   :  { %1385 = vmatprep.subr.bf16.mxu0 %v4908_v33  ;;  %1531 = vmatprep.subr.bf16.mxu1 %v4910_v34  ;;  %v71_v32 = vld [vmem:[%s8392_s1 + $0xb8] sm:$0xff]  ;;  %v4767_v33 = vcombine.low %v58_v19, %v62_v20  ;;  %v4769_v34 = vcombine.low %v59_v22, %v63_v23 }
  0x50   :  { %1358 = vmatprep.mubr.bf16.mxu0 %v5842_v35  ;;  %1504 = vmatprep.mubr.bf16.mxu1 %v5842_v35  ;;  %v4778_v37 = vcombine.high %v67_v31, %v71_v32  ;;  %v4777_v44 = vcombine.low %v67_v31, %v71_v32  ;;  %v111_v19 = vld [vmem:[%s8392_s1 + $0x1f8] sm:$0xff] }
  0x52   :  { %1386 = vmatpush1.bf16.msra.mxu0 %v4907_v40  ;;  %1532 = vmatpush1.bf16.msra.mxu1 %v4909_v41  ;;  %v5973_v40 = vld [vmem:[%s8393_s0 + $0x20] ss:$12 sps:$4 sm:$0xff]   ;;  %v75_v41 = vld [vmem:[%s8392_s1 + $0xd8] sm:$0xff] }
  0x53   :  { %1387 = vmatprep.subr.bf16.mxu0 %v4916_v42  ;;  %1533 = vmatprep.subr.bf16.mxu1 %v4918_v43  ;;  %v79_v42 = vld [vmem:[%s8392_s1 + $0xf8] sm:$0xff]  ;;  %v4775_v43 = vcombine.low %v66_v29, %v70_v30 }
  0x54   :  { %v4786_v47 = vcombine.high %v75_v41, %v79_v42  ;;  %v4785_v54 = vcombine.low %v75_v41, %v79_v42  ;;  %v119_v29 = vld [vmem:[%s8392_s1 + $0x238] sm:$0xff] }
  0x55   :  { %1359 = vmatmul.mubr.bf16.gmra.mrb[8].mxu0 %v5869_v46  ;;  %1505 = vmatmul.mubr.bf16.gmra.mrb[8].mxu1 %v5869_v46 }
  0x56   :  { %1388 = vmatpush1.bf16.msra.mxu0 %v4915_v49  ;;  %1534 = vmatpush1.bf16.msra.mxu1 %v4917_v50  ;;  %v86_v49 = vld [vmem:[%s8392_s1 + $0x130] sm:$0xff]  ;;  %v83_v50 = vld [vmem:[%s8392_s1 + $0x118] sm:$0xff] }
  0x57   :  { %1389 = vmatprep.subr.bf16.mxu0 %v4924_v51  ;;  %1535 = vmatprep.subr.bf16.mxu1 %v4926_v52  ;;  %v87_v51 = vld [vmem:[%s8392_s1 + $0x138] sm:$0xff]  ;;  %v4783_v52 = vcombine.low %v74_v38, %v78_v39  ;;  %v4792_v55 = vcombine.high %v82_v48, %v86_v49  ;;  %v4791_v63 = vcombine.low %v82_v48, %v86_v49 }
  0x58   :  { %1368 = vmatprep.mubr.bf16.mxu0 %v5880_v53  ;;  %1514 = vmatprep.mubr.bf16.mxu1 %v5880_v53  ;;  %v4794_v57 = vcombine.high %v83_v50, %v87_v51  ;;  %v4793_v0 = vcombine.low %v83_v50, %v87_v51  ;;  %v127_v38 = vld [vmem:[%s8392_s1 + $0x278] sm:$0xff] }
  0x5a   :  { %1390 = vmatpush1.bf16.msra.mxu0 %v4923_v59  ;;  %1536 = vmatpush1.bf16.msra.mxu1 %v4925_v60  ;;  %v94_v59 = vld [vmem:[%s8392_s1 + $0x170] sm:$0xff]  ;;  %v6006_v60 = vld [vmem:[%s8393_s0 + $0x38] ss:$12 sps:$4 sm:$0xff]  }
  0x5b   :  { %1391 = vmatprep.subr.bf16.mxu0 %v4932_v61  ;;  %1537 = vmatprep.subr.bf16.mxu1 %v4934_v62  ;;  %v91_v61 = vld [vmem:[%s8392_s1 + $0x158] sm:$0xff]  ;;  %v4800_v2 = vcombine.high %v90_v58, %v94_v59  ;;  %v4799_v8 = vcombine.low %v90_v58, %v94_v59 }
  0x5c   :  { %v95_v62 = vld [vmem:[%s8392_s1 + $0x178] sm:$0xff] }
  0x5d   :  { %1369 = vmatmul.mubr.bf16.gmra.mrb[12].mxu0 %v5907_v1  ;;  %1515 = vmatmul.mubr.bf16.gmra.mrb[12].mxu1 %v5907_v1  ;;  %v4802_v3 = vcombine.high %v91_v61, %v95_v62  ;;  %v4801_v9 = vcombine.low %v91_v61, %v95_v62 }
  0x5e   :  { %1392 = vmatpush1.bf16.msra.mxu0 %v4931_v4  ;;  %1538 = vmatpush1.bf16.msra.mxu1 %v4933_v5  ;;  %v98_v4 = vld [vmem:[%s8392_s1 + $0x190] sm:$0xff] }
  0x5f   :  { %1393 = vmatprep.subr.bf16.mxu0 %v4940_v6  ;;  %1539 = vmatprep.subr.bf16.mxu1 %v4942_v7  ;;  %v102_v5 = vld [vmem:[%s8392_s1 + $0x1b0] sm:$0xff]  ;;  %v99_v6 = vld [vmem:[%s8392_s1 + $0x198] sm:$0xff] }
  0x60   :  { %1411 = vmatprep.mubr.bf16.mxu0 %v5536_v16  ;;  %1557 = vmatprep.mubr.bf16.mxu1 %v5536_v16  ;;  %v103_v7 = vld [vmem:[%s8392_s1 + $0x1b8] sm:$0xff]  ;;  %v4808_v11 = vcombine.high %v98_v4, %v102_v5  ;;  %v4807_v20 = vcombine.low %v98_v4, %v102_v5 }
  0x61   :  { %v4810_v12 = vcombine.high %v99_v6, %v103_v7  ;;  %v4809_v22 = vcombine.low %v99_v6, %v103_v7 }
  0x62   :  { %1394 = vmatpush1.bf16.msra.mxu0 %v4939_v13  ;;  %1540 = vmatpush1.bf16.msra.mxu1 %v4941_v14  ;;  %v106_v13 = vld [vmem:[%s8392_s1 + $0x1d0] sm:$0xff] }
  0x63   :  { %1598 = vmatprep.subr.bf16.mxu0 %v4760_v15  ;;  %1744 = vmatprep.subr.bf16.mxu1 %v4762_v18  ;;  %v110_v14 = vld [vmem:[%s8392_s1 + $0x1f0] sm:$0xff]  ;;  %v107_v18 = vld [vmem:[%s8392_s1 + $0x1d8] sm:$0xff] }
  0x64   :  { %v6039_v15 = vld [vmem:[%s8393_s0 + $0x50] ss:$12 sps:$4 sm:$0xff]   ;;  %v4816_v23 = vcombine.high %v106_v13, %v110_v14  ;;  %v4815_v30 = vcombine.low %v106_v13, %v110_v14  ;;  %v4817_v31 = vcombine.low %v107_v18, %v111_v19 }
  0x65   :  { %1412 = vmatmul.mubr.bf16.vlgmr.msra.gmra.mrb[0].mxu0 %v5940_v21  ;;  %1558 = vmatmul.mubr.bf16.vlgmr.msra.gmra.mrb[0].mxu1 %v5940_v21 }
  0x66   :  { %1599 = vmatpush1.bf16.msra.mxu0 %v4759_v24  ;;  %1745 = vmatpush1.bf16.msra.mxu1 %v4761_v25  ;;  %v4818_v24 = vcombine.high %v107_v18, %v111_v19  ;;  %v114_v25 = vld [vmem:[%s8392_s1 + $0x210] sm:$0xff] }
  0x67   :  { %1600 = vmatprep.subr.bf16.mxu0 %v4768_v26  ;;  %1746 = vmatprep.subr.bf16.mxu1 %v4770_v27  ;;  %v118_v26 = vld [vmem:[%s8392_s1 + $0x230] sm:$0xff]  ;;  %v115_v27 = vld [vmem:[%s8392_s1 + $0x218] sm:$0xff] }
  0x68   :  { %1421 = vmatprep.mubr.bf16.mxu0 %v5536_v16  ;;  %1567 = vmatprep.mubr.bf16.mxu1 %v5536_v16  ;;  %v4824_v32 = vcombine.high %v114_v25, %v118_v26  ;;  %v4823_v39 = vcombine.low %v114_v25, %v118_v26  ;;  %v4825_v41 = vcombine.low %v115_v27, %v119_v29 }
  0x6a   :  { %1601 = vmatpush1.bf16.msra.mxu0 %v4767_v33  ;;  %1747 = vmatpush1.bf16.msra.mxu1 %v4769_v34  ;;  %v4826_v33 = vcombine.high %v115_v27, %v119_v29  ;;  %v122_v34 = vld [vmem:[%s8392_s1 + $0x250] sm:$0xff] }
  0x6b   :  { %1602 = vmatprep.subr.bf16.mxu0 %v4776_v36  ;;  %1748 = vmatprep.subr.bf16.mxu1 %v4778_v37  ;;  %v126_v36 = vld [vmem:[%s8392_s1 + $0x270] sm:$0xff]  ;;  %v123_v37 = vld [vmem:[%s8392_s1 + $0x258] sm:$0xff] }
  0x6c   :  { %v4832_v42 = vcombine.high %v122_v34, %v126_v36  ;;  %v4831_v48 = vcombine.low %v122_v34, %v126_v36  ;;  %v4833_v49 = vcombine.low %v123_v37, %v127_v38 }
  0x6d   :  { %1422 = vmatmul.mubr.bf16.gmra.mrb[4].mxu0 %v5973_v40  ;;  %1568 = vmatmul.mubr.bf16.gmra.mrb[4].mxu1 %v5973_v40 }
  0x6e   :  { %1603 = vmatpush1.bf16.msra.mxu0 %v4775_v43  ;;  %1749 = vmatpush1.bf16.msra.mxu1 %v4777_v44  ;;  %v4834_v43 = vcombine.high %v123_v37, %v127_v38  ;;  %v130_v44 = vld [vmem:[%s8392_s1 + $0x290] sm:$0xff] }
  0x6f   :  { %1604 = vmatprep.subr.bf16.mxu0 %v4784_v45  ;;  %1750 = vmatprep.subr.bf16.mxu1 %v4786_v47  ;;  %v134_v45 = vld [vmem:[%s8392_s1 + $0x2b0] sm:$0xff]  ;;  %v135_v47 = vld [vmem:[%s8392_s1 + $0x2b8] sm:$0xff] }
  0x70   :  { %1431 = vmatprep.mubr.bf16.mxu0 %v5536_v16  ;;  %1577 = vmatprep.mubr.bf16.mxu1 %v5536_v16  ;;  %v4840_v50 = vcombine.high %v130_v44, %v134_v45  ;;  %v4839_v58 = vcombine.low %v130_v44, %v134_v45 }
  0x72   :  { %1605 = vmatpush1.bf16.msra.mxu0 %v4783_v52  ;;  %1751 = vmatpush1.bf16.msra.mxu1 %v4785_v54  ;;  %v138_v52 = vld [vmem:[%s8392_s1 + $0x2d0] sm:$0xff] }
  0x73   :  { %1606 = vmatprep.subr.bf16.mxu0 %v4792_v55  ;;  %1752 = vmatprep.subr.bf16.mxu1 %v4794_v57  ;;  %v142_v54 = vld [vmem:[%s8392_s1 + $0x2f0] sm:$0xff]  ;;  %v139_v55 = vld [vmem:[%s8392_s1 + $0x2d8] sm:$0xff] }
  0x74   :  { %v143_v57 = vld [vmem:[%s8392_s1 + $0x2f8] sm:$0xff]  ;;  %v4848_v61 = vcombine.high %v138_v52, %v142_v54  ;;  %v4847_v4 = vcombine.low %v138_v52, %v142_v54 }
  0x75   :  { %1432 = vmatmul.mubr.bf16.gmra.mrb[8].mxu0 %v6006_v60  ;;  %1578 = vmatmul.mubr.bf16.gmra.mrb[8].mxu1 %v6006_v60  ;;  %v4850_v62 = vcombine.high %v139_v55, %v143_v57  ;;  %v4849_v5 = vcombine.low %v139_v55, %v143_v57 }
  0x76   :  { %1607 = vmatpush1.bf16.msra.mxu0 %v4791_v63  ;;  %1753 = vmatpush1.bf16.msra.mxu1 %v4793_v0  ;;  %v146_v63 = vld [vmem:[%s8392_s1 + $0x310] sm:$0xff] }
  0x77   :  { %1608 = vmatprep.subr.bf16.mxu0 %v4800_v2  ;;  %1754 = vmatprep.subr.bf16.mxu1 %v4802_v3  ;;  %v150_v0 = vld [vmem:[%s8392_s1 + $0x330] sm:$0xff]  ;;  %v147_v2 = vld [vmem:[%s8392_s1 + $0x318] sm:$0xff] }
  0x78   :  { %1441 = vmatprep.mubr.bf16.mxu0 %v5536_v16  ;;  %1587 = vmatprep.mubr.bf16.mxu1 %v5536_v16  ;;  %v151_v3 = vld [vmem:[%s8392_s1 + $0x338] sm:$0xff]  ;;  %v4856_v6 = vcombine.high %v146_v63, %v150_v0  ;;  %v4855_v13 = vcombine.low %v146_v63, %v150_v0 }
  0x79   :  { %v4858_v7 = vcombine.high %v147_v2, %v151_v3  ;;  %v4857_v14 = vcombine.low %v147_v2, %v151_v3 }
  0x7a   :  { %1609 = vmatpush1.bf16.msra.mxu0 %v4799_v8  ;;  %1755 = vmatpush1.bf16.msra.mxu1 %v4801_v9  ;;  %v154_v8 = vld [vmem:[%s8392_s1 + $0x350] sm:$0xff] }
  0x7b   :  { %1610 = vmatprep.subr.bf16.mxu0 %v4808_v11  ;;  %1756 = vmatprep.subr.bf16.mxu1 %v4810_v12  ;;  %v158_v9 = vld [vmem:[%s8392_s1 + $0x370] sm:$0xff]  ;;  %v155_v11 = vld [vmem:[%s8392_s1 + $0x358] sm:$0xff] }
  0x7c   :  { %v159_v12 = vld [vmem:[%s8392_s1 + $0x378] sm:$0xff]  ;;  %v4864_v18 = vcombine.high %v154_v8, %v158_v9  ;;  %v4863_v25 = vcombine.low %v154_v8, %v158_v9 }
  0x7d   :  { %1442 = vmatmul.mubr.bf16.gmra.mrb[12].mxu0 %v6039_v15  ;;  %1588 = vmatmul.mubr.bf16.gmra.mrb[12].mxu1 %v6039_v15  ;;  %v4866_v19 = vcombine.high %v155_v11, %v159_v12  ;;  %v4865_v26 = vcombine.low %v155_v11, %v159_v12  ;;  %v214_v12 = vld [vmem:[%s8392_s1 + $0x530] sm:$0xff] }
  0x7e   :  { %1611 = vmatpush1.bf16.msra.mxu0 %v4807_v20  ;;  %1757 = vmatpush1.bf16.msra.mxu1 %v4809_v22  ;;  %v162_v20 = vld [vmem:[%s8392_s1 + $0x390] sm:$0xff] }
  0x7f   :  { %1612 = vmatprep.subr.bf16.mxu0 %v4816_v23  ;;  %1758 = vmatprep.subr.bf16.mxu1 %v4818_v24  ;;  %v166_v22 = vld [vmem:[%s8392_s1 + $0x3b0] sm:$0xff]  ;;  %v163_v23 = vld [vmem:[%s8392_s1 + $0x398] sm:$0xff] }
  0x80   :  { %1630 = vmatprep.mubr.bf16.mxu0 %v5666_v56  ;;  %1776 = vmatprep.mubr.bf16.mxu1 %v5666_v56  ;;  %v131_v56 = vld [vmem:[%s8392_s1 + $0x298] sm:$0xff]  ;;  %v4872_v27 = vcombine.high %v162_v20, %v166_v22  ;;  %v4871_v34 = vcombine.low %v162_v20, %v166_v22 }
  0x81   :  { %v4842_v51 = vcombine.high %v131_v56, %v135_v47  ;;  %v4841_v59 = vcombine.low %v131_v56, %v135_v47  ;;  %v167_v24 = vld [vmem:[%s8392_s1 + $0x3b8] sm:$0xff] }
  0x82   :  { %1613 = vmatpush1.bf16.msra.mxu0 %v4815_v30  ;;  %1759 = vmatpush1.bf16.msra.mxu1 %v4817_v31  ;;  %v4874_v29 = vcombine.high %v163_v23, %v167_v24  ;;  %v170_v30 = vld [vmem:[%s8392_s1 + $0x3d0] sm:$0xff]  ;;  %v4873_v36 = vcombine.low %v163_v23, %v167_v24 }
  0x83   :  { %1614 = vmatprep.subr.bf16.mxu0 %v4824_v32  ;;  %1760 = vmatprep.subr.bf16.mxu1 %v4826_v33  ;;  %v174_v31 = vld [vmem:[%s8392_s1 + $0x3f0] sm:$0xff]  ;;  %v171_v32 = vld [vmem:[%s8392_s1 + $0x3d8] sm:$0xff] }
  0x84   :  { %v175_v33 = vld [vmem:[%s8392_s1 + $0x3f8] sm:$0xff]  ;;  %v4880_v37 = vcombine.high %v170_v30, %v174_v31  ;;  %v4879_v44 = vcombine.low %v170_v30, %v174_v31  ;;  %v218_v23 = vld [vmem:[%s8392_s1 + $0x550] sm:$0xff] }
  0x85   :  { %v4882_v38 = vcombine.high %v171_v32, %v175_v33  ;;  %v4881_v45 = vcombine.low %v171_v32, %v175_v33  ;;  %v222_v24 = vld [vmem:[%s8392_s1 + $0x570] sm:$0xff]  ;;  %v227_v32 = vld [vmem:[%s8392_s1 + $0x598] sm:$0xff] }
  0x86   :  { %1615 = vmatpush1.bf16.msra.mxu0 %v4823_v39  ;;  %1761 = vmatpush1.bf16.msra.mxu1 %v4825_v41  ;;  %v178_v39 = vld [vmem:[%s8392_s1 + $0x410] sm:$0xff]  ;;  %v231_v33 = vld [vmem:[%s8392_s1 + $0x5b8] sm:$0xff] }
  0x87   :  { %1616 = vmatprep.subr.bf16.mxu0 %v4832_v42  ;;  %1762 = vmatprep.subr.bf16.mxu1 %v4834_v43  ;;  %v182_v41 = vld [vmem:[%s8392_s1 + $0x430] sm:$0xff]  ;;  %v179_v42 = vld [vmem:[%s8392_s1 + $0x418] sm:$0xff] }
  0x88   :  { %v183_v43 = vld [vmem:[%s8392_s1 + $0x438] sm:$0xff]  ;;  %v4888_v56 = vcombine.high %v178_v39, %v182_v41  ;;  %v4887_v52 = vcombine.low %v178_v39, %v182_v41  ;;  %v230_v31 = vld [vmem:[%s8392_s1 + $0x5b0] sm:$0xff] }
  0x89   :  { %v4890_v47 = vcombine.high %v179_v42, %v183_v43  ;;  %v4889_v54 = vcombine.low %v179_v42, %v183_v43  ;;  %v234_v39 = vld [vmem:[%s8392_s1 + $0x5d0] sm:$0xff]  ;;  %v239_v42 = vld [vmem:[%s8392_s1 + $0x5f8] sm:$0xff] }
  0x8a   :  { %1617 = vmatpush1.bf16.msra.mxu0 %v4831_v48  ;;  %1763 = vmatpush1.bf16.msra.mxu1 %v4833_v49  ;;  %v186_v48 = vld [vmem:[%s8392_s1 + $0x450] sm:$0xff] }
  0x8b   :  { %1618 = vmatprep.subr.bf16.mxu0 %v4840_v50  ;;  %1764 = vmatprep.subr.bf16.mxu1 %v4842_v51  ;;  %v190_v49 = vld [vmem:[%s8392_s1 + $0x470] sm:$0xff]  ;;  %v187_v50 = vld [vmem:[%s8392_s1 + $0x458] sm:$0xff] }
  0x8c   :  { %v191_v51 = vld [vmem:[%s8392_s1 + $0x478] sm:$0xff]  ;;  %v4896_v55 = vcombine.high %v186_v48, %v190_v49  ;;  %v4895_v63 = vcombine.low %v186_v48, %v190_v49  ;;  %v238_v41 = vld [vmem:[%s8392_s1 + $0x5f0] sm:$0xff]  ;;  %v1972_v48 = vld [vmem:[%s8394_s3 + $0x8] sm:$0xff] }
  0x8d   :  { %v4898_v57 = vcombine.high %v187_v50, %v191_v51  ;;  %v4897_v0 = vcombine.low %v187_v50, %v191_v51  ;;  %v1976_v49 = vld [vmem:[%s8394_s3 + $0x28] sm:$0xff]  ;;  %v4943_v50 = vcombine.low %v234_v39, %v238_v41 }
  0x8e   :  { %1619 = vmatpush1.bf16.msra.mxu0 %v4839_v58  ;;  %1765 = vmatpush1.bf16.msra.mxu1 %v4841_v59  ;;  %v194_v58 = vld [vmem:[%s8392_s1 + $0x490] sm:$0xff] }
  0x8f   :  { %1620 = vmatprep.subr.bf16.mxu0 %v4848_v61  ;;  %1766 = vmatprep.subr.bf16.mxu1 %v4850_v62  ;;  %v198_v59 = vld [vmem:[%s8392_s1 + $0x4b0] sm:$0xff]  ;;  %v195_v61 = vld [vmem:[%s8392_s1 + $0x498] sm:$0xff] }
  0x90   :  { %v199_v62 = vld [vmem:[%s8392_s1 + $0x4b8] sm:$0xff]  ;;  %v4904_v2 = vcombine.high %v194_v58, %v198_v59 }
  0x91   :  { %v4906_v3 = vcombine.high %v195_v61, %v199_v62  ;;  %v4905_v8 = vcombine.low %v195_v61, %v199_v62  ;;  %v6290_v61 = vcombine.low %v1972_v48, %v1976_v49 }
  0x92   :  { %1621 = vmatpush1.bf16.msra.mxu0 %v4847_v4  ;;  %1767 = vmatpush1.bf16.msra.mxu1 %v4849_v5  ;;  %v202_v4 = vld [vmem:[%s8392_s1 + $0x4d0] sm:$0xff] }
  0x93   :  { %1622 = vmatprep.subr.bf16.mxu0 %v4856_v6  ;;  %1768 = vmatprep.subr.bf16.mxu1 %v4858_v7  ;;  %v206_v5 = vld [vmem:[%s8392_s1 + $0x4f0] sm:$0xff]  ;;  %v207_v6 = vld [vmem:[%s8392_s1 + $0x4f8] sm:$0xff]  ;;  %v4903_v7 = vcombine.low %v194_v58, %v198_v59  ;;  %v1984_v58 = vld [vmem:[%s8394_s3 + $0x68] sm:$0xff]  ;;  %8673 = vst [vmem:[#allocation8_spill] sm:$0xff] %v6290_v61 }
  0x94   :  { %v4912_v9 = vcombine.high %v202_v4, %v206_v5 }
  0x96   :  { %1623 = vmatpush1.bf16.msra.mxu0 %v4855_v13  ;;  %1769 = vmatpush1.bf16.msra.mxu1 %v4857_v14  ;;  %v211_v13 = vld [vmem:[%s8392_s1 + $0x518] sm:$0xff] }
  0x97   :  { %1624 = vmatprep.subr.bf16.mxu0 %v4864_v18  ;;  %1770 = vmatprep.subr.bf16.mxu1 %v4866_v19  ;;  %v215_v14 = vld [vmem:[%s8392_s1 + $0x538] sm:$0xff]  ;;  %v4911_v18 = vcombine.low %v202_v4, %v206_v5  ;;  %v1992_v4 = vld [vmem:[%s8394_s3 + $0xa8] sm:$0xff] }
  0x98   :  { %v4922_v22 = vcombine.high %v211_v13, %v215_v14 }
  0x9a   :  { %1625 = vmatpush1.bf16.msra.mxu0 %v4863_v25  ;;  %1771 = vmatpush1.bf16.msra.mxu1 %v4865_v26  ;;  %v223_v25 = vld [vmem:[%s8392_s1 + $0x578] sm:$0xff] }
  0x9b   :  { %1626 = vmatprep.subr.bf16.mxu0 %v4872_v27  ;;  %1772 = vmatprep.subr.bf16.mxu1 %v4874_v29  ;;  %v4921_v27 = vcombine.low %v211_v13, %v215_v14  ;;  %v4928_v29 = vcombine.high %v218_v23, %v222_v24 }
  0x9e   :  { %1627 = vmatpush1.bf16.msra.mxu0 %v4871_v34  ;;  %1773 = vmatpush1.bf16.msra.mxu1 %v4873_v36  ;;  %v4927_v34 = vcombine.low %v218_v23, %v222_v24 }
  0x9f   :  { %1628 = vmatprep.subr.bf16.mxu0 %v4880_v37  ;;  %1774 = vmatprep.subr.bf16.mxu1 %v4882_v38  ;;  %v4938_v38 = vcombine.high %v227_v32, %v231_v33 }
  0xa2   :  { %1629 = vmatpush1.bf16.msra.mxu0 %v4879_v44  ;;  %1775 = vmatpush1.bf16.msra.mxu1 %v4881_v45  ;;  %v4937_v44 = vcombine.low %v227_v32, %v231_v33  ;;  %v4944_v45 = vcombine.high %v234_v39, %v238_v41  ;;  %v2019_v33 = vld [vmem:[%s8394_s3 + $0x180] sm:$0xff] }
  0xa3   :  { %1671 = vmatprep.subr.bf16.mxu0 %v4888_v56  ;;  %1817 = vmatprep.subr.bf16.mxu1 %v4890_v47  ;;  %v1975_v47 = vld [vmem:[%s8394_s3 + $0x20] sm:$0xff] }
  0xa5   :  { %1631 = vmatmul.mubr.bf16.vlgmr.msra.gmra.mrb[16].mxu0 %v5793_v10  ;;  %1777 = vmatmul.mubr.bf16.vlgmr.msra.gmra.mrb[16].mxu1 %v5793_v10  ;;  %v203_v10 = vld [vmem:[%s8392_s1 + $0x4d8] sm:$0xff] }
  0xa6   :  { %1672 = vmatpush1.bf16.msra.mxu0 %v4887_v52  ;;  %1818 = vmatpush1.bf16.msra.mxu1 %v4889_v54  ;;  %v4914_v11 = vcombine.high %v203_v10, %v207_v6  ;;  %v4913_v19 = vcombine.low %v203_v10, %v207_v6  ;;  %v6272_v54 = vcombine.high %v1972_v48, %v1976_v49  ;;  %v2039_v48 = vld [vmem:[%s8394_s3 + $0x220] sm:$0xff]  ;;  %v2036_v49 = vld [vmem:[%s8394_s3 + $0x208] sm:$0xff] }
  0xa7   :  { %1673 = vmatprep.subr.bf16.mxu0 %v4896_v55  ;;  %1819 = vmatprep.subr.bf16.mxu1 %v4898_v57  ;;  %v1979_v55 = vld [vmem:[%s8394_s3 + $0x40] sm:$0xff]  ;;  %v1980_v57 = vld [vmem:[%s8394_s3 + $0x48] sm:$0xff] }
  0xa8   :  { %1640 = vmatprep.mubr.bf16.mxu0 %v5804_v17  ;;  %1786 = vmatprep.mubr.bf16.mxu1 %v5804_v17  ;;  %v210_v17 = vld [vmem:[%s8392_s1 + $0x510] sm:$0xff]  ;;  %8671 = vst [vmem:[#allocation6_spill] sm:$0xff] %v6272_v54  ;;  %v6316_v10 = vcombine.low %v1980_v57, %v1984_v58 }
  0xa9   :  { %v4920_v20 = vcombine.high %v210_v17, %v214_v12  ;;  %v4919_v26 = vcombine.low %v210_v17, %v214_v12 }
  0xaa   :  { %1674 = vmatpush1.bf16.msra.mxu0 %v4895_v63  ;;  %1820 = vmatpush1.bf16.msra.mxu1 %v4897_v0  ;;  %v6295_v63 = vcombine.high %v1980_v57, %v1984_v58  ;;  %v1987_v0 = vld [vmem:[%s8394_s3 + $0x80] sm:$0xff]  ;;  %8677 = vst [vmem:[#allocation12_spill] sm:$0xff] %v6316_v10 }
  0xab   :  { %1675 = vmatprep.subr.bf16.mxu0 %v4904_v2  ;;  %1821 = vmatprep.subr.bf16.mxu1 %v4906_v3  ;;  %v1991_v2 = vld [vmem:[%s8394_s3 + $0xa0] sm:$0xff]  ;;  %v1988_v3 = vld [vmem:[%s8394_s3 + $0x88] sm:$0xff] }
  0xac   :  { %8675 = vst [vmem:[#allocation10_spill] sm:$0xff] %v6295_v63  ;;  %v6318_v6 = vcombine.high %v1987_v0, %v1991_v2  ;;  %v6338_v17 = vcombine.low %v1987_v0, %v1991_v2  ;;  %v6342_v12 = vcombine.low %v1988_v3, %v1992_v4  ;;  %v2047_v58 = vld [vmem:[%s8394_s3 + $0x260] sm:$0xff]  ;;  %v8399_v0 = vmov 0.0|0.0   ;;  %v2044_v2 = vld [vmem:[%s8394_s3 + $0x248] sm:$0xff] }
  0xad   :  { %1641 = vmatmul.mubr.bf16.gmra.mrb[20].mxu0 %v5831_v28  ;;  %1787 = vmatmul.mubr.bf16.gmra.mrb[20].mxu1 %v5831_v28  ;;  %v219_v28 = vld [vmem:[%s8392_s1 + $0x558] sm:$0xff] }
  0xae   :  { %1676 = vmatpush1.bf16.msra.mxu0 %v4903_v7  ;;  %1822 = vmatpush1.bf16.msra.mxu1 %v4905_v8  ;;  %v4930_v30 = vcombine.high %v219_v28, %v223_v25  ;;  %v4929_v36 = vcombine.low %v219_v28, %v223_v25  ;;  %8678 = vst [vmem:[#allocation13_spill] sm:$0xff] %v6318_v6  ;;  %v1999_v8 = vld [vmem:[%s8394_s3 + $0xe0] sm:$0xff]  ;;  %8680 = vst [vmem:[#allocation15_spill] sm:$0xff] %v6338_v17 }
  0xaf   :  { %1677 = vmatprep.subr.bf16.mxu0 %v4912_v9  ;;  %1823 = vmatprep.subr.bf16.mxu1 %v4914_v11  ;;  %v6322_v7 = vcombine.high %v1988_v3, %v1992_v4  ;;  %v1996_v9 = vld [vmem:[%s8394_s3 + $0xc8] sm:$0xff]  ;;  %8681 = vst [vmem:[#allocation16_spill] sm:$0xff] %v6342_v12 }
  0xb0   :  { %1650 = vmatprep.mubr.bf16.mxu0 %v5842_v35  ;;  %1796 = vmatprep.mubr.bf16.mxu1 %v5842_v35  ;;  %v226_v35 = vld [vmem:[%s8392_s1 + $0x590] sm:$0xff]  ;;  %v2000_v11 = vld [vmem:[%s8394_s3 + $0xe8] sm:$0xff] }
  0xb1   :  { %v4936_v37 = vcombine.high %v226_v35, %v230_v31  ;;  %v4935_v43 = vcombine.low %v226_v35, %v230_v31  ;;  %8679 = vst [vmem:[#allocation14_spill] sm:$0xff] %v6322_v7  ;;  %v6347_v14 = vcombine.high %v1996_v9, %v2000_v11  ;;  %v6368_v24 = vcombine.low %v1996_v9, %v2000_v11  ;;  %v2048_v3 = vld [vmem:[%s8394_s3 + $0x268] sm:$0xff]  ;;  %v2051_v11 = vld [vmem:[%s8394_s3 + $0x280] sm:$0xff] }
  0xb2   :  { %1678 = vmatpush1.bf16.msra.mxu0 %v4911_v18  ;;  %1824 = vmatpush1.bf16.msra.mxu1 %v4913_v19  ;;  %v2003_v18 = vld [vmem:[%s8394_s3 + $0x100] sm:$0xff]  ;;  %v6503_v9 = vcombine.high %v2044_v2, %v2048_v3 }
  0xb3   :  { %1679 = vmatprep.subr.bf16.mxu0 %v4920_v20  ;;  %1825 = vmatprep.subr.bf16.mxu1 %v4922_v22  ;;  %8683 = vst [vmem:[#allocation18_spill] sm:$0xff] %v6347_v14  ;;  %v2007_v19 = vld [vmem:[%s8394_s3 + $0x120] sm:$0xff]  ;;  %v2004_v20 = vld [vmem:[%s8394_s3 + $0x108] sm:$0xff]  ;;  %8685 = vst [vmem:[#allocation20_spill] sm:$0xff] %v6368_v24 }
  0xb4   :  { %v2008_v22 = vld [vmem:[%s8394_s3 + $0x128] sm:$0xff]  ;;  %v6370_v28 = vcombine.high %v2003_v18, %v2007_v19  ;;  %8707 = vst [vmem:[#allocation42_spill] sm:$0xff] %v6503_v9 }
  0xb5   :  { %1651 = vmatmul.mubr.bf16.gmra.mrb[24].mxu0 %v5869_v46  ;;  %1797 = vmatmul.mubr.bf16.gmra.mrb[24].mxu1 %v5869_v46  ;;  %v235_v46 = vld [vmem:[%s8392_s1 + $0x5d8] sm:$0xff]  ;;  %v6374_v25 = vcombine.high %v2004_v20, %v2008_v22  ;;  %v6394_v35 = vcombine.low %v2004_v20, %v2008_v22  ;;  %v2056_v20 = vld [vmem:[%s8394_s3 + $0x2a8] sm:$0xff] }
  0xb6   :  { %1680 = vmatpush1.bf16.msra.mxu0 %v4919_v26  ;;  %1826 = vmatpush1.bf16.msra.mxu1 %v4921_v27  ;;  %v4946_v56 = vcombine.high %v235_v46, %v239_v42  ;;  %v4945_v51 = vcombine.low %v235_v46, %v239_v42  ;;  %8686 = vst [vmem:[#allocation21_spill] sm:$0xff] %v6370_v28  ;;  %v2015_v26 = vld [vmem:[%s8394_s3 + $0x160] sm:$0xff]  ;;  %v2012_v27 = vld [vmem:[%s8394_s3 + $0x148] sm:$0xff] }
  0xb7   :  { %1681 = vmatprep.subr.bf16.mxu0 %v4928_v29  ;;  %1827 = vmatprep.subr.bf16.mxu1 %v4930_v30  ;;  %8687 = vst [vmem:[#allocation22_spill] sm:$0xff] %v6374_v25  ;;  %v2016_v29 = vld [vmem:[%s8394_s3 + $0x168] sm:$0xff]  ;;  %v6390_v30 = vcombine.low %v2003_v18, %v2007_v19  ;;  %8689 = vst [vmem:[#allocation24_spill] sm:$0xff] %v6394_v35  ;;  %v2031_v42 = vld [vmem:[%s8394_s3 + $0x1e0] sm:$0xff] }
  0xb8   :  { %1660 = vmatprep.mubr.bf16.mxu0 %v5880_v53  ;;  %1806 = vmatprep.mubr.bf16.mxu1 %v5880_v53  ;;  %v1971_v53 = vld [vmem:[%s8394_s3] sm:$0xff]  ;;  %v6399_v32 = vcombine.high %v2012_v27, %v2016_v29  ;;  %v6420_v39 = vcombine.low %v2012_v27, %v2016_v29  ;;  %v2052_v19 = vld [vmem:[%s8394_s3 + $0x288] sm:$0xff] }
  0xb9   :  { %v6269_v52 = vcombine.high %v1971_v53, %v1975_v47  ;;  %v6287_v59 = vcombine.low %v1971_v53, %v1975_v47  ;;  %8688 = vst [vmem:[#allocation23_spill] sm:$0xff] %v6390_v30  ;;  %v2035_v47 = vld [vmem:[%s8394_s3 + $0x200] sm:$0xff]  ;;  %v6527_v27 = vcombine.high %v2052_v19, %v2056_v20 }
  0xba   :  { %1682 = vmatpush1.bf16.msra.mxu0 %v4927_v34  ;;  %1828 = vmatpush1.bf16.msra.mxu1 %v4929_v36  ;;  %8691 = vst [vmem:[#allocation26_spill] sm:$0xff] %v6399_v32  ;;  %v2023_v34 = vld [vmem:[%s8394_s3 + $0x1a0] sm:$0xff]  ;;  %v2020_v36 = vld [vmem:[%s8394_s3 + $0x188] sm:$0xff]  ;;  %8693 = vst [vmem:[#allocation28_spill] sm:$0xff] %v6420_v39  ;;  %v6494_v4 = vcombine.low %v2035_v47, %v2039_v48 }
  0xbb   :  { %1683 = vmatprep.subr.bf16.mxu0 %v4936_v37  ;;  %1829 = vmatprep.subr.bf16.mxu1 %v4938_v38  ;;  %8670 = vst [vmem:[#allocation5_spill] sm:$0xff] %v6269_v52  ;;  %8672 = vst [vmem:[#allocation7_spill] sm:$0xff] %v6287_v59  ;;  %v2024_v37 = vld [vmem:[%s8394_s3 + $0x1a8] sm:$0xff]  ;;  %v6422_v41 = vcombine.high %v2019_v33, %v2023_v34  ;;  %v2055_v18 = vld [vmem:[%s8394_s3 + $0x2a0] sm:$0xff] }
  0xbc   :  { %v6426_v46 = vcombine.high %v2020_v36, %v2024_v37  ;;  %8704 = vst [vmem:[#allocation39_spill] sm:$0xff] %v6494_v4  ;;  %8711 = vst [vmem:[#allocation46_spill] sm:$0xff] %v6527_v27  ;;  %v2059_v29 = vld [vmem:[%s8394_s3 + $0x2c0] sm:$0xff] }
  0xbd   :  { %1661 = vmatmul.mubr.bf16.gmra.mrb[28].mxu0 %v5907_v1  ;;  %1807 = vmatmul.mubr.bf16.gmra.mrb[28].mxu1 %v5907_v1  ;;  %v1983_v1 = vld [vmem:[%s8394_s3 + $0x60] sm:$0xff]  ;;  %8694 = vst [vmem:[#allocation29_spill] sm:$0xff] %v6422_v41 }
  0xbe   :  { %1684 = vmatpush1.bf16.msra.mxu0 %v4935_v43  ;;  %1830 = vmatpush1.bf16.msra.mxu1 %v4937_v44  ;;  %v6292_v62 = vcombine.high %v1979_v55, %v1983_v1  ;;  %v6312_v5 = vcombine.low %v1979_v55, %v1983_v1  ;;  %8695 = vst [vmem:[#allocation30_spill] sm:$0xff] %v6426_v46  ;;  %v2028_v43 = vld [vmem:[%s8394_s3 + $0x1c8] sm:$0xff] }
  0xbf   :  { %1685 = vmatprep.subr.bf16.mxu0 %v4944_v45  ;;  %1831 = vmatprep.subr.bf16.mxu1 %v4946_v56  ;;  %v2032_v44 = vld [vmem:[%s8394_s3 + $0x1e8] sm:$0xff]  ;;  %v6442_v45 = vcombine.low %v2019_v33, %v2023_v34  ;;  %v6446_v56 = vcombine.low %v2020_v36, %v2024_v37  ;;  %v6474_v1 = vcombine.high %v2035_v47, %v2039_v48  ;;  %v2063_v33 = vld [vmem:[%s8394_s3 + $0x2e0] sm:$0xff] }
  0xc0   :  { %1703 = vmatprep.mubr.bf16.mxu0 %v5536_v16  ;;  %1849 = vmatprep.mubr.bf16.mxu1 %v5536_v16  ;;  %8674 = vst [vmem:[#allocation9_spill] sm:$0xff] %v6292_v62  ;;  %8676 = vst [vmem:[#allocation11_spill] sm:$0xff] %v6312_v5  ;;  %v6472_v55 = vcombine.low %v2028_v43, %v2032_v44  ;;  %v2060_v34 = vld [vmem:[%s8394_s3 + $0x2c8] sm:$0xff]  ;;  %v6542_v37 = vcombine.low %v2051_v11, %v2055_v18  ;;  %v2071_v47 = vld [vmem:[%s8394_s3 + $0x320] sm:$0xff] }
  0xc1   :  { %8696 = vst [vmem:[#allocation31_spill] sm:$0xff] %v6442_v45  ;;  %8697 = vst [vmem:[#allocation32_spill] sm:$0xff] %v6446_v56  ;;  %v2064_v36 = vld [vmem:[%s8394_s3 + $0x2e8] sm:$0xff] }
  0xc2   :  { %1686 = vmatpush1.bf16.msra.mxu0 %v4943_v50  ;;  %1832 = vmatpush1.bf16.msra.mxu1 %v4945_v51  ;;  %v2040_v50 = vld [vmem:[%s8394_s3 + $0x228] sm:$0xff]  ;;  %8701 = vst [vmem:[#allocation36_spill] sm:$0xff] %v6472_v55  ;;  %8702 = vst [vmem:[#allocation37_spill] sm:$0xff] %v6474_v1 }
  0xc3   :  { %2739 = vmatprep.subr.bf16.mxu0 %v6269_v52  ;;  %2780 = vmatprep.subr.bf16.mxu1 %v6272_v54  ;;  %v6477_v57 = vcombine.high %v2036_v49, %v2040_v50  ;;  %8712 = vst [vmem:[#allocation47_spill] sm:$0xff] %v6542_v37  ;;  %v2068_v48 = vld [vmem:[%s8394_s3 + $0x308] sm:$0xff] }
  0xc5   :  { %1704 = vmatmul.mubr.bf16.vlgmr.msra.gmra.mrb[16].mxu0 %v5940_v21  ;;  %1850 = vmatmul.mubr.bf16.vlgmr.msra.gmra.mrb[16].mxu1 %v5940_v21  ;;  %v1995_v21 = vld [vmem:[%s8394_s3 + $0xc0] sm:$0xff]  ;;  %8703 = vst [vmem:[#allocation38_spill] sm:$0xff] %v6477_v57 }
  0xc6   :  { %2740 = vmatpush1.bf16.msra.mxu0 %v6287_v59  ;;  %2781 = vmatpush1.bf16.msra.mxu1 %v6290_v61  ;;  %v6344_v13 = vcombine.high %v1995_v21, %v1999_v8  ;;  %v6364_v23 = vcombine.low %v1995_v21, %v1999_v8  ;;  %v6498_v21 = vcombine.low %v2036_v49, %v2040_v50  ;;  %v2072_v49 = vld [vmem:[%s8394_s3 + $0x328] sm:$0xff] }
  0xc7   :  { %2741 = vmatprep.subr.bf16.mxu0 %v6292_v62  ;;  %2782 = vmatprep.subr.bf16.mxu1 %v6295_v63  ;;  %v6566_v50 = vcombine.low %v2059_v29, %v2063_v33 }
  0xc8   :  { %1713 = vmatprep.mubr.bf16.mxu0 %v5536_v16  ;;  %1859 = vmatprep.mubr.bf16.mxu1 %v5536_v16  ;;  %8682 = vst [vmem:[#allocation17_spill] sm:$0xff] %v6344_v13  ;;  %8684 = vst [vmem:[#allocation19_spill] sm:$0xff] %v6364_v23 }
  0xc9   :  { %8705 = vst [vmem:[#allocation40_spill] sm:$0xff] %v6498_v21  ;;  %8716 = vst [vmem:[#allocation51_spill] sm:$0xff] %v6566_v50 }
  0xca   :  { %2742 = vmatpush1.bf16.msra.mxu0 %v6312_v5  ;;  %2783 = vmatpush1.bf16.msra.mxu1 %v6316_v10 }
  0xcb   :  { %2743 = vmatprep.subr.bf16.mxu0 %v6318_v6  ;;  %2784 = vmatprep.subr.bf16.mxu1 %v6322_v7 }
  0xcd   :  { %1714 = vmatmul.mubr.bf16.gmra.mrb[20].mxu0 %v5973_v40  ;;  %1860 = vmatmul.mubr.bf16.gmra.mrb[20].mxu1 %v5973_v40  ;;  %v2011_v40 = vld [vmem:[%s8394_s3 + $0x140] sm:$0xff] }
  0xce   :  { %2744 = vmatpush1.bf16.msra.mxu0 %v6338_v17  ;;  %2785 = vmatpush1.bf16.msra.mxu1 %v6342_v12  ;;  %v6396_v31 = vcombine.high %v2011_v40, %v2015_v26  ;;  %v6416_v38 = vcombine.low %v2011_v40, %v2015_v26  ;;  %v6522_v40 = vcombine.low %v2044_v2, %v2048_v3  ;;  %v2075_v3 = vld [vmem:[%s8394_s3 + $0x340] sm:$0xff] }
  0xcf   :  { %2745 = vmatprep.subr.bf16.mxu0 %v6344_v13  ;;  %2786 = vmatprep.subr.bf16.mxu1 %v6347_v14  ;;  %v6524_v26 = vcombine.high %v2051_v11, %v2055_v18  ;;  %v6575_v2 = vcombine.high %v2068_v48, %v2072_v49  ;;  %v2079_v11 = vld [vmem:[%s8394_s3 + $0x360] sm:$0xff]  ;;  %v2076_v18 = vld [vmem:[%s8394_s3 + $0x348] sm:$0xff] }
  0xd0   :  { %1723 = vmatprep.mubr.bf16.mxu0 %v5536_v16  ;;  %1869 = vmatprep.mubr.bf16.mxu1 %v5536_v16  ;;  %8690 = vst [vmem:[#allocation25_spill] sm:$0xff] %v6396_v31  ;;  %8692 = vst [vmem:[#allocation27_spill] sm:$0xff] %v6416_v38 }
  0xd1   :  { %8709 = vst [vmem:[#allocation44_spill] sm:$0xff] %v6522_v40  ;;  %8710 = vst [vmem:[#allocation45_spill] sm:$0xff] %v6524_v26 }
  0xd2   :  { %2746 = vmatpush1.bf16.msra.mxu0 %v6364_v23  ;;  %2787 = vmatpush1.bf16.msra.mxu1 %v6368_v24  ;;  %8719 = vst [vmem:[#allocation54_spill] sm:$0xff] %v6575_v2 }
  0xd3   :  { %2747 = vmatprep.subr.bf16.mxu0 %v6370_v28  ;;  %2788 = vmatprep.subr.bf16.mxu1 %v6374_v25 }
  0xd5   :  { %1724 = vmatmul.mubr.bf16.gmra.mrb[24].mxu0 %v6006_v60  ;;  %1870 = vmatmul.mubr.bf16.gmra.mrb[24].mxu1 %v6006_v60  ;;  %v2027_v60 = vld [vmem:[%s8394_s3 + $0x1c0] sm:$0xff] }
  0xd6   :  { %2748 = vmatpush1.bf16.msra.mxu0 %v6390_v30  ;;  %2789 = vmatpush1.bf16.msra.mxu1 %v6394_v35  ;;  %v6448_v53 = vcombine.high %v2027_v60, %v2031_v42  ;;  %v6468_v51 = vcombine.low %v2027_v60, %v2031_v42  ;;  %v6546_v60 = vcombine.low %v2052_v19, %v2056_v20  ;;  %v2080_v19 = vld [vmem:[%s8394_s3 + $0x368] sm:$0xff] }
  0xd7   :  { %2749 = vmatprep.subr.bf16.mxu0 %v6396_v31  ;;  %2790 = vmatprep.subr.bf16.mxu1 %v6399_v32  ;;  %v6548_v42 = vcombine.high %v2059_v29, %v2063_v33  ;;  %v6594_v29 = vcombine.low %v2068_v48, %v2072_v49  ;;  %v6596_v33 = vcombine.high %v2075_v3, %v2079_v11  ;;  %v2088_v48 = vld [vmem:[%s8394_s3 + $0x3a8] sm:$0xff] }
  0xd8   :  { %1733 = vmatprep.mubr.bf16.mxu0 %v5536_v16  ;;  %1879 = vmatprep.mubr.bf16.mxu1 %v5536_v16  ;;  %8698 = vst [vmem:[#allocation33_spill] sm:$0xff] %v6448_v53  ;;  %v6451_v16 = vcombine.high %v2028_v43, %v2032_v44  ;;  %8700 = vst [vmem:[#allocation35_spill] sm:$0xff] %v6468_v51  ;;  %v6551_v43 = vcombine.high %v2060_v34, %v2064_v36  ;;  %v2067_v44 = vld [vmem:[%s8394_s3 + $0x300] sm:$0xff] }
  0xd9   :  { %8713 = vst [vmem:[#allocation48_spill] sm:$0xff] %v6546_v60  ;;  %8714 = vst [vmem:[#allocation49_spill] sm:$0xff] %v6548_v42  ;;  %v6590_v20 = vcombine.low %v2067_v44, %v2071_v47  ;;  %v6614_v49 = vcombine.low %v2075_v3, %v2079_v11  ;;  %v2095_v3 = vld [vmem:[%s8394_s3 + $0x3e0] sm:$0xff]  ;;  %v2092_v11 = vld [vmem:[%s8394_s3 + $0x3c8] sm:$0xff] }
  0xda   :  { %2750 = vmatpush1.bf16.msra.mxu0 %v6416_v38  ;;  %2791 = vmatpush1.bf16.msra.mxu1 %v6420_v39  ;;  %8699 = vst [vmem:[#allocation34_spill] sm:$0xff] %v6451_v16  ;;  %8715 = vst [vmem:[#allocation50_spill] sm:$0xff] %v6551_v43 }
  0xdb   :  { %2751 = vmatprep.subr.bf16.mxu0 %v6422_v41  ;;  %2792 = vmatprep.subr.bf16.mxu1 %v6426_v46  ;;  %8720 = vst [vmem:[#allocation55_spill] sm:$0xff] %v6590_v20  ;;  %8721 = vst [vmem:[#allocation56_spill] sm:$0xff] %v6594_v29 }
  0xdc   :  { %8722 = vst [vmem:[#allocation57_spill] sm:$0xff] %v6596_v33  ;;  %8724 = vst [vmem:[#allocation59_spill] sm:$0xff] %v6614_v49 }
  0xdd   :  { %1734 = vmatmul.mubr.bf16.gmra.mrb[28].mxu0 %v6039_v15  ;;  %1880 = vmatmul.mubr.bf16.gmra.mrb[28].mxu1 %v6039_v15  ;;  %v2043_v15 = vld [vmem:[%s8394_s3 + $0x240] sm:$0xff] }
  0xde   :  { %2752 = vmatpush1.bf16.msra.mxu0 %v6442_v45  ;;  %2793 = vmatpush1.bf16.msra.mxu1 %v6446_v56  ;;  %v6500_v8 = vcombine.high %v2043_v15, %v2047_v58  ;;  %v6518_v22 = vcombine.low %v2043_v15, %v2047_v58  ;;  %v6570_v15 = vcombine.low %v2060_v34, %v2064_v36  ;;  %v2083_v36 = vld [vmem:[%s8394_s3 + $0x380] sm:$0xff] }
  0xdf   :  { %2753 = vmatprep.subr.bf16.mxu0 %v6448_v53  ;;  %2794 = vmatprep.subr.bf16.mxu1 %v6451_v16  ;;  %v6572_v58 = vcombine.high %v2067_v44, %v2071_v47  ;;  %v6599_v34 = vcombine.high %v2076_v18, %v2080_v19  ;;  %v2087_v44 = vld [vmem:[%s8394_s3 + $0x3a0] sm:$0xff]  ;;  %v2084_v47 = vld [vmem:[%s8394_s3 + $0x388] sm:$0xff] }
  0xe0   :  { %2771 = vmatprep.mubr.bf16.mxu0 %v8399_v0  ;;  %2812 = vmatprep.mubr.bf16.mxu1 %v8399_v0  ;;  %8706 = vst [vmem:[#allocation41_spill] sm:$0xff] %v6500_v8  ;;  %8708 = vst [vmem:[#allocation43_spill] sm:$0xff] %v6518_v22  ;;  %v6618_v0 = vcombine.low %v2076_v18, %v2080_v19  ;;  %v2096_v18 = vld [vmem:[%s8394_s3 + $0x3e8] sm:$0xff]  ;;  %v6638_v19 = vcombine.low %v2083_v36, %v2087_v44 }
  0xe1   :  { %8717 = vst [vmem:[#allocation52_spill] sm:$0xff] %v6570_v15  ;;  %8718 = vst [vmem:[#allocation53_spill] sm:$0xff] %v6572_v58 }
  0xe2   :  { %2754 = vmatpush1.bf16.msra.mxu0 %v6468_v51  ;;  %2795 = vmatpush1.bf16.msra.mxu1 %v6472_v55  ;;  %8723 = vst [vmem:[#allocation58_spill] sm:$0xff] %v6599_v34  ;;  %8725 = vst [vmem:[#allocation60_spill] sm:$0xff] %v6618_v0 }
  0xe3   :  { %2755 = vmatprep.subr.bf16.mxu0 %v6474_v1  ;;  %2796 = vmatprep.subr.bf16.mxu1 %v6477_v57  ;;  %8728 = vst [vmem:[#allocation63_spill] sm:$0xff] %v6638_v19 }
  0xe6   :  { %2756 = vmatpush1.bf16.msra.mxu0 %v6494_v4  ;;  %2797 = vmatpush1.bf16.msra.mxu1 %v6498_v21 }
  0xe7   :  { %2757 = vmatprep.subr.bf16.mxu0 %v6500_v8  ;;  %2798 = vmatprep.subr.bf16.mxu1 %v6503_v9 }
  0xea   :  { %2758 = vmatpush1.bf16.msra.mxu0 %v6518_v22  ;;  %2799 = vmatpush1.bf16.msra.mxu1 %v6522_v40 }
  0xeb   :  { %2759 = vmatprep.subr.bf16.mxu0 %v6524_v26  ;;  %2800 = vmatprep.subr.bf16.mxu1 %v6527_v27 }
  0xee   :  { %2760 = vmatpush1.bf16.msra.mxu0 %v6542_v37  ;;  %2801 = vmatpush1.bf16.msra.mxu1 %v6546_v60 }
  0xef   :  { %2761 = vmatprep.subr.bf16.mxu0 %v6548_v42  ;;  %2802 = vmatprep.subr.bf16.mxu1 %v6551_v43  ;;  %v2077_v43 = vld [vmem:[%s8394_s3 + $0x350] sm:$0xff] }
  0xf2   :  { %2762 = vmatpush1.bf16.msra.mxu0 %v6566_v50  ;;  %2803 = vmatpush1.bf16.msra.mxu1 %v6570_v15  ;;  %v2091_v15 = vld [vmem:[%s8394_s3 + $0x3c0] sm:$0xff]  ;;  %v1997_v50 = vld [vmem:[%s8394_s3 + $0xd0] sm:$0xff] }
  0xf3   :  { %2763 = vmatprep.subr.bf16.mxu0 %v6572_v58  ;;  %2804 = vmatprep.subr.bf16.mxu1 %v6575_v2  ;;  %v6620_v2 = vcombine.high %v2083_v36, %v2087_v44  ;;  %v6623_v58 = vcombine.high %v2084_v47, %v2088_v48  ;;  %v1977_v36 = vld [vmem:[%s8394_s3 + $0x30] sm:$0xff]  ;;  %v1974_v44 = vld [vmem:[%s8394_s3 + $0x18] sm:$0xff] }
  0xf5   :  { %8726 = vst [vmem:[#allocation61_spill] sm:$0xff] %v6620_v2  ;;  %8727 = vst [vmem:[#allocation62_spill] sm:$0xff] %v6623_v58 }
  0xf6   :  { %2764 = vmatpush1.bf16.msra.mxu0 %v6590_v20  ;;  %2805 = vmatpush1.bf16.msra.mxu1 %v6594_v29  ;;  %v6647_v29 = vcombine.high %v2092_v11, %v2096_v18  ;;  %v1973_v20 = vld [vmem:[%s8394_s3 + $0x10] sm:$0xff] }
  0xf7   :  { %2765 = vmatprep.subr.bf16.mxu0 %v6596_v33  ;;  %2806 = vmatprep.subr.bf16.mxu1 %v6599_v34  ;;  %v6642_v34 = vcombine.low %v2084_v47, %v2088_v48  ;;  %v6644_v33 = vcombine.high %v2091_v15, %v2095_v3  ;;  %v1978_v47 = vld [vmem:[%s8394_s3 + $0x38] sm:$0xff]  ;;  %v6662_v48 = vcombine.low %v2091_v15, %v2095_v3  ;;  %v1985_v15 = vld [vmem:[%s8394_s3 + $0x70] sm:$0xff] }
  0xf8   :  { %8731 = vst [vmem:[#allocation66_spill] sm:$0xff] %v6647_v29  ;;  %v1982_v3 = vld [vmem:[%s8394_s3 + $0x58] sm:$0xff] }
  0xf9   :  { %8729 = vst [vmem:[#allocation64_spill] sm:$0xff] %v6642_v34  ;;  %8730 = vst [vmem:[#allocation65_spill] sm:$0xff] %v6644_v33 }
  0xfa   :  { %2766 = vmatpush1.bf16.msra.mxu0 %v6614_v49  ;;  %2807 = vmatpush1.bf16.msra.mxu1 %v6618_v0  ;;  %8732 = vst [vmem:[#allocation67_spill] sm:$0xff] %v6662_v48  ;;  %v6671_v0 = vcombine.high %v1974_v44, %v1978_v47  ;;  %v1981_v49 = vld [vmem:[%s8394_s3 + $0x50] sm:$0xff] }
  0xfb   :  { %2767 = vmatprep.subr.bf16.mxu0 %v6620_v2  ;;  %2808 = vmatprep.subr.bf16.mxu1 %v6623_v58  ;;  %v6666_v58 = vcombine.low %v2092_v11, %v2096_v18  ;;  %v6668_v2 = vcombine.high %v1973_v20, %v1977_v36  ;;  %v1986_v11 = vld [vmem:[%s8394_s3 + $0x78] sm:$0xff]  ;;  %v6686_v18 = vcombine.low %v1973_v20, %v1977_v36  ;;  %v1993_v20 = vld [vmem:[%s8394_s3 + $0xb0] sm:$0xff]  ;;  %v8740_v36 = vmov 0.0|0.0  }
  0xfc   :  { %8735 = vst [vmem:[#allocation70_spill] sm:$0xff] %v6671_v0 }
  0xfd   :  { %8733 = vst [vmem:[#allocation68_spill] sm:$0xff] %v6666_v58  ;;  %8734 = vst [vmem:[#allocation69_spill] sm:$0xff] %v6668_v2 }
  0xfe   :  { %2768 = vmatpush1.bf16.msra.mxu0 %v6638_v19  ;;  %2809 = vmatpush1.bf16.msra.mxu1 %v6642_v34  ;;  %8736 = vst [vmem:[#allocation71_spill] sm:$0xff] %v6686_v18  ;;  %v6695_v34 = vcombine.high %v1982_v3, %v1986_v11  ;;  %v1989_v19 = vld [vmem:[%s8394_s3 + $0x90] sm:$0xff] }
  0xff   :  { %2769 = vmatprep.subr.bf16.mxu0 %v6644_v33  ;;  %2810 = vmatprep.subr.bf16.mxu1 %v6647_v29  ;;  %v6690_v29 = vcombine.low %v1974_v44, %v1978_v47  ;;  %v6692_v33 = vcombine.high %v1981_v49, %v1985_v15  ;;  %v1990_v44 = vld [vmem:[%s8394_s3 + $0x98] sm:$0xff] }
 0x100   :  { %8739 = vst [vmem:[#allocation74_spill] sm:$0xff] %v6695_v34  ;;  %v1994_v47 = vld [vmem:[%s8394_s3 + $0xb8] sm:$0xff] }
 0x101   :  { %8737 = vst [vmem:[#allocation72_spill] sm:$0xff] %v6690_v29  ;;  %8738 = vst [vmem:[#allocation73_spill] sm:$0xff] %v6692_v33 }
 0x102   :  { %2770 = vmatpush1.bf16.msra.mxu0 %v6662_v48  ;;  %2811 = vmatpush1.bf16.msra.mxu1 %v6666_v58  ;;  %v6718_v58 = vcombine.high %v1989_v19, %v1993_v20  ;;  %v6721_v48 = vcombine.high %v1990_v44, %v1994_v47 }
 0x103   :  { %2821 = vmatprep.subr.bf16.mxu0 %v6668_v2  ;;  %2862 = vmatprep.subr.bf16.mxu1 %v6671_v0  ;;  %v6712_v0 = vcombine.low %v1981_v49, %v1985_v15  ;;  %v6716_v2 = vcombine.low %v1982_v3, %v1986_v11  ;;  %v2001_v49 = vld [vmem:[%s8394_s3 + $0xf0] sm:$0xff]  ;;  %v1998_v15 = vld [vmem:[%s8394_s3 + $0xd8] sm:$0xff]  ;;  %v6738_v11 = vcombine.low %v1989_v19, %v1993_v20 }
 0x104   :  { %8743 = vst [vmem:[#allocation77_spill] sm:$0xff] %v6718_v58  ;;  %8744 = vst [vmem:[#allocation78_spill] sm:$0xff] %v6721_v48  ;;  %v2002_v3 = vld [vmem:[%s8394_s3 + $0xf8] sm:$0xff]  ;;  %v2009_v19 = vld [vmem:[%s8394_s3 + $0x130] sm:$0xff] }
 0x105   :  { %2772 = vmatmul.mubr.bf16.vlgmr.msra.gmra.mrb[32].mxu0 %v8740_v36  ;;  %2813 = vmatmul.mubr.bf16.vlgmr.msra.gmra.mrb[32].mxu1 %v8740_v36  ;;  %8741 = vst [vmem:[#allocation75_spill] sm:$0xff] %v6712_v0  ;;  %8742 = vst [vmem:[#allocation76_spill] sm:$0xff] %v6716_v2  ;;  %v2006_v20 = vld [vmem:[%s8394_s3 + $0x118] sm:$0xff] }
 0x106   :  { %2822 = vmatpush1.bf16.msra.mxu0 %v6686_v18  ;;  %2863 = vmatpush1.bf16.msra.mxu1 %v6690_v29  ;;  %8745 = vst [vmem:[#allocation79_spill] sm:$0xff] %v6738_v11  ;;  %v6747_v29 = vcombine.high %v1998_v15, %v2002_v3  ;;  %v2005_v18 = vld [vmem:[%s8394_s3 + $0x110] sm:$0xff] }
 0x107   :  { %2823 = vmatprep.subr.bf16.mxu0 %v6692_v33  ;;  %2864 = vmatprep.subr.bf16.mxu1 %v6695_v34  ;;  %v6742_v34 = vcombine.low %v1990_v44, %v1994_v47  ;;  %v6744_v33 = vcombine.high %v1997_v50, %v2001_v49  ;;  %v2010_v44 = vld [vmem:[%s8394_s3 + $0x138] sm:$0xff]  ;;  %v6762_v47 = vcombine.low %v1997_v50, %v2001_v49  ;;  %v2017_v50 = vld [vmem:[%s8394_s3 + $0x170] sm:$0xff] }
 0x108   :  { %2853 = vmatprep.mubr.bf16.mxu0 %v8740_v36  ;;  %2894 = vmatprep.mubr.bf16.mxu1 %v8740_v36  ;;  %8748 = vst [vmem:[#allocation82_spill] sm:$0xff] %v6747_v29  ;;  %v2014_v49 = vld [vmem:[%s8394_s3 + $0x158] sm:$0xff] }
 0x109   :  { %8746 = vst [vmem:[#allocation80_spill] sm:$0xff] %v6742_v34  ;;  %8747 = vst [vmem:[#allocation81_spill] sm:$0xff] %v6744_v33 }
 0x10a   :  { %2824 = vmatpush1.bf16.msra.mxu0 %v6712_v0  ;;  %2865 = vmatpush1.bf16.msra.mxu1 %v6716_v2  ;;  %8749 = vst [vmem:[#allocation83_spill] sm:$0xff] %v6762_v47  ;;  %v6771_v2 = vcombine.high %v2006_v20, %v2010_v44  ;;  %v2013_v0 = vld [vmem:[%s8394_s3 + $0x150] sm:$0xff] }
 0x10b   :  { %2825 = vmatprep.subr.bf16.mxu0 %v6718_v58  ;;  %2866 = vmatprep.subr.bf16.mxu1 %v6721_v48  ;;  %v6766_v48 = vcombine.low %v1998_v15, %v2002_v3  ;;  %v6768_v58 = vcombine.high %v2005_v18, %v2009_v19  ;;  %v2018_v15 = vld [vmem:[%s8394_s3 + $0x178] sm:$0xff]  ;;  %v6786_v3 = vcombine.low %v2005_v18, %v2009_v19  ;;  %v2025_v18 = vld [vmem:[%s8394_s3 + $0x1b0] sm:$0xff] }
 0x10c   :  { %8752 = vst [vmem:[#allocation86_spill] sm:$0xff] %v6771_v2  ;;  %v2022_v19 = vld [vmem:[%s8394_s3 + $0x198] sm:$0xff] }
 0x10d   :  { %8750 = vst [vmem:[#allocation84_spill] sm:$0xff] %v6766_v48  ;;  %8751 = vst [vmem:[#allocation85_spill] sm:$0xff] %v6768_v58 }
 0x10e   :  { %2826 = vmatpush1.bf16.msra.mxu0 %v6738_v11  ;;  %2867 = vmatpush1.bf16.msra.mxu1 %v6742_v34  ;;  %8753 = vst [vmem:[#allocation87_spill] sm:$0xff] %v6786_v3  ;;  %v6795_v34 = vcombine.high %v2014_v49, %v2018_v15  ;;  %v2021_v11 = vld [vmem:[%s8394_s3 + $0x190] sm:$0xff] }
 0x10f   :  { %2827 = vmatprep.subr.bf16.mxu0 %v6744_v33  ;;  %2868 = vmatprep.subr.bf16.mxu1 %v6747_v29  ;;  %v6790_v29 = vcombine.low %v2006_v20, %v2010_v44  ;;  %v6792_v33 = vcombine.high %v2013_v0, %v2017_v50  ;;  %v2026_v20 = vld [vmem:[%s8394_s3 + $0x1b8] sm:$0xff]  ;;  %v6810_v44 = vcombine.low %v2013_v0, %v2017_v50  ;;  %v2033_v0 = vld [vmem:[%s8394_s3 + $0x1f0] sm:$0xff] }
 0x110   :  { %8756 = vst [vmem:[#allocation90_spill] sm:$0xff] %v6795_v34  ;;  %v2030_v50 = vld [vmem:[%s8394_s3 + $0x1d8] sm:$0xff] }
 0x111   :  { %8754 = vst [vmem:[#allocation88_spill] sm:$0xff] %v6790_v29  ;;  %8755 = vst [vmem:[#allocation89_spill] sm:$0xff] %v6792_v33 }
 0x112   :  { %2828 = vmatpush1.bf16.msra.mxu0 %v6762_v47  ;;  %2869 = vmatpush1.bf16.msra.mxu1 %v6766_v48  ;;  %8757 = vst [vmem:[#allocation91_spill] sm:$0xff] %v6810_v44  ;;  %v6819_v48 = vcombine.high %v2022_v19, %v2026_v20  ;;  %v2029_v47 = vld [vmem:[%s8394_s3 + $0x1d0] sm:$0xff] }
 0x113   :  { %2829 = vmatprep.subr.bf16.mxu0 %v6768_v58  ;;  %2870 = vmatprep.subr.bf16.mxu1 %v6771_v2  ;;  %v6814_v2 = vcombine.low %v2014_v49, %v2018_v15  ;;  %v6816_v58 = vcombine.high %v2021_v11, %v2025_v18  ;;  %v2034_v49 = vld [vmem:[%s8394_s3 + $0x1f8] sm:$0xff]  ;;  %v6834_v15 = vcombine.low %v2021_v11, %v2025_v18  ;;  %v2041_v11 = vld [vmem:[%s8394_s3 + $0x230] sm:$0xff] }
 0x114   :  { %8760 = vst [vmem:[#allocation94_spill] sm:$0xff] %v6819_v48  ;;  %v2038_v18 = vld [vmem:[%s8394_s3 + $0x218] sm:$0xff] }
 0x115   :  { %8758 = vst [vmem:[#allocation92_spill] sm:$0xff] %v6814_v2  ;;  %8759 = vst [vmem:[#allocation93_spill] sm:$0xff] %v6816_v58 }
 0x116   :  { %2830 = vmatpush1.bf16.msra.mxu0 %v6786_v3  ;;  %2871 = vmatpush1.bf16.msra.mxu1 %v6790_v29  ;;  %8761 = vst [vmem:[#allocation95_spill] sm:$0xff] %v6834_v15  ;;  %v6843_v29 = vcombine.high %v2030_v50, %v2034_v49  ;;  %v2037_v3 = vld [vmem:[%s8394_s3 + $0x210] sm:$0xff] }
 0x117   :  { %2831 = vmatprep.subr.bf16.mxu0 %v6792_v33  ;;  %2872 = vmatprep.subr.bf16.mxu1 %v6795_v34  ;;  %v6838_v34 = vcombine.low %v2022_v19, %v2026_v20  ;;  %v6840_v33 = vcombine.high %v2029_v47, %v2033_v0  ;;  %v2042_v19 = vld [vmem:[%s8394_s3 + $0x238] sm:$0xff]  ;;  %v6858_v20 = vcombine.low %v2029_v47, %v2033_v0  ;;  %v2049_v47 = vld [vmem:[%s8394_s3 + $0x270] sm:$0xff] }
 0x118   :  { %8764 = vst [vmem:[#allocation98_spill] sm:$0xff] %v6843_v29  ;;  %v2046_v0 = vld [vmem:[%s8394_s3 + $0x258] sm:$0xff] }
 0x119   :  { %8762 = vst [vmem:[#allocation96_spill] sm:$0xff] %v6838_v34  ;;  %8763 = vst [vmem:[#allocation97_spill] sm:$0xff] %v6840_v33 }
 0x11a   :  { %2832 = vmatpush1.bf16.msra.mxu0 %v6810_v44  ;;  %2873 = vmatpush1.bf16.msra.mxu1 %v6814_v2  ;;  %8765 = vst [vmem:[#allocation99_spill] sm:$0xff] %v6858_v20  ;;  %v6867_v2 = vcombine.high %v2038_v18, %v2042_v19  ;;  %v2045_v44 = vld [vmem:[%s8394_s3 + $0x250] sm:$0xff] }
 0x11b   :  { %2833 = vmatprep.subr.bf16.mxu0 %v6816_v58  ;;  %2874 = vmatprep.subr.bf16.mxu1 %v6819_v48  ;;  %v6862_v48 = vcombine.low %v2030_v50, %v2034_v49  ;;  %v6864_v58 = vcombine.high %v2037_v3, %v2041_v11  ;;  %v2050_v50 = vld [vmem:[%s8394_s3 + $0x278] sm:$0xff]  ;;  %v6882_v49 = vcombine.low %v2037_v3, %v2041_v11  ;;  %v2057_v3 = vld [vmem:[%s8394_s3 + $0x2b0] sm:$0xff] }
 0x11c   :  { %8768 = vst [vmem:[#allocation102_spill] sm:$0xff] %v6867_v2  ;;  %v2054_v11 = vld [vmem:[%s8394_s3 + $0x298] sm:$0xff] }
 0x11d   :  { %8766 = vst [vmem:[#allocation100_spill] sm:$0xff] %v6862_v48  ;;  %8767 = vst [vmem:[#allocation101_spill] sm:$0xff] %v6864_v58 }
 0x11e   :  { %2834 = vmatpush1.bf16.msra.mxu0 %v6834_v15  ;;  %2875 = vmatpush1.bf16.msra.mxu1 %v6838_v34  ;;  %8769 = vst [vmem:[#allocation103_spill] sm:$0xff] %v6882_v49  ;;  %v6891_v34 = vcombine.high %v2046_v0, %v2050_v50  ;;  %v2053_v15 = vld [vmem:[%s8394_s3 + $0x290] sm:$0xff] }
 0x11f   :  { %2835 = vmatprep.subr.bf16.mxu0 %v6840_v33  ;;  %2876 = vmatprep.subr.bf16.mxu1 %v6843_v29  ;;  %v6886_v29 = vcombine.low %v2038_v18, %v2042_v19  ;;  %v6888_v33 = vcombine.high %v2045_v44, %v2049_v47  ;;  %v2058_v18 = vld [vmem:[%s8394_s3 + $0x2b8] sm:$0xff]  ;;  %v6906_v19 = vcombine.low %v2045_v44, %v2049_v47  ;;  %v2065_v44 = vld [vmem:[%s8394_s3 + $0x2f0] sm:$0xff] }
 0x120   :  { %8772 = vst [vmem:[#allocation106_spill] sm:$0xff] %v6891_v34  ;;  %v2062_v47 = vld [vmem:[%s8394_s3 + $0x2d8] sm:$0xff] }
 0x121   :  { %8770 = vst [vmem:[#allocation104_spill] sm:$0xff] %v6886_v29  ;;  %8771 = vst [vmem:[#allocation105_spill] sm:$0xff] %v6888_v33 }
 0x122   :  { %2836 = vmatpush1.bf16.msra.mxu0 %v6858_v20  ;;  %2877 = vmatpush1.bf16.msra.mxu1 %v6862_v48  ;;  %8773 = vst [vmem:[#allocation107_spill] sm:$0xff] %v6906_v19  ;;  %v6915_v48 = vcombine.high %v2054_v11, %v2058_v18  ;;  %v2061_v20 = vld [vmem:[%s8394_s3 + $0x2d0] sm:$0xff] }
 0x123   :  { %2837 = vmatprep.subr.bf16.mxu0 %v6864_v58  ;;  %2878 = vmatprep.subr.bf16.mxu1 %v6867_v2  ;;  %v6910_v2 = vcombine.low %v2046_v0, %v2050_v50  ;;  %v6912_v58 = vcombine.high %v2053_v15, %v2057_v3  ;;  %v2066_v0 = vld [vmem:[%s8394_s3 + $0x2f8] sm:$0xff]  ;;  %v6930_v50 = vcombine.low %v2053_v15, %v2057_v3  ;;  %v2073_v15 = vld [vmem:[%s8394_s3 + $0x330] sm:$0xff] }
 0x124   :  { %8776 = vst [vmem:[#allocation110_spill] sm:$0xff] %v6915_v48  ;;  %v2070_v3 = vld [vmem:[%s8394_s3 + $0x318] sm:$0xff] }
 0x125   :  { %8774 = vst [vmem:[#allocation108_spill] sm:$0xff] %v6910_v2  ;;  %8775 = vst [vmem:[#allocation109_spill] sm:$0xff] %v6912_v58 }
 0x126   :  { %2838 = vmatpush1.bf16.msra.mxu0 %v6882_v49  ;;  %2879 = vmatpush1.bf16.msra.mxu1 %v6886_v29  ;;  %8777 = vst [vmem:[#allocation111_spill] sm:$0xff] %v6930_v50  ;;  %v6939_v29 = vcombine.high %v2062_v47, %v2066_v0  ;;  %v2069_v49 = vld [vmem:[%s8394_s3 + $0x310] sm:$0xff] }
 0x127   :  { %2839 = vmatprep.subr.bf16.mxu0 %v6888_v33  ;;  %2880 = vmatprep.subr.bf16.mxu1 %v6891_v34  ;;  %v6934_v34 = vcombine.low %v2054_v11, %v2058_v18  ;;  %v6936_v33 = vcombine.high %v2061_v20, %v2065_v44  ;;  %v2074_v11 = vld [vmem:[%s8394_s3 + $0x338] sm:$0xff]  ;;  %v242_v18 = vlaneseq }
 0x128   :  { %8780 = vst [vmem:[#allocation114_spill] sm:$0xff] %v6939_v29 }
 0x129   :  { %8778 = vst [vmem:[#allocation112_spill] sm:$0xff] %v6934_v34  ;;  %8779 = vst [vmem:[#allocation113_spill] sm:$0xff] %v6936_v33 }
 0x12a   :  { %2840 = vmatpush1.bf16.msra.mxu0 %v6906_v19  ;;  %2881 = vmatpush1.bf16.msra.mxu1 %v6910_v2  ;;  %v6960_v2 = vcombine.high %v2069_v49, %v2073_v15  ;;  %v6963_v19 = vcombine.high %v2070_v3, %v2074_v11 }
 0x12b   :  { %2841 = vmatprep.subr.bf16.mxu0 %v6912_v58  ;;  %2882 = vmatprep.subr.bf16.mxu1 %v6915_v48  ;;  %v6954_v48 = vcombine.low %v2061_v20, %v2065_v44  ;;  %v6958_v58 = vcombine.low %v2062_v47, %v2066_v0  ;;  %v2081_v20 = vld [vmem:[%s8394_s3 + $0x370] sm:$0xff]  ;;  %v6971_v44 = vshrl.u32 %v242_v18, 7  ;;  %v2078_v47 = vld [vmem:[%s8394_s3 + $0x358] sm:$0xff] }
 0x12c   :  { %8783 = vst [vmem:[#allocation117_spill] sm:$0xff] %v6960_v2  ;;  %8784 = vst [vmem:[#allocation118_spill] sm:$0xff] %v6963_v19  ;;  %v2082_v0 = vld [vmem:[%s8394_s3 + $0x378] sm:$0xff]  ;;  %v6986_v18 = vcombine.high %v2077_v43, %v2081_v20  ;;  %v7013_v42 = vcombine.low %v2077_v43, %v2081_v20  ;;  %v2097_v43 = vld [vmem:[%s8394_s3 + $0x3f0] sm:$0xff] }
 0x12d   :  { %8781 = vst [vmem:[#allocation115_spill] sm:$0xff] %v6954_v48  ;;  %8782 = vst [vmem:[#allocation116_spill] sm:$0xff] %v6958_v58  ;;  %v7017_v60 = vcombine.low %v2078_v47, %v2082_v0 }
 0x12e   :  { %2842 = vmatpush1.bf16.msra.mxu0 %v6930_v50  ;;  %2883 = vmatpush1.bf16.msra.mxu1 %v6934_v34  ;;  %8785 = vst [vmem:[#allocation119_spill] sm:$0xff] %v6971_v44  ;;  %8788 = vst [vmem:[#allocation122_spill] sm:$0xff] %v6986_v18  ;;  %v6989_v34 = vcombine.high %v2078_v47, %v2082_v0  ;;  %v2085_v50 = vld [vmem:[%s8394_s3 + $0x390] sm:$0xff] }
 0x12f   :  { %2843 = vmatprep.subr.bf16.mxu0 %v6936_v33  ;;  %2884 = vmatprep.subr.bf16.mxu1 %v6939_v29  ;;  %v6980_v29 = vcombine.low %v2069_v49, %v2073_v15  ;;  %v6984_v33 = vcombine.low %v2070_v3, %v2074_v11  ;;  %v2089_v49 = vld [vmem:[%s8394_s3 + $0x3b0] sm:$0xff]  ;;  %v244_v15 = vsub.s32 0, %v6971_v44  ;;  %v2086_v3 = vld [vmem:[%s8394_s3 + $0x398] sm:$0xff]  ;;  %8790 = vst [vmem:[#allocation124_spill] sm:$0xff] %v7013_v42  ;;  %8791 = vst [vmem:[#allocation125_spill] sm:$0xff] %v7017_v60 }
 0x130   :  { %8789 = vst [vmem:[#allocation123_spill] sm:$0xff] %v6989_v34  ;;  %v2090_v11 = vld [vmem:[%s8394_s3 + $0x3b8] sm:$0xff]  ;;  %v7057_v26 = vcombine.low %v2085_v50, %v2089_v49 }
 0x131   :  { %8786 = vst [vmem:[#allocation120_spill] sm:$0xff] %v6980_v29  ;;  %8787 = vst [vmem:[#allocation121_spill] sm:$0xff] %v6984_v33  ;;  %v7024_v27 = vcombine.high %v2086_v3, %v2090_v11 }
 0x132   :  { %2844 = vmatpush1.bf16.msra.mxu0 %v6954_v48  ;;  %2885 = vmatpush1.bf16.msra.mxu1 %v6958_v58  ;;  %v248_v58 = vsub.s32 1, %v6971_v44  ;;  %v256_v48 = vsub.s32 3, %v6971_v44  ;;  %8798 = vst [vmem:[#allocation132_spill] sm:$0xff] %v7057_v26 }
 0x133   :  { %2845 = vmatprep.subr.bf16.mxu0 %v6960_v2  ;;  %2886 = vmatprep.subr.bf16.mxu1 %v6963_v19  ;;  %v7008_v19 = vld [vmem:[%s8395_s2] sm:$0xff]  ;;  %v252_v2 = vsub.s32 2, %v6971_v44  ;;  %8794 = vst [vmem:[#allocation128_spill] sm:$0xff] %v7024_v27  ;;  %v2093_v44 = vld [vmem:[%s8394_s3 + $0x3d0] sm:$0xff] }
 0x134   :  { %v7033_v20 = vrot.slane %v7008_v19, %v244_v15  ;;  %v7052_v15 = vrot.slane %v7008_v19, %v256_v48  ;;  %v7066_v48 = vcombine.high %v2093_v44, %v2097_v43 }
 0x136   :  { %2846 = vmatpush1.bf16.msra.mxu0 %v6980_v29  ;;  %2887 = vmatpush1.bf16.msra.mxu1 %v6984_v33  ;;  %v7019_v29 = vcombine.high %v2085_v50, %v2089_v49  ;;  %v7046_v33 = vrot.slane %v7008_v19, %v252_v2  ;;  %8801 = vst [vmem:[#allocation135_spill] sm:$0xff] %v7066_v48 }
 0x137   :  { %2847 = vmatprep.subr.bf16.mxu0 %v6986_v18  ;;  %2888 = vmatprep.subr.bf16.mxu1 %v6989_v34  ;;  %v2094_v34 = vld [vmem:[%s8394_s3 + $0x3d8] sm:$0xff] }
 0x138   :  { %8792 = vst [vmem:[#allocation126_spill] sm:$0xff] %v7019_v29  ;;  %v7021_v37 = vpop.f32.mrb[0].mxu0  ;;  %v7035_v47 = vpop.f32.mrb[0].mxu1  ;;  %v2098_v18 = vld [vmem:[%s8394_s3 + $0x3f8] sm:$0xff] }
 0x139   :  { %8793 = vst [vmem:[#allocation127_spill] sm:$0xff] %v7021_v37  ;;  %8795 = vst [vmem:[#allocation129_spill] sm:$0xff] %v7035_v47  ;;  %v7037_v0 = vpop.f32.mrb[1].mxu0  ;;  %v7049_v37 = vrot.slane %v7008_v19, %v248_v58  ;;  %v7054_v47 = vpop.f32.mrb[1].mxu1  ;;  %v7064_v58 = vcombine.low %v2086_v3, %v2090_v11  ;;  %v7075_v49 = vcombine.high %v2094_v34, %v2098_v18 }
 0x13a   :  { %8796 = vst [vmem:[#allocation130_spill] sm:$0xff] %v7037_v0  ;;  %8797 = vst [vmem:[#allocation131_spill] sm:$0xff] %v7054_v47  ;;  %v1417_v0 = vpop.f32.mrb[2].mxu0  ;;  %2848 = vmatpush1.bf16.msra.mxu0 %v7013_v42  ;;  %v1563_v22 = vpop.f32.mrb[2].mxu1  ;;  %2889 = vmatpush1.bf16.msra.mxu1 %v7017_v60  ;;  %v7081_v3 = vcombine.low %v2093_v44, %v2097_v43 }
 0x13b   :  { %v7060_v40 = vadd.f32 %v1417_v0, %v7033_v20  ;;  %v1419_v2 = vpop.f32.mrb[3].mxu0  ;;  %2849 = vmatprep.subr.bf16.mxu0 %v7019_v29  ;;  %8800 = vst [vmem:[#allocation134_spill] sm:$0xff] %v7064_v58  ;;  %v7069_v47 = vadd.f32 %v1563_v22, %v7046_v33  ;;  %v1565_v50 = vpop.f32.mrb[3].mxu1  ;;  %2890 = vmatprep.subr.bf16.mxu1 %v7024_v27  ;;  %8804 = vst [vmem:[#allocation138_spill] sm:$0xff] %v7075_v49 }
 0x13c   :  { %v7072_v42 = vadd.f32 %v1419_v2, %v7049_v37  ;;  %v7078_v0 = vadd.f32 %v1565_v50, %v7052_v15  ;;  %8806 = vst [vmem:[#allocation140_spill] sm:$0xff] %v7081_v3  ;;  %v7085_v22 = vcombine.low %v2094_v34, %v2098_v18 }
 0x13d   :  { %8799 = vst [vmem:[#allocation133_spill] sm:$0xff] %v7060_v40  ;;  %8802 = vst [vmem:[#allocation136_spill] sm:$0xff] %v7069_v47  ;;  %v8843_v40 = vld [vmem:[#allocation54_spill] sm:$0xff] }
 0x13e   :  { %8803 = vst [vmem:[#allocation137_spill] sm:$0xff] %v7072_v42  ;;  %8805 = vst [vmem:[#allocation139_spill] sm:$0xff] %v7078_v0  ;;  %2850 = vmatpush1.bf16.msra.mxu0 %v7057_v26  ;;  %2891 = vmatpush1.bf16.msra.mxu1 %v7064_v58 }
 0x13f   :  { %2851 = vmatprep.subr.bf16.mxu0 %v7066_v48  ;;  %8807 = vst [vmem:[#allocation141_spill] sm:$0xff] %v7085_v22  ;;  %2892 = vmatprep.subr.bf16.mxu1 %v7075_v49 }
 0x140   :  { %v1423_v11 = vpop.f32.mrb[4].mxu0  ;;  %v1569_v42 = vpop.f32.mrb[4].mxu1 }
 0x141   :  { %v7089_v2 = vadd.f32 %v1423_v11, %v7033_v20  ;;  %v1425_v47 = vpop.f32.mrb[5].mxu0  ;;  %v7092_v50 = vadd.f32 %v1569_v42, %v7046_v33  ;;  %v1571_v43 = vpop.f32.mrb[5].mxu1 }
 0x142   :  { %v7095_v44 = vadd.f32 %v1425_v47, %v7049_v37  ;;  %v1427_v0 = vpop.f32.mrb[6].mxu0  ;;  %2852 = vmatpush1.bf16.msra.mxu0 %v7081_v3  ;;  %v7099_v34 = vadd.f32 %v1571_v43, %v7052_v15  ;;  %v1573_v11 = vpop.f32.mrb[6].mxu1  ;;  %2893 = vmatpush1.bf16.msra.mxu1 %v7085_v22 }
 0x143   :  { %8808 = vst [vmem:[#allocation142_spill] sm:$0xff] %v7089_v2  ;;  %8809 = vst [vmem:[#allocation143_spill] sm:$0xff] %v7092_v50  ;;  %v7102_v18 = vadd.f32 %v1427_v0, %v7033_v20  ;;  %v1429_v2 = vpop.f32.mrb[7].mxu0  ;;  %2966 = vmatprep.subr.bf16.mxu0 %v6269_v52  ;;  %v7107_v42 = vadd.f32 %v1573_v11, %v7046_v33  ;;  %3007 = vmatprep.subr.bf16.mxu1 %v6272_v54  ;;  %v8842_v50 = vld [vmem:[#allocation53_spill] sm:$0xff] }
 0x144   :  { %8810 = vst [vmem:[#allocation144_spill] sm:$0xff] %v7095_v44  ;;  %8811 = vst [vmem:[#allocation145_spill] sm:$0xff] %v7099_v34  ;;  %v7110_v47 = vadd.f32 %v1429_v2, %v7049_v37  ;;  %v1575_v44 = vpop.f32.mrb[7].mxu1 }
 0x145   :  { %8812 = vst [vmem:[#allocation146_spill] sm:$0xff] %v7102_v18  ;;  %8813 = vst [vmem:[#allocation147_spill] sm:$0xff] %v7107_v42  ;;  %v7114_v43 = vadd.f32 %v1575_v44, %v7052_v15  ;;  %2854 = vmatmul.mubr.bf16.vlgmr.msra.gmra.mrb[36].mxu0 %v8740_v36  ;;  %2895 = vmatmul.mubr.bf16.vlgmr.msra.gmra.mrb[36].mxu1 %v8740_v36 }
 0x146   :  { %8814 = vst [vmem:[#allocation148_spill] sm:$0xff] %v7110_v47  ;;  %2967 = vmatpush1.bf16.msra.mxu0 %v6287_v59  ;;  %3008 = vmatpush1.bf16.msra.mxu1 %v6290_v61 }
 0x147   :  { %8815 = vst [vmem:[#allocation149_spill] sm:$0xff] %v7114_v43  ;;  %2968 = vmatprep.subr.bf16.mxu0 %v6292_v62  ;;  %3009 = vmatprep.subr.bf16.mxu1 %v6295_v63 }
 0x148   :  { %v1433_v0 = vpop.f32.mrb[8].mxu0  ;;  %v1579_v11 = vpop.f32.mrb[8].mxu1 }
 0x149   :  { %v7123_v2 = vadd.f32 %v1433_v0, %v7033_v20  ;;  %v1435_v47 = vpop.f32.mrb[9].mxu0  ;;  %v7126_v44 = vadd.f32 %v1579_v11, %v7046_v33  ;;  %v1581_v36 = vpop.f32.mrb[9].mxu1 }
 0x14a   :  { %v7129_v43 = vadd.f32 %v1435_v47, %v7049_v37  ;;  %v1437_v42 = vpop.f32.mrb[10].mxu0  ;;  %2969 = vmatpush1.bf16.msra.mxu0 %v6312_v5  ;;  %v7133_v18 = vadd.f32 %v1581_v36, %v7052_v15  ;;  %v1583_v0 = vpop.f32.mrb[10].mxu1  ;;  %3010 = vmatpush1.bf16.msra.mxu1 %v6316_v10 }
 0x14b   :  { %8816 = vst [vmem:[#allocation150_spill] sm:$0xff] %v7123_v2  ;;  %8817 = vst [vmem:[#allocation151_spill] sm:$0xff] %v7126_v44  ;;  %v7136_v34 = vadd.f32 %v1437_v42, %v7033_v20  ;;  %v1439_v2 = vpop.f32.mrb[11].mxu0  ;;  %2970 = vmatprep.subr.bf16.mxu0 %v6318_v6  ;;  %v7141_v11 = vadd.f32 %v1583_v0, %v7046_v33  ;;  %3011 = vmatprep.subr.bf16.mxu1 %v6322_v7 }
 0x14c   :  { %8818 = vst [vmem:[#allocation152_spill] sm:$0xff] %v7129_v43  ;;  %8819 = vst [vmem:[#allocation153_spill] sm:$0xff] %v7133_v18  ;;  %v7144_v47 = vadd.f32 %v1439_v2, %v7049_v37  ;;  %v1585_v43 = vpop.f32.mrb[11].mxu1 }
 0x14d   :  { %8820 = vst [vmem:[#allocation154_spill] sm:$0xff] %v7136_v34  ;;  %8821 = vst [vmem:[#allocation155_spill] sm:$0xff] %v7141_v11  ;;  %v7148_v36 = vadd.f32 %v1585_v43, %v7052_v15 }
 0x14e   :  { %8822 = vst [vmem:[#allocation156_spill] sm:$0xff] %v7144_v47  ;;  %2971 = vmatpush1.bf16.msra.mxu0 %v6338_v17  ;;  %3012 = vmatpush1.bf16.msra.mxu1 %v6342_v12 }
 0x14f   :  { %8823 = vst [vmem:[#allocation157_spill] sm:$0xff] %v7148_v36  ;;  %2972 = vmatprep.subr.bf16.mxu0 %v6344_v13  ;;  %3013 = vmatprep.subr.bf16.mxu1 %v6347_v14 }
 0x150   :  { %v1443_v42 = vpop.f32.mrb[12].mxu0  ;;  %v1589_v2 = vpop.f32.mrb[12].mxu1 }
 0x151   :  { %v7155_v0 = vadd.f32 %v1443_v42, %v7033_v20  ;;  %v1445_v47 = vpop.f32.mrb[13].mxu0  ;;  %v7158_v11 = vadd.f32 %v1589_v2, %v7046_v33  ;;  %v1591_v36 = vpop.f32.mrb[13].mxu1 }
 0x152   :  { %v7161_v43 = vadd.f32 %v1445_v47, %v7049_v37  ;;  %v1447_v34 = vpop.f32.mrb[14].mxu0  ;;  %2973 = vmatpush1.bf16.msra.mxu0 %v6364_v23  ;;  %v7165_v18 = vadd.f32 %v1591_v36, %v7052_v15  ;;  %v1593_v42 = vpop.f32.mrb[14].mxu1  ;;  %3014 = vmatpush1.bf16.msra.mxu1 %v6368_v24 }
 0x153   :  { %8824 = vst [vmem:[#allocation158_spill] sm:$0xff] %v7155_v0  ;;  %8825 = vst [vmem:[#allocation159_spill] sm:$0xff] %v7158_v11  ;;  %v7168_v44 = vadd.f32 %v1447_v34, %v7033_v20  ;;  %v1449_v0 = vpop.f32.mrb[15].mxu0  ;;  %2974 = vmatprep.subr.bf16.mxu0 %v6370_v28  ;;  %v7173_v2 = vadd.f32 %v1593_v42, %v7046_v33  ;;  %3015 = vmatprep.subr.bf16.mxu1 %v6374_v25  ;;  %v8832_v34 = vld [vmem:[#allocation43_spill] sm:$0xff]  ;;  %v8835_v42 = vld [vmem:[#allocation46_spill] sm:$0xff] }
 0x154   :  { %8826 = vst [vmem:[#allocation160_spill] sm:$0xff] %v7161_v43  ;;  %8827 = vst [vmem:[#allocation161_spill] sm:$0xff] %v7165_v18  ;;  %v7176_v47 = vadd.f32 %v1449_v0, %v7049_v37  ;;  %v1595_v43 = vpop.f32.mrb[15].mxu1  ;;  %v8833_v0 = vld [vmem:[#allocation44_spill] sm:$0xff]  ;;  %v8840_v18 = vld [vmem:[#allocation51_spill] sm:$0xff] }
 0x155   :  { %8828 = vst [vmem:[#allocation162_spill] sm:$0xff] %v7168_v44  ;;  %8829 = vst [vmem:[#allocation163_spill] sm:$0xff] %v7173_v2  ;;  %v7180_v36 = vadd.f32 %v1595_v43, %v7052_v15  ;;  %v8834_v43 = vld [vmem:[#allocation45_spill] sm:$0xff]  ;;  %v8839_v44 = vld [vmem:[#allocation50_spill] sm:$0xff] }
 0x156   :  { %8830 = vst [vmem:[#allocation164_spill] sm:$0xff] %v7176_v47  ;;  %2975 = vmatpush1.bf16.msra.mxu0 %v6390_v30  ;;  %3016 = vmatpush1.bf16.msra.mxu1 %v6394_v35  ;;  %v8837_v47 = vld [vmem:[#allocation48_spill] sm:$0xff]  ;;  %v8838_v2 = vld [vmem:[#allocation49_spill] sm:$0xff] }
 0x157   :  { %8831 = vst [vmem:[#allocation165_spill] sm:$0xff] %v7180_v36  ;;  %2976 = vmatprep.subr.bf16.mxu0 %v6396_v31  ;;  %3017 = vmatprep.subr.bf16.mxu1 %v6399_v32  ;;  %v8836_v36 = vld [vmem:[#allocation47_spill] sm:$0xff]  ;;  %v8841_v11 = vld [vmem:[#allocation52_spill] sm:$0xff] }
 0x15a   :  { %2977 = vmatpush1.bf16.msra.mxu0 %v6416_v38  ;;  %3018 = vmatpush1.bf16.msra.mxu1 %v6420_v39 }
 0x15b   :  { %2978 = vmatprep.subr.bf16.mxu0 %v6422_v41  ;;  %3019 = vmatprep.subr.bf16.mxu1 %v6426_v46 }
 0x15e   :  { %2979 = vmatpush1.bf16.msra.mxu0 %v6442_v45  ;;  %3020 = vmatpush1.bf16.msra.mxu1 %v6446_v56 }
 0x15f   :  { %2980 = vmatprep.subr.bf16.mxu0 %v6448_v53  ;;  %3021 = vmatprep.subr.bf16.mxu1 %v6451_v16 }
 0x162   :  { %2981 = vmatpush1.bf16.msra.mxu0 %v6468_v51  ;;  %3022 = vmatpush1.bf16.msra.mxu1 %v6472_v55 }
 0x163   :  { %2982 = vmatprep.subr.bf16.mxu0 %v6474_v1  ;;  %3023 = vmatprep.subr.bf16.mxu1 %v6477_v57 }
 0x166   :  { %2983 = vmatpush1.bf16.msra.mxu0 %v6494_v4  ;;  %3024 = vmatpush1.bf16.msra.mxu1 %v6498_v21 }
 0x167   :  { %2984 = vmatprep.subr.bf16.mxu0 %v6500_v8  ;;  %3025 = vmatprep.subr.bf16.mxu1 %v6503_v9 }
 0x16a   :  { %2985 = vmatpush1.bf16.msra.mxu0 %v8832_v34  ;;  %3026 = vmatpush1.bf16.msra.mxu1 %v8833_v0  ;;  %v8844_v0 = vld [vmem:[#allocation55_spill] sm:$0xff] }
 0x16b   :  { %2986 = vmatprep.subr.bf16.mxu0 %v8834_v43  ;;  %3027 = vmatprep.subr.bf16.mxu1 %v8835_v42  ;;  %v8845_v43 = vld [vmem:[#allocation56_spill] sm:$0xff]  ;;  %v8846_v42 = vld [vmem:[#allocation57_spill] sm:$0xff] }
 0x16e   :  { %2987 = vmatpush1.bf16.msra.mxu0 %v8836_v36  ;;  %3028 = vmatpush1.bf16.msra.mxu1 %v8837_v47  ;;  %v8847_v36 = vld [vmem:[#allocation58_spill] sm:$0xff]  ;;  %v8848_v47 = vld [vmem:[#allocation59_spill] sm:$0xff] }
 0x16f   :  { %2988 = vmatprep.subr.bf16.mxu0 %v8838_v2  ;;  %3029 = vmatprep.subr.bf16.mxu1 %v8839_v44  ;;  %v8849_v2 = vld [vmem:[#allocation60_spill] sm:$0xff]  ;;  %v8850_v44 = vld [vmem:[#allocation61_spill] sm:$0xff] }
 0x172   :  { %2989 = vmatpush1.bf16.msra.mxu0 %v8840_v18  ;;  %3030 = vmatpush1.bf16.msra.mxu1 %v8841_v11  ;;  %v8851_v18 = vld [vmem:[#allocation62_spill] sm:$0xff]  ;;  %v8852_v11 = vld [vmem:[#allocation63_spill] sm:$0xff] }
 0x173   :  { %2990 = vmatprep.subr.bf16.mxu0 %v8842_v50  ;;  %3031 = vmatprep.subr.bf16.mxu1 %v8843_v40  ;;  %v8853_v50 = vld [vmem:[#allocation64_spill] sm:$0xff]  ;;  %v8854_v40 = vld [vmem:[#allocation65_spill] sm:$0xff] }
 0x176   :  { %2991 = vmatpush1.bf16.msra.mxu0 %v8844_v0  ;;  %3032 = vmatpush1.bf16.msra.mxu1 %v8845_v43  ;;  %v8855_v0 = vld [vmem:[#allocation66_spill] sm:$0xff]  ;;  %v8856_v43 = vld [vmem:[#allocation67_spill] sm:$0xff] }
 0x177   :  { %2992 = vmatprep.subr.bf16.mxu0 %v8846_v42  ;;  %3033 = vmatprep.subr.bf16.mxu1 %v8847_v36  ;;  %v8857_v42 = vld [vmem:[#allocation68_spill] sm:$0xff]  ;;  %v8858_v36 = vld [vmem:[#allocation69_spill] sm:$0xff] }
 0x17a   :  { %2993 = vmatpush1.bf16.msra.mxu0 %v8848_v47  ;;  %3034 = vmatpush1.bf16.msra.mxu1 %v8849_v2  ;;  %v8859_v47 = vld [vmem:[#allocation70_spill] sm:$0xff]  ;;  %v8860_v2 = vld [vmem:[#allocation119_spill] sm:$0xff] }
 0x17b   :  { %2994 = vmatprep.subr.bf16.mxu0 %v8850_v44  ;;  %3035 = vmatprep.subr.bf16.mxu1 %v8851_v18  ;;  %v260_v44 = vsub.s32 4, %v8860_v2  ;;  %v268_v18 = vsub.s32 6, %v8860_v2 }
 0x17e   :  { %2995 = vmatpush1.bf16.msra.mxu0 %v8852_v11  ;;  %3036 = vmatpush1.bf16.msra.mxu1 %v8853_v50  ;;  %v264_v11 = vsub.s32 5, %v8860_v2  ;;  %v272_v50 = vsub.s32 7, %v8860_v2 }
 0x17f   :  { %2996 = vmatprep.subr.bf16.mxu0 %v8854_v40  ;;  %3037 = vmatprep.subr.bf16.mxu1 %v8855_v0  ;;  %v7237_v0 = vrot.slane %v7008_v19, %v260_v44 }
 0x180   :  { %v7252_v2 = vrot.slane %v7008_v19, %v272_v50 }
 0x182   :  { %2997 = vmatpush1.bf16.msra.mxu0 %v8856_v43  ;;  %3038 = vmatpush1.bf16.msra.mxu1 %v8857_v42 }
 0x183   :  { %3048 = vmatprep.subr.bf16.mxu0 %v8858_v36  ;;  %3089 = vmatprep.subr.bf16.mxu1 %v8859_v47  ;;  %v7244_v36 = vrot.slane %v7008_v19, %v268_v18  ;;  %v7247_v47 = vrot.slane %v7008_v19, %v264_v11 }
 0x198   :  { %v7234_v34 = vpop.f32.mrb[16].mxu0  ;;  %v7239_v43 = vpop.f32.mrb[16].mxu1 }
 0x199   :  { %v7241_v42 = vpop.f32.mrb[17].mxu0  ;;  %v7249_v40 = vpop.f32.mrb[17].mxu1 }
 0x19a   :  { %v1709_v9 = vpop.f32.mrb[18].mxu0  ;;  %v1855_v44 = vpop.f32.mrb[18].mxu1 }
 0x19b   :  { %v7255_v8 = vadd.f32 %v1709_v9, %v7237_v0  ;;  %v1711_v21 = vpop.f32.mrb[19].mxu0  ;;  %v7258_v4 = vadd.f32 %v1855_v44, %v7244_v36  ;;  %v1857_v57 = vpop.f32.mrb[19].mxu1 }
 0x19c   :  { %v7261_v18 = vadd.f32 %v1711_v21, %v7247_v47  ;;  %v7264_v11 = vadd.f32 %v1857_v57, %v7252_v2 }
 0x19d   :  { %8861 = vst [vmem:[#allocation119_spill] sm:$0xff] %v7255_v8  ;;  %8862 = vst [vmem:[#allocation166_spill] sm:$0xff] %v7258_v4 }
 0x19e   :  { %8863 = vst [vmem:[#allocation167_spill] sm:$0xff] %v7261_v18  ;;  %8864 = vst [vmem:[#allocation168_spill] sm:$0xff] %v7264_v11 }
 0x1a0   :  { %v1715_v1 = vpop.f32.mrb[20].mxu0  ;;  %v1861_v19 = vpop.f32.mrb[20].mxu1 }
 0x1a1   :  { %v7267_v55 = vadd.f32 %v1715_v1, %v7237_v0  ;;  %v1717_v50 = vpop.f32.mrb[21].mxu0  ;;  %v7270_v9 = vadd.f32 %v1861_v19, %v7244_v36  ;;  %v1863_v44 = vpop.f32.mrb[21].mxu1 }
 0x1a2   :  { %v7273_v8 = vadd.f32 %v1717_v50, %v7247_v47  ;;  %v1719_v4 = vpop.f32.mrb[22].mxu0  ;;  %v7276_v21 = vadd.f32 %v1863_v44, %v7252_v2  ;;  %v1865_v11 = vpop.f32.mrb[22].mxu1 }
 0x1a3   :  { %8865 = vst [vmem:[#allocation169_spill] sm:$0xff] %v7267_v55  ;;  %8866 = vst [vmem:[#allocation170_spill] sm:$0xff] %v7270_v9  ;;  %v7279_v57 = vadd.f32 %v1719_v4, %v7237_v0  ;;  %v1721_v18 = vpop.f32.mrb[23].mxu0  ;;  %v7282_v1 = vadd.f32 %v1865_v11, %v7244_v36  ;;  %v1867_v19 = vpop.f32.mrb[23].mxu1 }
 0x1a4   :  { %8867 = vst [vmem:[#allocation171_spill] sm:$0xff] %v7273_v8  ;;  %8868 = vst [vmem:[#allocation172_spill] sm:$0xff] %v7276_v21  ;;  %v7285_v55 = vadd.f32 %v1721_v18, %v7247_v47  ;;  %v7288_v50 = vadd.f32 %v1867_v19, %v7252_v2 }
 0x1a5   :  { %8869 = vst [vmem:[#allocation173_spill] sm:$0xff] %v7279_v57  ;;  %8870 = vst [vmem:[#allocation174_spill] sm:$0xff] %v7282_v1 }
 0x1a6   :  { %8871 = vst [vmem:[#allocation175_spill] sm:$0xff] %v7285_v55  ;;  %8872 = vst [vmem:[#allocation176_spill] sm:$0xff] %v7288_v50 }
 0x1a8   :  { %v1725_v8 = vpop.f32.mrb[24].mxu0  ;;  %v1871_v44 = vpop.f32.mrb[24].mxu1 }
 0x1a9   :  { %v7291_v9 = vadd.f32 %v1725_v8, %v7237_v0  ;;  %v1727_v21 = vpop.f32.mrb[25].mxu0  ;;  %v7294_v4 = vadd.f32 %v1871_v44, %v7244_v36  ;;  %v1873_v11 = vpop.f32.mrb[25].mxu1 }
 0x1aa   :  { %v7297_v57 = vadd.f32 %v1727_v21, %v7247_v47  ;;  %v1729_v1 = vpop.f32.mrb[26].mxu0  ;;  %v7300_v18 = vadd.f32 %v1873_v11, %v7252_v2  ;;  %v1875_v50 = vpop.f32.mrb[26].mxu1 }
 0x1ab   :  { %8873 = vst [vmem:[#allocation177_spill] sm:$0xff] %v7291_v9  ;;  %8874 = vst [vmem:[#allocation178_spill] sm:$0xff] %v7294_v4  ;;  %v7303_v19 = vadd.f32 %v1729_v1, %v7237_v0  ;;  %v1731_v55 = vpop.f32.mrb[27].mxu0  ;;  %v7306_v8 = vadd.f32 %v1875_v50, %v7244_v36  ;;  %v1877_v44 = vpop.f32.mrb[27].mxu1 }
 0x1ac   :  { %8875 = vst [vmem:[#allocation179_spill] sm:$0xff] %v7297_v57  ;;  %8876 = vst [vmem:[#allocation180_spill] sm:$0xff] %v7300_v18  ;;  %v7309_v9 = vadd.f32 %v1731_v55, %v7247_v47  ;;  %v7312_v21 = vadd.f32 %v1877_v44, %v7252_v2 }
 0x1ad   :  { %8877 = vst [vmem:[#allocation181_spill] sm:$0xff] %v7303_v19  ;;  %8878 = vst [vmem:[#allocation182_spill] sm:$0xff] %v7306_v8 }
 0x1ae   :  { %8879 = vst [vmem:[#allocation183_spill] sm:$0xff] %v7309_v9  ;;  %8880 = vst [vmem:[#allocation184_spill] sm:$0xff] %v7312_v21 }
 0x1b0   :  { %v1735_v57 = vpop.f32.mrb[28].mxu0  ;;  %v1881_v11 = vpop.f32.mrb[28].mxu1 }
 0x1b1   :  { %v7315_v4 = vadd.f32 %v1735_v57, %v7237_v0  ;;  %v1737_v18 = vpop.f32.mrb[29].mxu0  ;;  %v7318_v1 = vadd.f32 %v1881_v11, %v7244_v36  ;;  %v1883_v50 = vpop.f32.mrb[29].mxu1 }
 0x1b2   :  { %v7321_v19 = vadd.f32 %v1737_v18, %v7247_v47  ;;  %v1739_v8 = vpop.f32.mrb[30].mxu0  ;;  %v7324_v55 = vadd.f32 %v1883_v50, %v7252_v2  ;;  %v1885_v21 = vpop.f32.mrb[30].mxu1  ;;  %v8890_v50 = vld [vmem:[#allocation129_spill] sm:$0xff] }
 0x1b3   :  { %8881 = vst [vmem:[#allocation185_spill] sm:$0xff] %v7315_v4  ;;  %8882 = vst [vmem:[#allocation186_spill] sm:$0xff] %v7318_v1  ;;  %v7327_v44 = vadd.f32 %v1739_v8, %v7237_v0  ;;  %v1741_v9 = vpop.f32.mrb[31].mxu0  ;;  %v7330_v57 = vadd.f32 %v1885_v21, %v7244_v36  ;;  %v1887_v11 = vpop.f32.mrb[31].mxu1  ;;  %v8891_v8 = vld [vmem:[#allocation130_spill] sm:$0xff]  ;;  %v8892_v21 = vld [vmem:[#allocation131_spill] sm:$0xff] }
 0x1b4   :  { %8883 = vst [vmem:[#allocation187_spill] sm:$0xff] %v7321_v19  ;;  %8884 = vst [vmem:[#allocation188_spill] sm:$0xff] %v7324_v55  ;;  %v7333_v4 = vadd.f32 %v1741_v9, %v7247_v47  ;;  %v7336_v18 = vadd.f32 %v1887_v11, %v7252_v2  ;;  %v8889_v19 = vld [vmem:[#allocation127_spill] sm:$0xff]  ;;  %v5130_v55 = vadd.f32 %v8890_v50, %v7046_v33 }
 0x1b5   :  { %8885 = vst [vmem:[#allocation189_spill] sm:$0xff] %v7327_v44  ;;  %8886 = vst [vmem:[#allocation190_spill] sm:$0xff] %v7330_v57  ;;  %v5114_v1 = vadd.f32 %v8889_v19, %v7033_v20  ;;  %v5115_v44 = vadd.f32 %v8891_v8, %v7049_v37  ;;  %v5131_v57 = vadd.f32 %v8892_v21, %v7052_v15 }
 0x1b6   :  { %8887 = vst [vmem:[#allocation191_spill] sm:$0xff] %v7333_v4  ;;  %8888 = vst [vmem:[#allocation192_spill] sm:$0xff] %v7336_v18 }
 0x1d8   :  { %v2773_v51 = vpop.f32.mrb[32].mxu0  ;;  %v2814_v9 = vpop.f32.mrb[32].mxu1 }
 0x1d9   :  { %v2903_v16 = vadd.f32 %v5114_v1, %v2773_v51  ;;  %v2775_v4 = vpop.f32.mrb[33].mxu0  ;;  %v2905_v53 = vadd.f32 %v5130_v55, %v2814_v9  ;;  %v2816_v11 = vpop.f32.mrb[33].mxu1 }
 0x1da   :  { %v2904_v56 = vadd.f32 %v5115_v44, %v2775_v4  ;;  %v2777_v18 = vpop.f32.mrb[34].mxu0  ;;  %v2906_v45 = vadd.f32 %v5131_v57, %v2816_v11  ;;  %v2818_v46 = vpop.f32.mrb[34].mxu1 }
 0x1db   :  { %v2778_v20 = vpop.f32.mrb[35].mxu0  ;;  %v2819_v19 = vpop.f32.mrb[35].mxu1  ;;  %v2911_v41 = vsub.f32 0.0, %v2903_v16  ;;  %v2921_v33 = vsub.f32 0.0, %v2905_v53 }
 0x1dc   :  { %v2912_v50 = vsub.f32 0.0, %v2904_v56  ;;  %v2922_v39 = vsub.f32 0.0, %v2906_v45  ;;  %v5146_v56 = vadd.f32 %v7234_v34, %v7237_v0 }
 0x1dd   :  { %v2913_v37 = vmul.f32 1.442695, %v2911_v41  ;;  %v2923_v8 = vmul.f32 1.442695, %v2921_v33  ;;  %v5162_v41 = vadd.f32 %v7239_v43, %v7244_v36 }
 0x1de   :  { %v2915_v38 = vmul.f32 1.442695, %v2912_v50  ;;  %v2925_v32 = vmul.f32 1.442695, %v2922_v39  ;;  %v5147_v39 = vadd.f32 %v7241_v42, %v7247_v47 }
 0x1df   :  { %5276 = vpow2.f32 %v2913_v37 }
 0x1e0   :  { %5278 = vpow2.f32 %v2923_v8 }
 0x1e1   :  { %5280 = vpow2.f32 %v2915_v38  ;;  %v5163_v38 = vadd.f32 %v7249_v40, %v7252_v2 }
 0x1e2   :  { %5282 = vpow2.f32 %v2925_v32 }
 0x1e9   :  { %v5277_v51 = vpop.eup %5276 }
 0x1ea   :  { %v5279_v15 = vpop.eup %5278  ;;  %v2917_v55 = vadd.f32 1.0, %v5277_v51 }
 0x1eb   :  { %v5281_v4 = vpop.eup %5280  ;;  %v2927_v46 = vadd.f32 1.0, %v5279_v15 }
 0x1ec   :  { %v5283_v1 = vpop.eup %5282  ;;  %v2918_v44 = vadd.f32 1.0, %v5281_v4  ;;  %5284 = vrcp.f32 %v2917_v55 }
 0x1ed   :  { %v2928_v57 = vadd.f32 1.0, %v5283_v1  ;;  %5286 = vrcp.f32 %v2927_v46 }
 0x1ee   :  { %5288 = vrcp.f32 %v2918_v44 }
 0x1ef   :  { %5290 = vrcp.f32 %v2928_v57 }
 0x1f6   :  { %v5285_v40 = vpop.eup %5284 }
 0x1f7   :  { %v5287_v2 = vpop.eup %5286 }
 0x1f8   :  { %v5289_v33 = vpop.eup %5288  ;;  %v2943_v51 = vmul.f32 0.0, %v5287_v2  ;;  %v8904_v2 = vld [vmem:[#allocation82_spill] sm:$0xff] }
 0x1f9   :  { %v5291_v50 = vpop.eup %5290 }
 0x1fa   :  { %v2944_v4 = vmul.f32 0.0, %v5291_v50  ;;  %v8906_v50 = vld [vmem:[#allocation84_spill] sm:$0xff] }
 0x218   :  { %v2855_v32 = vpop.f32.mrb[36].mxu0  ;;  %v2896_v53 = vpop.f32.mrb[36].mxu1 }
 0x219   :  { %v2907_v45 = vadd.f32 %v5146_v56, %v2855_v32  ;;  %v2857_v16 = vpop.f32.mrb[37].mxu0  ;;  %v2909_v18 = vadd.f32 %v5162_v41, %v2896_v53  ;;  %v2898_v34 = vpop.f32.mrb[37].mxu1 }
 0x21a   :  { %v2908_v21 = vadd.f32 %v5147_v39, %v2857_v16  ;;  %v2859_v0 = vpop.f32.mrb[38].mxu0  ;;  %v2910_v9 = vadd.f32 %v5163_v38, %v2898_v34  ;;  %v2900_v36 = vpop.f32.mrb[38].mxu1  ;;  %v8893_v34 = vld [vmem:[#allocation71_spill] sm:$0xff] }
 0x21b   :  { %5292 = vtanh.f32 %v2907_v45  ;;  %v2860_v43 = vpop.f32.mrb[39].mxu0  ;;  %v2933_v11 = vsub.f32 0.0, %v2909_v18  ;;  %v2901_v47 = vpop.f32.mrb[39].mxu1  ;;  %v8894_v0 = vld [vmem:[#allocation72_spill] sm:$0xff]  ;;  %v8896_v36 = vld [vmem:[#allocation74_spill] sm:$0xff] }
 0x21c   :  { %5294 = vtanh.f32 %v2908_v21  ;;  %v2934_v42 = vsub.f32 0.0, %v2910_v9  ;;  %v8895_v9 = vld [vmem:[#allocation73_spill] sm:$0xff]  ;;  %v8897_v43 = vld [vmem:[#allocation75_spill] sm:$0xff] }
 0x21d   :  { %v2935_v20 = vmul.f32 1.442695, %v2933_v11  ;;  %v8898_v11 = vld [vmem:[#allocation76_spill] sm:$0xff]  ;;  %v8899_v47 = vld [vmem:[#allocation77_spill] sm:$0xff] }
 0x21e   :  { %v2937_v19 = vmul.f32 1.442695, %v2934_v42  ;;  %v8900_v42 = vld [vmem:[#allocation78_spill] sm:$0xff] }
 0x21f   :  { %5296 = vpow2.f32 %v2935_v20  ;;  %v8901_v20 = vld [vmem:[#allocation79_spill] sm:$0xff] }
 0x220   :  { %5298 = vpow2.f32 %v2937_v19  ;;  %v8902_v19 = vld [vmem:[#allocation80_spill] sm:$0xff] }
 0x225   :  { %v5293_v37 = vpop.eup %5292 }
 0x226   :  { %v5295_v8 = vpop.eup %5294  ;;  %v2945_v15 = vmul.f32 %v5293_v37, %v5285_v40  ;;  %v8903_v40 = vld [vmem:[#allocation81_spill] sm:$0xff] }
 0x227   :  { %v2946_v1 = vmul.f32 %v5295_v8, %v5289_v33  ;;  %v8905_v33 = vld [vmem:[#allocation83_spill] sm:$0xff]  ;;  %v8907_v37 = vld [vmem:[#allocation85_spill] sm:$0xff]  ;;  %v8908_v8 = vld [vmem:[#allocation86_spill] sm:$0xff] }
 0x228   :  { %v7354_v55 = vadd.f32 %v2945_v15, %v2943_v51  ;;  %v8909_v51 = vld [vmem:[#allocation87_spill] sm:$0xff]  ;;  %v8910_v15 = vld [vmem:[#allocation88_spill] sm:$0xff] }
 0x229   :  { %v7356_v46 = vadd.f32 %v2946_v1, %v2944_v4  ;;  %v5297_v44 = vpop.eup %5296  ;;  %v8911_v4 = vld [vmem:[#allocation89_spill] sm:$0xff]  ;;  %v8912_v1 = vld [vmem:[#allocation90_spill] sm:$0xff] }
 0x22a   :  { %v5299_v57 = vpop.eup %5298  ;;  %5300 = vtanh.f32 %v7354_v55  ;;  %v2939_v56 = vadd.f32 1.0, %v5297_v44  ;;  %v8913_v44 = vld [vmem:[#allocation91_spill] sm:$0xff] }
 0x22b   :  { %5302 = vtanh.f32 %v7356_v46  ;;  %v2940_v41 = vadd.f32 1.0, %v5299_v57  ;;  %v8914_v57 = vld [vmem:[#allocation92_spill] sm:$0xff] }
 0x22c   :  { %5304 = vrcp.f32 %v2939_v56  ;;  %v8915_v56 = vld [vmem:[#allocation93_spill] sm:$0xff] }
 0x22d   :  { %5306 = vrcp.f32 %v2940_v41  ;;  %v8916_v41 = vld [vmem:[#allocation94_spill] sm:$0xff] }
 0x234   :  { %v5301_v39 = vpop.eup %5300 }
 0x235   :  { %v5303_v32 = vpop.eup %5302 }
 0x236   :  { %v5305_v38 = vpop.eup %5304 }
 0x237   :  { %v5307_v45 = vpop.eup %5306  ;;  %v2951_v53 = vmul.f32 %v5305_v38, %v5301_v39  ;;  %v8917_v39 = vld [vmem:[#allocation95_spill] sm:$0xff]  ;;  %v8919_v38 = vld [vmem:[#allocation97_spill] sm:$0xff] }
 0x238   :  { %v2952_v16 = vmul.f32 %v5307_v45, %v5303_v32  ;;  %v8918_v32 = vld [vmem:[#allocation96_spill] sm:$0xff]  ;;  %v8920_v45 = vld [vmem:[#allocation98_spill] sm:$0xff] }
 0x239   :  { %v7360_v21 = vpack.c.bf16 %v2951_v53, %v2951_v53  ;;  %v8921_v53 = vld [vmem:[#allocation99_spill] sm:$0xff] }
 0x23a   :  { %v2965_v18 = vpack.c.bf16 %v2952_v16, %v2952_v16  ;;  %v8922_v16 = vld [vmem:[#allocation100_spill] sm:$0xff] }
 0x23c   :  { %2998 = vmatprep.mubr.bf16.mxu0 %v2965_v18  ;;  %3039 = vmatprep.mubr.bf16.mxu1 %v2965_v18 }
 0x23d   :  { %2999 = vmatmul.mubr.bf16.vlgmr.msra.gmra.mrb[40].mxu0 %v7360_v21  ;;  %3040 = vmatmul.mubr.bf16.vlgmr.msra.gmra.mrb[40].mxu1 %v7360_v21 }
 0x23e   :  { %3049 = vmatpush1.bf16.msra.mxu0 %v8893_v34  ;;  %3090 = vmatpush1.bf16.msra.mxu1 %v8894_v0 }
 0x23f   :  { %3080 = vmatprep.mubr.bf16.mxu0 %v2965_v18  ;;  %3121 = vmatprep.mubr.bf16.mxu1 %v2965_v18  ;;  %v8923_v18 = vld [vmem:[#allocation101_spill] sm:$0xff] }
 0x240   :  { %3050 = vmatprep.subr.bf16.mxu0 %v8895_v9  ;;  %3091 = vmatprep.subr.bf16.mxu1 %v8896_v36 }
 0x242   :  { %3051 = vmatpush1.bf16.msra.mxu0 %v8897_v43  ;;  %3092 = vmatpush1.bf16.msra.mxu1 %v8898_v11 }
 0x243   :  { %3052 = vmatprep.subr.bf16.mxu0 %v8899_v47  ;;  %3093 = vmatprep.subr.bf16.mxu1 %v8900_v42 }
 0x246   :  { %3053 = vmatpush1.bf16.msra.mxu0 %v8901_v20  ;;  %3094 = vmatpush1.bf16.msra.mxu1 %v8902_v19 }
 0x247   :  { %3054 = vmatprep.subr.bf16.mxu0 %v8903_v40  ;;  %3095 = vmatprep.subr.bf16.mxu1 %v8904_v2 }
 0x24a   :  { %3055 = vmatpush1.bf16.msra.mxu0 %v8905_v33  ;;  %3096 = vmatpush1.bf16.msra.mxu1 %v8906_v50 }
 0x24b   :  { %3056 = vmatprep.subr.bf16.mxu0 %v8907_v37  ;;  %3097 = vmatprep.subr.bf16.mxu1 %v8908_v8 }
 0x24e   :  { %3057 = vmatpush1.bf16.msra.mxu0 %v8909_v51  ;;  %3098 = vmatpush1.bf16.msra.mxu1 %v8910_v15 }
 0x24f   :  { %3058 = vmatprep.subr.bf16.mxu0 %v8911_v4  ;;  %3099 = vmatprep.subr.bf16.mxu1 %v8912_v1 }
 0x252   :  { %3059 = vmatpush1.bf16.msra.mxu0 %v8913_v44  ;;  %3100 = vmatpush1.bf16.msra.mxu1 %v8914_v57  ;;  %v8924_v44 = vld [vmem:[#allocation102_spill] sm:$0xff]  ;;  %v8925_v57 = vld [vmem:[#allocation103_spill] sm:$0xff] }
 0x253   :  { %3060 = vmatprep.subr.bf16.mxu0 %v8915_v56  ;;  %3101 = vmatprep.subr.bf16.mxu1 %v8916_v41  ;;  %v8926_v56 = vld [vmem:[#allocation104_spill] sm:$0xff]  ;;  %v8927_v41 = vld [vmem:[#allocation105_spill] sm:$0xff] }
 0x256   :  { %3061 = vmatpush1.bf16.msra.mxu0 %v8917_v39  ;;  %3102 = vmatpush1.bf16.msra.mxu1 %v8918_v32  ;;  %v8928_v39 = vld [vmem:[#allocation106_spill] sm:$0xff]  ;;  %v8929_v32 = vld [vmem:[#allocation107_spill] sm:$0xff] }
 0x257   :  { %3062 = vmatprep.subr.bf16.mxu0 %v8919_v38  ;;  %3103 = vmatprep.subr.bf16.mxu1 %v8920_v45  ;;  %v8930_v38 = vld [vmem:[#allocation108_spill] sm:$0xff]  ;;  %v8931_v45 = vld [vmem:[#allocation109_spill] sm:$0xff] }
 0x25a   :  { %3063 = vmatpush1.bf16.msra.mxu0 %v8921_v53  ;;  %3104 = vmatpush1.bf16.msra.mxu1 %v8922_v16  ;;  %v8932_v53 = vld [vmem:[#allocation110_spill] sm:$0xff]  ;;  %v8933_v16 = vld [vmem:[#allocation111_spill] sm:$0xff] }
 0x25b   :  { %3064 = vmatprep.subr.bf16.mxu0 %v8923_v18  ;;  %3105 = vmatprep.subr.bf16.mxu1 %v8924_v44  ;;  %v8934_v18 = vld [vmem:[#allocation112_spill] sm:$0xff]  ;;  %v8935_v44 = vld [vmem:[#allocation113_spill] sm:$0xff] }
 0x25e   :  { %3065 = vmatpush1.bf16.msra.mxu0 %v8925_v57  ;;  %3106 = vmatpush1.bf16.msra.mxu1 %v8926_v56  ;;  %v8936_v57 = vld [vmem:[#allocation114_spill] sm:$0xff]  ;;  %v8937_v56 = vld [vmem:[#allocation115_spill] sm:$0xff] }
 0x25f   :  { %3066 = vmatprep.subr.bf16.mxu0 %v8927_v41  ;;  %3107 = vmatprep.subr.bf16.mxu1 %v8928_v39  ;;  %v8938_v41 = vld [vmem:[#allocation116_spill] sm:$0xff]  ;;  %v8939_v39 = vld [vmem:[#allocation117_spill] sm:$0xff] }
 0x262   :  { %3067 = vmatpush1.bf16.msra.mxu0 %v8929_v32  ;;  %3108 = vmatpush1.bf16.msra.mxu1 %v8930_v38  ;;  %v8940_v32 = vld [vmem:[#allocation118_spill] sm:$0xff]  ;;  %v8941_v38 = vld [vmem:[#allocation120_spill] sm:$0xff] }
 0x263   :  { %3068 = vmatprep.subr.bf16.mxu0 %v8931_v45  ;;  %3109 = vmatprep.subr.bf16.mxu1 %v8932_v53  ;;  %v8942_v45 = vld [vmem:[#allocation121_spill] sm:$0xff]  ;;  %v8943_v53 = vld [vmem:[#allocation122_spill] sm:$0xff] }
 0x266   :  { %3069 = vmatpush1.bf16.msra.mxu0 %v8933_v16  ;;  %3110 = vmatpush1.bf16.msra.mxu1 %v8934_v18  ;;  %v8944_v16 = vld [vmem:[#allocation123_spill] sm:$0xff]  ;;  %v8945_v18 = vld [vmem:[#allocation124_spill] sm:$0xff] }
 0x267   :  { %3070 = vmatprep.subr.bf16.mxu0 %v8935_v44  ;;  %3111 = vmatprep.subr.bf16.mxu1 %v8936_v57 }
 0x26a   :  { %3071 = vmatpush1.bf16.msra.mxu0 %v8937_v56  ;;  %3112 = vmatpush1.bf16.msra.mxu1 %v8938_v41 }
 0x26b   :  { %3072 = vmatprep.subr.bf16.mxu0 %v8939_v39  ;;  %3113 = vmatprep.subr.bf16.mxu1 %v8940_v32 }
 0x26e   :  { %3073 = vmatpush1.bf16.msra.mxu0 %v8941_v38  ;;  %3114 = vmatpush1.bf16.msra.mxu1 %v8942_v45 }
 0x26f   :  { %3074 = vmatprep.subr.bf16.mxu0 %v8943_v53  ;;  %3115 = vmatprep.subr.bf16.mxu1 %v8944_v16 }
 0x272   :  { %3075 = vmatpush1.bf16.msra.mxu0 %v8945_v18  ;;  %3116 = vmatpush1.bf16.msra.mxu1 %v7017_v60 }
 0x273   :  { %3076 = vmatprep.subr.bf16.mxu0 %v7019_v29  ;;  %3117 = vmatprep.subr.bf16.mxu1 %v7024_v27 }
 0x276   :  { %3077 = vmatpush1.bf16.msra.mxu0 %v7057_v26  ;;  %3118 = vmatpush1.bf16.msra.mxu1 %v7064_v58 }
 0x277   :  { %3078 = vmatprep.subr.bf16.mxu0 %v7066_v48  ;;  %3119 = vmatprep.subr.bf16.mxu1 %v7075_v49 }
 0x27a   :  { %3079 = vmatpush1.bf16.msra.mxu0 %v7081_v3  ;;  %3120 = vmatpush1.bf16.msra.mxu1 %v7085_v22 }
 0x27b   :  { %3193 = vmatprep.subr.bf16.mxu0 %v6269_v52  ;;  %3234 = vmatprep.subr.bf16.mxu1 %v6272_v54 }
 0x27d   :  { %3081 = vmatmul.mubr.bf16.vlgmr.msra.gmra.mrb[44].mxu0 %v7360_v21  ;;  %3122 = vmatmul.mubr.bf16.vlgmr.msra.gmra.mrb[44].mxu1 %v7360_v21  ;;  %v8946_v21 = vld [vmem:[#allocation26_spill] sm:$0xff] }
 0x27e   :  { %3194 = vmatpush1.bf16.msra.mxu0 %v6287_v59  ;;  %3235 = vmatpush1.bf16.msra.mxu1 %v6290_v61 }
 0x27f   :  { %3195 = vmatprep.subr.bf16.mxu0 %v6292_v62  ;;  %3236 = vmatprep.subr.bf16.mxu1 %v6295_v63 }
 0x282   :  { %3196 = vmatpush1.bf16.msra.mxu0 %v6312_v5  ;;  %3237 = vmatpush1.bf16.msra.mxu1 %v6316_v10  ;;  %v8993_v10 = vld [vmem:[#allocation137_spill] sm:$0xff]  ;;  %v8994_v5 = vld [vmem:[#allocation139_spill] sm:$0xff] }
 0x283   :  { %3197 = vmatprep.subr.bf16.mxu0 %v6318_v6  ;;  %3238 = vmatprep.subr.bf16.mxu1 %v6322_v7  ;;  %v8992_v7 = vld [vmem:[#allocation136_spill] sm:$0xff] }
 0x286   :  { %3198 = vmatpush1.bf16.msra.mxu0 %v6338_v17  ;;  %3239 = vmatpush1.bf16.msra.mxu1 %v6342_v12  ;;  %v8947_v12 = vld [vmem:[#allocation27_spill] sm:$0xff]  ;;  %v8991_v17 = vld [vmem:[#allocation133_spill] sm:$0xff] }
 0x287   :  { %3199 = vmatprep.subr.bf16.mxu0 %v6344_v13  ;;  %3240 = vmatprep.subr.bf16.mxu1 %v6347_v14  ;;  %v8948_v13 = vld [vmem:[#allocation28_spill] sm:$0xff]  ;;  %v8949_v14 = vld [vmem:[#allocation29_spill] sm:$0xff] }
 0x28a   :  { %3200 = vmatpush1.bf16.msra.mxu0 %v6364_v23  ;;  %3241 = vmatpush1.bf16.msra.mxu1 %v6368_v24  ;;  %v8950_v23 = vld [vmem:[#allocation30_spill] sm:$0xff]  ;;  %v8951_v24 = vld [vmem:[#allocation31_spill] sm:$0xff] }
 0x28b   :  { %3201 = vmatprep.subr.bf16.mxu0 %v6370_v28  ;;  %3242 = vmatprep.subr.bf16.mxu1 %v6374_v25  ;;  %v8952_v28 = vld [vmem:[#allocation32_spill] sm:$0xff]  ;;  %v8953_v25 = vld [vmem:[#allocation33_spill] sm:$0xff] }
 0x28e   :  { %3202 = vmatpush1.bf16.msra.mxu0 %v6390_v30  ;;  %3243 = vmatpush1.bf16.msra.mxu1 %v6394_v35  ;;  %v8954_v30 = vld [vmem:[#allocation34_spill] sm:$0xff]  ;;  %v8955_v35 = vld [vmem:[#allocation35_spill] sm:$0xff] }
 0x28f   :  { %3203 = vmatprep.subr.bf16.mxu0 %v6396_v31  ;;  %3244 = vmatprep.subr.bf16.mxu1 %v8946_v21  ;;  %v8956_v31 = vld [vmem:[#allocation36_spill] sm:$0xff]  ;;  %v8957_v21 = vld [vmem:[#allocation37_spill] sm:$0xff] }
 0x292   :  { %3204 = vmatpush1.bf16.msra.mxu0 %v8947_v12  ;;  %3245 = vmatpush1.bf16.msra.mxu1 %v8948_v13  ;;  %v8958_v12 = vld [vmem:[#allocation38_spill] sm:$0xff]  ;;  %v8959_v13 = vld [vmem:[#allocation39_spill] sm:$0xff] }
 0x293   :  { %3205 = vmatprep.subr.bf16.mxu0 %v8949_v14  ;;  %3246 = vmatprep.subr.bf16.mxu1 %v8950_v23  ;;  %v8960_v14 = vld [vmem:[#allocation40_spill] sm:$0xff]  ;;  %v8961_v23 = vld [vmem:[#allocation41_spill] sm:$0xff] }
 0x296   :  { %3206 = vmatpush1.bf16.msra.mxu0 %v8951_v24  ;;  %3247 = vmatpush1.bf16.msra.mxu1 %v8952_v28  ;;  %v8962_v24 = vld [vmem:[#allocation42_spill] sm:$0xff]  ;;  %v8963_v28 = vld [vmem:[#allocation43_spill] sm:$0xff] }
 0x297   :  { %3207 = vmatprep.subr.bf16.mxu0 %v8953_v25  ;;  %3248 = vmatprep.subr.bf16.mxu1 %v8954_v30  ;;  %v8964_v25 = vld [vmem:[#allocation44_spill] sm:$0xff]  ;;  %v8965_v30 = vld [vmem:[#allocation45_spill] sm:$0xff] }
 0x29a   :  { %3208 = vmatpush1.bf16.msra.mxu0 %v8955_v35  ;;  %3249 = vmatpush1.bf16.msra.mxu1 %v8956_v31  ;;  %v8966_v35 = vld [vmem:[#allocation46_spill] sm:$0xff]  ;;  %v8967_v31 = vld [vmem:[#allocation47_spill] sm:$0xff] }
 0x29b   :  { %3209 = vmatprep.subr.bf16.mxu0 %v8957_v21  ;;  %3250 = vmatprep.subr.bf16.mxu1 %v8958_v12  ;;  %v8968_v21 = vld [vmem:[#allocation48_spill] sm:$0xff]  ;;  %v8969_v12 = vld [vmem:[#allocation49_spill] sm:$0xff] }
 0x29e   :  { %3210 = vmatpush1.bf16.msra.mxu0 %v8959_v13  ;;  %3251 = vmatpush1.bf16.msra.mxu1 %v8960_v14  ;;  %v8970_v13 = vld [vmem:[#allocation50_spill] sm:$0xff]  ;;  %v8971_v14 = vld [vmem:[#allocation51_spill] sm:$0xff] }
 0x29f   :  { %3211 = vmatprep.subr.bf16.mxu0 %v8961_v23  ;;  %3252 = vmatprep.subr.bf16.mxu1 %v8962_v24  ;;  %v8972_v23 = vld [vmem:[#allocation52_spill] sm:$0xff]  ;;  %v8973_v24 = vld [vmem:[#allocation53_spill] sm:$0xff] }
 0x2a2   :  { %3212 = vmatpush1.bf16.msra.mxu0 %v8963_v28  ;;  %3253 = vmatpush1.bf16.msra.mxu1 %v8964_v25  ;;  %v8974_v28 = vld [vmem:[#allocation54_spill] sm:$0xff]  ;;  %v8975_v25 = vld [vmem:[#allocation55_spill] sm:$0xff] }
 0x2a3   :  { %3213 = vmatprep.subr.bf16.mxu0 %v8965_v30  ;;  %3254 = vmatprep.subr.bf16.mxu1 %v8966_v35  ;;  %v8976_v30 = vld [vmem:[#allocation56_spill] sm:$0xff]  ;;  %v8977_v35 = vld [vmem:[#allocation57_spill] sm:$0xff] }
 0x2a6   :  { %3214 = vmatpush1.bf16.msra.mxu0 %v8967_v31  ;;  %3255 = vmatpush1.bf16.msra.mxu1 %v8968_v21  ;;  %v8978_v31 = vld [vmem:[#allocation58_spill] sm:$0xff]  ;;  %v8979_v21 = vld [vmem:[#allocation59_spill] sm:$0xff] }
 0x2a7   :  { %3215 = vmatprep.subr.bf16.mxu0 %v8969_v12  ;;  %3256 = vmatprep.subr.bf16.mxu1 %v8970_v13  ;;  %v8980_v12 = vld [vmem:[#allocation60_spill] sm:$0xff]  ;;  %v8981_v13 = vld [vmem:[#allocation61_spill] sm:$0xff] }
 0x2aa   :  { %3216 = vmatpush1.bf16.msra.mxu0 %v8971_v14  ;;  %3257 = vmatpush1.bf16.msra.mxu1 %v8972_v23  ;;  %v8982_v14 = vld [vmem:[#allocation62_spill] sm:$0xff]  ;;  %v8983_v23 = vld [vmem:[#allocation63_spill] sm:$0xff] }
 0x2ab   :  { %3217 = vmatprep.subr.bf16.mxu0 %v8973_v24  ;;  %3258 = vmatprep.subr.bf16.mxu1 %v8974_v28  ;;  %v8984_v24 = vld [vmem:[#allocation64_spill] sm:$0xff]  ;;  %v8985_v28 = vld [vmem:[#allocation65_spill] sm:$0xff] }
 0x2ae   :  { %3218 = vmatpush1.bf16.msra.mxu0 %v8975_v25  ;;  %3259 = vmatpush1.bf16.msra.mxu1 %v8976_v30  ;;  %v8986_v25 = vld [vmem:[#allocation66_spill] sm:$0xff]  ;;  %v8987_v30 = vld [vmem:[#allocation67_spill] sm:$0xff] }
 0x2af   :  { %3219 = vmatprep.subr.bf16.mxu0 %v8977_v35  ;;  %3260 = vmatprep.subr.bf16.mxu1 %v8978_v31  ;;  %v8988_v35 = vld [vmem:[#allocation68_spill] sm:$0xff]  ;;  %v8989_v31 = vld [vmem:[#allocation69_spill] sm:$0xff] }
 0x2b2   :  { %3220 = vmatpush1.bf16.msra.mxu0 %v8979_v21  ;;  %3261 = vmatpush1.bf16.msra.mxu1 %v8980_v12  ;;  %v8990_v21 = vld [vmem:[#allocation70_spill] sm:$0xff] }
 0x2b3   :  { %3221 = vmatprep.subr.bf16.mxu0 %v8981_v13  ;;  %3262 = vmatprep.subr.bf16.mxu1 %v8982_v14 }
 0x2b6   :  { %3222 = vmatpush1.bf16.msra.mxu0 %v8983_v23  ;;  %3263 = vmatpush1.bf16.msra.mxu1 %v8984_v24 }
 0x2b7   :  { %3223 = vmatprep.subr.bf16.mxu0 %v8985_v28  ;;  %3264 = vmatprep.subr.bf16.mxu1 %v8986_v25 }
 0x2ba   :  { %3224 = vmatpush1.bf16.msra.mxu0 %v8987_v30  ;;  %3265 = vmatpush1.bf16.msra.mxu1 %v8988_v35 }
 0x2bb   :  { %3275 = vmatprep.subr.bf16.mxu0 %v8989_v31  ;;  %3316 = vmatprep.subr.bf16.mxu1 %v8990_v21 }
 0x310   :  { %v3000_v12 = vpop.f32.mrb[40].mxu0  ;;  %v3041_v13 = vpop.f32.mrb[40].mxu1 }
 0x311   :  { %v3130_v14 = vadd.f32 %v8991_v17, %v3000_v12  ;;  %v3132_v23 = vadd.f32 %v8992_v7, %v3041_v13  ;;  %v3002_v6 = vpop.f32.mrb[41].mxu0  ;;  %v3043_v24 = vpop.f32.mrb[41].mxu1 }
 0x312   :  { %v3131_v28 = vadd.f32 %v8993_v10, %v3002_v6  ;;  %v3133_v25 = vadd.f32 %v8994_v5, %v3043_v24  ;;  %v3004_v63 = vpop.f32.mrb[42].mxu0  ;;  %v3045_v30 = vpop.f32.mrb[42].mxu1  ;;  %v8996_v24 = vld [vmem:[#allocation166_spill] sm:$0xff] }
 0x313   :  { %v3005_v62 = vpop.f32.mrb[43].mxu0  ;;  %v3046_v35 = vpop.f32.mrb[43].mxu1  ;;  %v3138_v61 = vsub.f32 0.0, %v3130_v14  ;;  %v3148_v31 = vsub.f32 0.0, %v3132_v23 }
 0x314   :  { %v3139_v59 = vsub.f32 0.0, %v3131_v28  ;;  %v3149_v21 = vsub.f32 0.0, %v3133_v25  ;;  %v8997_v25 = vld [vmem:[#allocation167_spill] sm:$0xff]  ;;  %v8998_v35 = vld [vmem:[#allocation168_spill] sm:$0xff] }
 0x315   :  { %v3140_v54 = vmul.f32 1.442695, %v3138_v61  ;;  %v3150_v52 = vmul.f32 1.442695, %v3148_v31  ;;  %v8995_v61 = vld [vmem:[#allocation119_spill] sm:$0xff] }
 0x316   :  { %v3142_v22 = vmul.f32 1.442695, %v3139_v59  ;;  %v3152_v17 = vmul.f32 1.442695, %v3149_v21 }
 0x317   :  { %5308 = vpow2.f32 %v3140_v54 }
 0x318   :  { %5310 = vpow2.f32 %v3150_v52 }
 0x319   :  { %5312 = vpow2.f32 %v3142_v22 }
 0x31a   :  { %5314 = vpow2.f32 %v3152_v17 }
 0x321   :  { %v5309_v7 = vpop.eup %5308 }
 0x322   :  { %v5311_v10 = vpop.eup %5310  ;;  %v3144_v63 = vadd.f32 1.0, %v5309_v7 }
 0x323   :  { %v5313_v6 = vpop.eup %5312  ;;  %v3154_v12 = vadd.f32 1.0, %v5311_v10 }
 0x324   :  { %v5315_v5 = vpop.eup %5314  ;;  %v3145_v62 = vadd.f32 1.0, %v5313_v6  ;;  %5316 = vrcp.f32 %v3144_v63 }
 0x325   :  { %v3155_v13 = vadd.f32 1.0, %v5315_v5  ;;  %5318 = vrcp.f32 %v3154_v12 }
 0x326   :  { %5320 = vrcp.f32 %v3145_v62 }
 0x327   :  { %5322 = vrcp.f32 %v3155_v13 }
 0x32e   :  { %v5317_v12 = vpop.eup %5316 }
 0x32f   :  { %v5319_v62 = vpop.eup %5318 }
 0x350   :  { %v3082_v14 = vpop.f32.mrb[44].mxu0  ;;  %v3123_v23 = vpop.f32.mrb[44].mxu1 }
 0x351   :  { %v3134_v59 = vadd.f32 %v8995_v61, %v3082_v14  ;;  %v3136_v54 = vadd.f32 %v8996_v24, %v3123_v23  ;;  %v3084_v52 = vpop.f32.mrb[45].mxu0  ;;  %v3125_v28 = vpop.f32.mrb[45].mxu1  ;;  %v3170_v24 = vmul.f32 %v5319_v62, %v7354_v55  ;;  %v9001_v62 = vld [vmem:[#allocation93_spill] sm:$0xff] }
 0x352   :  { %v3135_v30 = vadd.f32 %v8997_v25, %v3084_v52  ;;  %v3137_v31 = vadd.f32 %v8998_v35, %v3125_v28  ;;  %v3086_v22 = vpop.f32.mrb[46].mxu0  ;;  %v3127_v21 = vpop.f32.mrb[46].mxu1 }
 0x353   :  { %5324 = vtanh.f32 %v3134_v59  ;;  %v3160_v17 = vsub.f32 0.0, %v3136_v54  ;;  %v3087_v7 = vpop.f32.mrb[47].mxu0  ;;  %v3128_v10 = vpop.f32.mrb[47].mxu1 }
 0x354   :  { %5326 = vtanh.f32 %v3135_v30  ;;  %v3161_v6 = vsub.f32 0.0, %v3137_v31  ;;  %v5321_v14 = vpop.eup %5320 }
 0x355   :  { %v3162_v5 = vmul.f32 1.442695, %v3160_v17  ;;  %v5323_v13 = vpop.eup %5322 }
 0x356   :  { %v3164_v63 = vmul.f32 1.442695, %v3161_v6  ;;  %v3171_v59 = vmul.f32 %v5323_v13, %v7356_v46  ;;  %v9003_v13 = vld [vmem:[#allocation95_spill] sm:$0xff] }
 0x357   :  { %5328 = vpow2.f32 %v3162_v5 }
 0x358   :  { %5330 = vpow2.f32 %v3164_v63  ;;  %v8999_v63 = vld [vmem:[#allocation91_spill] sm:$0xff] }
 0x35d   :  { %v5325_v23 = vpop.eup %5324 }
 0x35e   :  { %v5327_v61 = vpop.eup %5326  ;;  %v3172_v52 = vmul.f32 %v5325_v23, %v5317_v12  ;;  %v9000_v12 = vld [vmem:[#allocation92_spill] sm:$0xff] }
 0x35f   :  { %v3173_v54 = vmul.f32 %v5327_v61, %v5321_v14  ;;  %v9002_v14 = vld [vmem:[#allocation94_spill] sm:$0xff]  ;;  %v9004_v23 = vld [vmem:[#allocation96_spill] sm:$0xff]  ;;  %v9005_v61 = vld [vmem:[#allocation97_spill] sm:$0xff] }
 0x360   :  { %v7504_v28 = vadd.f32 %v3172_v52, %v3170_v24  ;;  %v9006_v24 = vld [vmem:[#allocation98_spill] sm:$0xff]  ;;  %v9007_v52 = vld [vmem:[#allocation99_spill] sm:$0xff] }
 0x361   :  { %v5329_v25 = vpop.eup %5328  ;;  %v7506_v30 = vadd.f32 %v3173_v54, %v3171_v59  ;;  %v9008_v59 = vld [vmem:[#allocation100_spill] sm:$0xff]  ;;  %v9009_v54 = vld [vmem:[#allocation101_spill] sm:$0xff] }
 0x362   :  { %v5331_v35 = vpop.eup %5330  ;;  %5332 = vtanh.f32 %v7504_v28  ;;  %v3166_v31 = vadd.f32 1.0, %v5329_v25  ;;  %v9010_v25 = vld [vmem:[#allocation102_spill] sm:$0xff] }
 0x363   :  { %5334 = vtanh.f32 %v7506_v30  ;;  %v3167_v22 = vadd.f32 1.0, %v5331_v35  ;;  %v9011_v35 = vld [vmem:[#allocation103_spill] sm:$0xff] }
 0x364   :  { %5336 = vrcp.f32 %v3166_v31  ;;  %v9012_v31 = vld [vmem:[#allocation104_spill] sm:$0xff] }
 0x365   :  { %5338 = vrcp.f32 %v3167_v22  ;;  %v9013_v22 = vld [vmem:[#allocation105_spill] sm:$0xff] }
 0x36c   :  { %v5333_v21 = vpop.eup %5332 }
 0x36d   :  { %v5335_v55 = vpop.eup %5334 }
 0x36e   :  { %v5337_v17 = vpop.eup %5336 }
 0x36f   :  { %v5339_v7 = vpop.eup %5338  ;;  %v3178_v46 = vmul.f32 %v5337_v17, %v5333_v21  ;;  %v9014_v21 = vld [vmem:[#allocation106_spill] sm:$0xff]  ;;  %v9016_v17 = vld [vmem:[#allocation108_spill] sm:$0xff] }
 0x370   :  { %v3179_v10 = vmul.f32 %v5339_v7, %v5335_v55  ;;  %v9015_v55 = vld [vmem:[#allocation107_spill] sm:$0xff]  ;;  %v9017_v7 = vld [vmem:[#allocation109_spill] sm:$0xff] }
 0x371   :  { %v7510_v5 = vpack.c.bf16 %v3178_v46, %v3178_v46  ;;  %v9018_v46 = vld [vmem:[#allocation110_spill] sm:$0xff] }
 0x372   :  { %v3192_v6 = vpack.c.bf16 %v3179_v10, %v3179_v10  ;;  %v9019_v10 = vld [vmem:[#allocation111_spill] sm:$0xff] }
 0x374   :  { %3225 = vmatprep.mubr.bf16.mxu0 %v3192_v6  ;;  %3266 = vmatprep.mubr.bf16.mxu1 %v3192_v6 }
 0x375   :  { %3226 = vmatmul.mubr.bf16.vlgmr.msra.gmra.mrb[48].mxu0 %v7510_v5  ;;  %3267 = vmatmul.mubr.bf16.vlgmr.msra.gmra.mrb[48].mxu1 %v7510_v5 }
 0x376   :  { %3276 = vmatpush1.bf16.msra.mxu0 %v8893_v34  ;;  %3317 = vmatpush1.bf16.msra.mxu1 %v8894_v0 }
 0x377   :  { %3307 = vmatprep.mubr.bf16.mxu0 %v3192_v6  ;;  %3348 = vmatprep.mubr.bf16.mxu1 %v3192_v6  ;;  %v9020_v6 = vld [vmem:[#allocation112_spill] sm:$0xff] }
 0x378   :  { %3277 = vmatprep.subr.bf16.mxu0 %v8895_v9  ;;  %3318 = vmatprep.subr.bf16.mxu1 %v8896_v36 }
 0x37a   :  { %3278 = vmatpush1.bf16.msra.mxu0 %v8897_v43  ;;  %3319 = vmatpush1.bf16.msra.mxu1 %v8898_v11 }
 0x37b   :  { %3279 = vmatprep.subr.bf16.mxu0 %v8899_v47  ;;  %3320 = vmatprep.subr.bf16.mxu1 %v8900_v42 }
 0x37e   :  { %3280 = vmatpush1.bf16.msra.mxu0 %v8901_v20  ;;  %3321 = vmatpush1.bf16.msra.mxu1 %v8902_v19 }
 0x37f   :  { %3281 = vmatprep.subr.bf16.mxu0 %v8903_v40  ;;  %3322 = vmatprep.subr.bf16.mxu1 %v8904_v2 }
 0x382   :  { %3282 = vmatpush1.bf16.msra.mxu0 %v8905_v33  ;;  %3323 = vmatpush1.bf16.msra.mxu1 %v8906_v50 }
 0x383   :  { %3283 = vmatprep.subr.bf16.mxu0 %v8907_v37  ;;  %3324 = vmatprep.subr.bf16.mxu1 %v8908_v8 }
 0x386   :  { %3284 = vmatpush1.bf16.msra.mxu0 %v8909_v51  ;;  %3325 = vmatpush1.bf16.msra.mxu1 %v8910_v15 }
 0x387   :  { %3285 = vmatprep.subr.bf16.mxu0 %v8911_v4  ;;  %3326 = vmatprep.subr.bf16.mxu1 %v8912_v1 }
 0x38a   :  { %3286 = vmatpush1.bf16.msra.mxu0 %v8999_v63  ;;  %3327 = vmatpush1.bf16.msra.mxu1 %v9000_v12 }
 0x38b   :  { %3287 = vmatprep.subr.bf16.mxu0 %v9001_v62  ;;  %3328 = vmatprep.subr.bf16.mxu1 %v9002_v14 }
 0x38e   :  { %3288 = vmatpush1.bf16.msra.mxu0 %v9003_v13  ;;  %3329 = vmatpush1.bf16.msra.mxu1 %v9004_v23 }
 0x38f   :  { %3289 = vmatprep.subr.bf16.mxu0 %v9005_v61  ;;  %3330 = vmatprep.subr.bf16.mxu1 %v9006_v24 }
 0x392   :  { %3290 = vmatpush1.bf16.msra.mxu0 %v9007_v52  ;;  %3331 = vmatpush1.bf16.msra.mxu1 %v9008_v59 }
 0x393   :  { %3291 = vmatprep.subr.bf16.mxu0 %v9009_v54  ;;  %3332 = vmatprep.subr.bf16.mxu1 %v9010_v25 }
 0x396   :  { %3292 = vmatpush1.bf16.msra.mxu0 %v9011_v35  ;;  %3333 = vmatpush1.bf16.msra.mxu1 %v9012_v31 }
 0x397   :  { %3293 = vmatprep.subr.bf16.mxu0 %v9013_v22  ;;  %3334 = vmatprep.subr.bf16.mxu1 %v9014_v21 }
 0x39a   :  { %3294 = vmatpush1.bf16.msra.mxu0 %v9015_v55  ;;  %3335 = vmatpush1.bf16.msra.mxu1 %v9016_v17 }
 0x39b   :  { %3295 = vmatprep.subr.bf16.mxu0 %v9017_v7  ;;  %3336 = vmatprep.subr.bf16.mxu1 %v9018_v46 }
 0x39e   :  { %3296 = vmatpush1.bf16.msra.mxu0 %v9019_v10  ;;  %3337 = vmatpush1.bf16.msra.mxu1 %v9020_v6 }
 0x39f   :  { %3297 = vmatprep.subr.bf16.mxu0 %v8935_v44  ;;  %3338 = vmatprep.subr.bf16.mxu1 %v8936_v57 }
 0x3a2   :  { %3298 = vmatpush1.bf16.msra.mxu0 %v8937_v56  ;;  %3339 = vmatpush1.bf16.msra.mxu1 %v8938_v41 }
 0x3a3   :  { %3299 = vmatprep.subr.bf16.mxu0 %v8939_v39  ;;  %3340 = vmatprep.subr.bf16.mxu1 %v8940_v32  ;;  %v9090_v32 = vld [vmem:[#allocation144_spill] sm:$0xff]  ;;  %v9091_v39 = vld [vmem:[#allocation145_spill] sm:$0xff] }
 0x3a6   :  { %3300 = vmatpush1.bf16.msra.mxu0 %v8941_v38  ;;  %3341 = vmatpush1.bf16.msra.mxu1 %v8942_v45  ;;  %v9089_v45 = vld [vmem:[#allocation143_spill] sm:$0xff] }
 0x3a7   :  { %3301 = vmatprep.subr.bf16.mxu0 %v8943_v53  ;;  %3342 = vmatprep.subr.bf16.mxu1 %v8944_v16  ;;  %v9021_v53 = vld [vmem:[#allocation141_spill] sm:$0xff] }
 0x3a8   :  { %v9022_v16 = vld [vmem:[#allocation5_spill] sm:$0xff] }
 0x3aa   :  { %3302 = vmatpush1.bf16.msra.mxu0 %v8945_v18  ;;  %3343 = vmatpush1.bf16.msra.mxu1 %v7017_v60  ;;  %v9023_v18 = vld [vmem:[#allocation6_spill] sm:$0xff] }
 0x3ab   :  { %3303 = vmatprep.subr.bf16.mxu0 %v7019_v29  ;;  %3344 = vmatprep.subr.bf16.mxu1 %v7024_v27  ;;  %v9024_v27 = vld [vmem:[#allocation7_spill] sm:$0xff]  ;;  %v9033_v29 = vld [vmem:[#allocation16_spill] sm:$0xff]  ;;  %v9088_v60 = vld [vmem:[#allocation142_spill] sm:$0xff] }
 0x3ae   :  { %3304 = vmatpush1.bf16.msra.mxu0 %v7057_v26  ;;  %3345 = vmatpush1.bf16.msra.mxu1 %v7064_v58  ;;  %v9025_v26 = vld [vmem:[#allocation8_spill] sm:$0xff]  ;;  %v9026_v58 = vld [vmem:[#allocation9_spill] sm:$0xff] }
 0x3af   :  { %3305 = vmatprep.subr.bf16.mxu0 %v7066_v48  ;;  %3346 = vmatprep.subr.bf16.mxu1 %v7075_v49  ;;  %v9027_v48 = vld [vmem:[#allocation10_spill] sm:$0xff]  ;;  %v9028_v49 = vld [vmem:[#allocation11_spill] sm:$0xff] }
 0x3b2   :  { %3306 = vmatpush1.bf16.msra.mxu0 %v7081_v3  ;;  %3347 = vmatpush1.bf16.msra.mxu1 %v9021_v53  ;;  %v9029_v3 = vld [vmem:[#allocation12_spill] sm:$0xff]  ;;  %v9030_v53 = vld [vmem:[#allocation13_spill] sm:$0xff] }
 0x3b3   :  { %3420 = vmatprep.subr.bf16.mxu0 %v9022_v16  ;;  %3461 = vmatprep.subr.bf16.mxu1 %v9023_v18  ;;  %v9031_v16 = vld [vmem:[#allocation14_spill] sm:$0xff]  ;;  %v9032_v18 = vld [vmem:[#allocation15_spill] sm:$0xff] }
 0x3b5   :  { %3308 = vmatmul.mubr.bf16.vlgmr.msra.gmra.mrb[52].mxu0 %v7510_v5  ;;  %3349 = vmatmul.mubr.bf16.vlgmr.msra.gmra.mrb[52].mxu1 %v7510_v5  ;;  %v9034_v5 = vld [vmem:[#allocation17_spill] sm:$0xff] }
 0x3b6   :  { %3421 = vmatpush1.bf16.msra.mxu0 %v9024_v27  ;;  %3462 = vmatpush1.bf16.msra.mxu1 %v9025_v26  ;;  %v9035_v27 = vld [vmem:[#allocation18_spill] sm:$0xff]  ;;  %v9036_v26 = vld [vmem:[#allocation19_spill] sm:$0xff] }
 0x3b7   :  { %3422 = vmatprep.subr.bf16.mxu0 %v9026_v58  ;;  %3463 = vmatprep.subr.bf16.mxu1 %v9027_v48  ;;  %v9037_v58 = vld [vmem:[#allocation20_spill] sm:$0xff]  ;;  %v9038_v48 = vld [vmem:[#allocation21_spill] sm:$0xff] }
 0x3ba   :  { %3423 = vmatpush1.bf16.msra.mxu0 %v9028_v49  ;;  %3464 = vmatpush1.bf16.msra.mxu1 %v9029_v3  ;;  %v9039_v49 = vld [vmem:[#allocation22_spill] sm:$0xff]  ;;  %v9040_v3 = vld [vmem:[#allocation23_spill] sm:$0xff] }
 0x3bb   :  { %3424 = vmatprep.subr.bf16.mxu0 %v9030_v53  ;;  %3465 = vmatprep.subr.bf16.mxu1 %v9031_v16  ;;  %v9041_v53 = vld [vmem:[#allocation24_spill] sm:$0xff]  ;;  %v9042_v16 = vld [vmem:[#allocation25_spill] sm:$0xff] }
 0x3be   :  { %3425 = vmatpush1.bf16.msra.mxu0 %v9032_v18  ;;  %3466 = vmatpush1.bf16.msra.mxu1 %v9033_v29  ;;  %v9043_v18 = vld [vmem:[#allocation26_spill] sm:$0xff]  ;;  %v9044_v29 = vld [vmem:[#allocation27_spill] sm:$0xff] }
 0x3bf   :  { %3426 = vmatprep.subr.bf16.mxu0 %v9034_v5  ;;  %3467 = vmatprep.subr.bf16.mxu1 %v9035_v27  ;;  %v9045_v5 = vld [vmem:[#allocation28_spill] sm:$0xff]  ;;  %v9046_v27 = vld [vmem:[#allocation29_spill] sm:$0xff] }
 0x3c2   :  { %3427 = vmatpush1.bf16.msra.mxu0 %v9036_v26  ;;  %3468 = vmatpush1.bf16.msra.mxu1 %v9037_v58  ;;  %v9047_v26 = vld [vmem:[#allocation30_spill] sm:$0xff]  ;;  %v9048_v58 = vld [vmem:[#allocation31_spill] sm:$0xff] }
 0x3c3   :  { %3428 = vmatprep.subr.bf16.mxu0 %v9038_v48  ;;  %3469 = vmatprep.subr.bf16.mxu1 %v9039_v49  ;;  %v9049_v48 = vld [vmem:[#allocation32_spill] sm:$0xff]  ;;  %v9050_v49 = vld [vmem:[#allocation33_spill] sm:$0xff] }
 0x3c6   :  { %3429 = vmatpush1.bf16.msra.mxu0 %v9040_v3  ;;  %3470 = vmatpush1.bf16.msra.mxu1 %v9041_v53  ;;  %v9051_v3 = vld [vmem:[#allocation34_spill] sm:$0xff]  ;;  %v9052_v53 = vld [vmem:[#allocation35_spill] sm:$0xff] }
 0x3c7   :  { %3430 = vmatprep.subr.bf16.mxu0 %v9042_v16  ;;  %3471 = vmatprep.subr.bf16.mxu1 %v9043_v18  ;;  %v9053_v16 = vld [vmem:[#allocation36_spill] sm:$0xff]  ;;  %v9054_v18 = vld [vmem:[#allocation37_spill] sm:$0xff] }
 0x3ca   :  { %3431 = vmatpush1.bf16.msra.mxu0 %v9044_v29  ;;  %3472 = vmatpush1.bf16.msra.mxu1 %v9045_v5  ;;  %v9055_v29 = vld [vmem:[#allocation38_spill] sm:$0xff]  ;;  %v9056_v5 = vld [vmem:[#allocation39_spill] sm:$0xff] }
 0x3cb   :  { %3432 = vmatprep.subr.bf16.mxu0 %v9046_v27  ;;  %3473 = vmatprep.subr.bf16.mxu1 %v9047_v26  ;;  %v9057_v27 = vld [vmem:[#allocation40_spill] sm:$0xff]  ;;  %v9058_v26 = vld [vmem:[#allocation41_spill] sm:$0xff] }
 0x3ce   :  { %3433 = vmatpush1.bf16.msra.mxu0 %v9048_v58  ;;  %3474 = vmatpush1.bf16.msra.mxu1 %v9049_v48  ;;  %v9059_v58 = vld [vmem:[#allocation42_spill] sm:$0xff]  ;;  %v9060_v48 = vld [vmem:[#allocation43_spill] sm:$0xff] }
 0x3cf   :  { %3434 = vmatprep.subr.bf16.mxu0 %v9050_v49  ;;  %3475 = vmatprep.subr.bf16.mxu1 %v9051_v3  ;;  %v9061_v49 = vld [vmem:[#allocation44_spill] sm:$0xff]  ;;  %v9062_v3 = vld [vmem:[#allocation45_spill] sm:$0xff] }
 0x3d2   :  { %3435 = vmatpush1.bf16.msra.mxu0 %v9052_v53  ;;  %3476 = vmatpush1.bf16.msra.mxu1 %v9053_v16  ;;  %v9063_v53 = vld [vmem:[#allocation46_spill] sm:$0xff]  ;;  %v9064_v16 = vld [vmem:[#allocation47_spill] sm:$0xff] }
 0x3d3   :  { %3436 = vmatprep.subr.bf16.mxu0 %v9054_v18  ;;  %3477 = vmatprep.subr.bf16.mxu1 %v9055_v29  ;;  %v9065_v18 = vld [vmem:[#allocation48_spill] sm:$0xff]  ;;  %v9066_v29 = vld [vmem:[#allocation49_spill] sm:$0xff] }
 0x3d6   :  { %3437 = vmatpush1.bf16.msra.mxu0 %v9056_v5  ;;  %3478 = vmatpush1.bf16.msra.mxu1 %v9057_v27  ;;  %v9067_v5 = vld [vmem:[#allocation50_spill] sm:$0xff]  ;;  %v9068_v27 = vld [vmem:[#allocation51_spill] sm:$0xff] }
 0x3d7   :  { %3438 = vmatprep.subr.bf16.mxu0 %v9058_v26  ;;  %3479 = vmatprep.subr.bf16.mxu1 %v9059_v58  ;;  %v9069_v26 = vld [vmem:[#allocation52_spill] sm:$0xff]  ;;  %v9070_v58 = vld [vmem:[#allocation53_spill] sm:$0xff] }
 0x3da   :  { %3439 = vmatpush1.bf16.msra.mxu0 %v9060_v48  ;;  %3480 = vmatpush1.bf16.msra.mxu1 %v9061_v49  ;;  %v9071_v48 = vld [vmem:[#allocation54_spill] sm:$0xff]  ;;  %v9072_v49 = vld [vmem:[#allocation55_spill] sm:$0xff] }
 0x3db   :  { %3440 = vmatprep.subr.bf16.mxu0 %v9062_v3  ;;  %3481 = vmatprep.subr.bf16.mxu1 %v9063_v53  ;;  %v9073_v3 = vld [vmem:[#allocation56_spill] sm:$0xff]  ;;  %v9074_v53 = vld [vmem:[#allocation57_spill] sm:$0xff] }
 0x3de   :  { %3441 = vmatpush1.bf16.msra.mxu0 %v9064_v16  ;;  %3482 = vmatpush1.bf16.msra.mxu1 %v9065_v18  ;;  %v9075_v16 = vld [vmem:[#allocation58_spill] sm:$0xff]  ;;  %v9076_v18 = vld [vmem:[#allocation59_spill] sm:$0xff] }
 0x3df   :  { %3442 = vmatprep.subr.bf16.mxu0 %v9066_v29  ;;  %3483 = vmatprep.subr.bf16.mxu1 %v9067_v5  ;;  %v9077_v29 = vld [vmem:[#allocation60_spill] sm:$0xff]  ;;  %v9078_v5 = vld [vmem:[#allocation61_spill] sm:$0xff] }
 0x3e2   :  { %3443 = vmatpush1.bf16.msra.mxu0 %v9068_v27  ;;  %3484 = vmatpush1.bf16.msra.mxu1 %v9069_v26  ;;  %v9079_v27 = vld [vmem:[#allocation62_spill] sm:$0xff]  ;;  %v9080_v26 = vld [vmem:[#allocation63_spill] sm:$0xff] }
 0x3e3   :  { %3444 = vmatprep.subr.bf16.mxu0 %v9070_v58  ;;  %3485 = vmatprep.subr.bf16.mxu1 %v9071_v48  ;;  %v9081_v58 = vld [vmem:[#allocation64_spill] sm:$0xff]  ;;  %v9082_v48 = vld [vmem:[#allocation65_spill] sm:$0xff] }
 0x3e6   :  { %3445 = vmatpush1.bf16.msra.mxu0 %v9072_v49  ;;  %3486 = vmatpush1.bf16.msra.mxu1 %v9073_v3  ;;  %v9083_v49 = vld [vmem:[#allocation66_spill] sm:$0xff]  ;;  %v9084_v3 = vld [vmem:[#allocation67_spill] sm:$0xff] }
 0x3e7   :  { %3446 = vmatprep.subr.bf16.mxu0 %v9074_v53  ;;  %3487 = vmatprep.subr.bf16.mxu1 %v9075_v16  ;;  %v9085_v53 = vld [vmem:[#allocation68_spill] sm:$0xff]  ;;  %v9086_v16 = vld [vmem:[#allocation69_spill] sm:$0xff] }
 0x3ea   :  { %3447 = vmatpush1.bf16.msra.mxu0 %v9076_v18  ;;  %3488 = vmatpush1.bf16.msra.mxu1 %v9077_v29  ;;  %v9087_v18 = vld [vmem:[#allocation70_spill] sm:$0xff] }
 0x3eb   :  { %3448 = vmatprep.subr.bf16.mxu0 %v9078_v5  ;;  %3489 = vmatprep.subr.bf16.mxu1 %v9079_v27 }
 0x3ee   :  { %3449 = vmatpush1.bf16.msra.mxu0 %v9080_v26  ;;  %3490 = vmatpush1.bf16.msra.mxu1 %v9081_v58 }
 0x3ef   :  { %3450 = vmatprep.subr.bf16.mxu0 %v9082_v48  ;;  %3491 = vmatprep.subr.bf16.mxu1 %v9083_v49 }
 0x3f2   :  { %3451 = vmatpush1.bf16.msra.mxu0 %v9084_v3  ;;  %3492 = vmatpush1.bf16.msra.mxu1 %v9085_v53 }
 0x3f3   :  { %3502 = vmatprep.subr.bf16.mxu0 %v9086_v16  ;;  %3543 = vmatprep.subr.bf16.mxu1 %v9087_v18 }
 0x448   :  { %v3227_v29 = vpop.f32.mrb[48].mxu0  ;;  %v3268_v5 = vpop.f32.mrb[48].mxu1 }
 0x449   :  { %v3357_v27 = vadd.f32 %v9088_v60, %v3227_v29  ;;  %v3359_v26 = vadd.f32 %v9089_v45, %v3268_v5  ;;  %v3229_v38 = vpop.f32.mrb[49].mxu0  ;;  %v3270_v58 = vpop.f32.mrb[49].mxu1 }
 0x44a   :  { %v3358_v48 = vadd.f32 %v9090_v32, %v3229_v38  ;;  %v3360_v49 = vadd.f32 %v9091_v39, %v3270_v58  ;;  %v3231_v41 = vpop.f32.mrb[50].mxu0  ;;  %v3272_v3 = vpop.f32.mrb[50].mxu1 }
 0x44b   :  { %v3232_v56 = vpop.f32.mrb[51].mxu0  ;;  %v3273_v53 = vpop.f32.mrb[51].mxu1  ;;  %v3365_v57 = vsub.f32 0.0, %v3357_v27  ;;  %v3375_v16 = vsub.f32 0.0, %v3359_v26 }
 0x44c   :  { %v3366_v44 = vsub.f32 0.0, %v3358_v48  ;;  %v3376_v18 = vsub.f32 0.0, %v3360_v49  ;;  %v9092_v48 = vld [vmem:[#allocation169_spill] sm:$0xff] }
 0x44d   :  { %v3367_v6 = vmul.f32 1.442695, %v3365_v57  ;;  %v3377_v10 = vmul.f32 1.442695, %v3375_v16  ;;  %v9094_v16 = vld [vmem:[#allocation171_spill] sm:$0xff] }
 0x44e   :  { %v3369_v46 = vmul.f32 1.442695, %v3366_v44  ;;  %v3379_v60 = vmul.f32 1.442695, %v3376_v18  ;;  %v9093_v44 = vld [vmem:[#allocation170_spill] sm:$0xff] }
 0x44f   :  { %5340 = vpow2.f32 %v3367_v6 }
 0x450   :  { %5342 = vpow2.f32 %v3377_v10 }
 0x451   :  { %5344 = vpow2.f32 %v3369_v46  ;;  %v9095_v46 = vld [vmem:[#allocation172_spill] sm:$0xff] }
 0x452   :  { %5346 = vpow2.f32 %v3379_v60 }
 0x459   :  { %v5341_v29 = vpop.eup %5340 }
 0x45a   :  { %v5343_v32 = vpop.eup %5342  ;;  %v3371_v41 = vadd.f32 1.0, %v5341_v29 }
 0x45b   :  { %v5345_v38 = vpop.eup %5344  ;;  %v3381_v3 = vadd.f32 1.0, %v5343_v32 }
 0x45c   :  { %v5347_v58 = vpop.eup %5346  ;;  %v3372_v56 = vadd.f32 1.0, %v5345_v38  ;;  %5348 = vrcp.f32 %v3371_v41 }
 0x45d   :  { %v3382_v39 = vadd.f32 1.0, %v5347_v58  ;;  %5350 = vrcp.f32 %v3381_v3 }
 0x45e   :  { %5352 = vrcp.f32 %v3372_v56 }
 0x45f   :  { %5354 = vrcp.f32 %v3382_v39 }
 0x466   :  { %v5349_v3 = vpop.eup %5348 }
 0x467   :  { %v5351_v56 = vpop.eup %5350 }
 0x488   :  { %v3309_v26 = vpop.f32.mrb[52].mxu0  ;;  %v3350_v27 = vpop.f32.mrb[52].mxu1 }
 0x489   :  { %v3361_v49 = vadd.f32 %v9092_v48, %v3309_v26  ;;  %v3363_v57 = vadd.f32 %v9093_v44, %v3350_v27  ;;  %v3311_v45 = vpop.f32.mrb[53].mxu0  ;;  %v3352_v53 = vpop.f32.mrb[53].mxu1  ;;  %v3397_v44 = vmul.f32 %v5351_v56, %v7504_v28  ;;  %v9098_v56 = vld [vmem:[#allocation112_spill] sm:$0xff] }
 0x48a   :  { %v3362_v18 = vadd.f32 %v9094_v16, %v3311_v45  ;;  %v3364_v10 = vadd.f32 %v9095_v46, %v3352_v53  ;;  %v3313_v6 = vpop.f32.mrb[54].mxu0  ;;  %v3354_v5 = vpop.f32.mrb[54].mxu1 }
 0x48b   :  { %5356 = vtanh.f32 %v3361_v49  ;;  %v3387_v60 = vsub.f32 0.0, %v3363_v57  ;;  %v3314_v29 = vpop.f32.mrb[55].mxu0  ;;  %v3355_v32 = vpop.f32.mrb[55].mxu1 }
 0x48c   :  { %5358 = vtanh.f32 %v3362_v18  ;;  %v3388_v38 = vsub.f32 0.0, %v3364_v10  ;;  %v5353_v26 = vpop.eup %5352 }
 0x48d   :  { %v3389_v58 = vmul.f32 1.442695, %v3387_v60  ;;  %v5355_v39 = vpop.eup %5354 }
 0x48e   :  { %v3391_v41 = vmul.f32 1.442695, %v3388_v38  ;;  %v3398_v49 = vmul.f32 %v5355_v39, %v7506_v30  ;;  %v9100_v39 = vld [vmem:[#allocation114_spill] sm:$0xff] }
 0x48f   :  { %5360 = vpow2.f32 %v3389_v58 }
 0x490   :  { %5362 = vpow2.f32 %v3391_v41  ;;  %v9096_v41 = vld [vmem:[#allocation110_spill] sm:$0xff] }
 0x495   :  { %v5357_v27 = vpop.eup %5356 }
 0x496   :  { %v5359_v48 = vpop.eup %5358  ;;  %v3399_v45 = vmul.f32 %v5357_v27, %v5349_v3  ;;  %v9097_v3 = vld [vmem:[#allocation111_spill] sm:$0xff] }
 0x497   :  { %v3400_v57 = vmul.f32 %v5359_v48, %v5353_v26  ;;  %v9099_v26 = vld [vmem:[#allocation113_spill] sm:$0xff]  ;;  %v9101_v27 = vld [vmem:[#allocation115_spill] sm:$0xff]  ;;  %v9102_v48 = vld [vmem:[#allocation116_spill] sm:$0xff] }
 0x498   :  { %v7654_v53 = vadd.f32 %v3399_v45, %v3397_v44  ;;  %v9103_v44 = vld [vmem:[#allocation117_spill] sm:$0xff]  ;;  %v9104_v45 = vld [vmem:[#allocation118_spill] sm:$0xff] }
 0x499   :  { %v5361_v16 = vpop.eup %5360  ;;  %v7656_v18 = vadd.f32 %v3400_v57, %v3398_v49  ;;  %v9105_v49 = vld [vmem:[#allocation120_spill] sm:$0xff]  ;;  %v9106_v57 = vld [vmem:[#allocation121_spill] sm:$0xff] }
 0x49a   :  { %v5363_v46 = vpop.eup %5362  ;;  %5364 = vtanh.f32 %v7654_v53  ;;  %v3393_v10 = vadd.f32 1.0, %v5361_v16  ;;  %v9107_v16 = vld [vmem:[#allocation122_spill] sm:$0xff] }
 0x49b   :  { %5366 = vtanh.f32 %v7656_v18  ;;  %v3394_v6 = vadd.f32 1.0, %v5363_v46  ;;  %v9108_v46 = vld [vmem:[#allocation123_spill] sm:$0xff] }
 0x49c   :  { %5368 = vrcp.f32 %v3393_v10  ;;  %v9109_v10 = vld [vmem:[#allocation124_spill] sm:$0xff] }
 0x49d   :  { %5370 = vrcp.f32 %v3394_v6  ;;  %v9110_v6 = vld [vmem:[#allocation125_spill] sm:$0xff] }
 0x4a4   :  { %v5365_v5 = vpop.eup %5364 }
 0x4a5   :  { %v5367_v28 = vpop.eup %5366 }
 0x4a6   :  { %v5369_v60 = vpop.eup %5368 }
 0x4a7   :  { %v5371_v29 = vpop.eup %5370  ;;  %v3405_v30 = vmul.f32 %v5369_v60, %v5365_v5  ;;  %v9111_v5 = vld [vmem:[#allocation126_spill] sm:$0xff]  ;;  %v9113_v60 = vld [vmem:[#allocation132_spill] sm:$0xff] }
 0x4a8   :  { %v3406_v32 = vmul.f32 %v5371_v29, %v5367_v28  ;;  %v9112_v28 = vld [vmem:[#allocation128_spill] sm:$0xff]  ;;  %v9114_v29 = vld [vmem:[#allocation134_spill] sm:$0xff] }
 0x4a9   :  { %v7660_v58 = vpack.c.bf16 %v3405_v30, %v3405_v30  ;;  %v9115_v30 = vld [vmem:[#allocation135_spill] sm:$0xff] }
 0x4aa   :  { %v3419_v38 = vpack.c.bf16 %v3406_v32, %v3406_v32  ;;  %v9116_v32 = vld [vmem:[#allocation138_spill] sm:$0xff] }
 0x4ac   :  { %3452 = vmatprep.mubr.bf16.mxu0 %v3419_v38  ;;  %3493 = vmatprep.mubr.bf16.mxu1 %v3419_v38 }
 0x4ad   :  { %3453 = vmatmul.mubr.bf16.vlgmr.msra.gmra.mrb[56].mxu0 %v7660_v58  ;;  %3494 = vmatmul.mubr.bf16.vlgmr.msra.gmra.mrb[56].mxu1 %v7660_v58 }
 0x4ae   :  { %3503 = vmatpush1.bf16.msra.mxu0 %v8893_v34  ;;  %3544 = vmatpush1.bf16.msra.mxu1 %v8894_v0 }
 0x4af   :  { %3534 = vmatprep.mubr.bf16.mxu0 %v3419_v38  ;;  %3575 = vmatprep.mubr.bf16.mxu1 %v3419_v38  ;;  %v9117_v38 = vld [vmem:[#allocation140_spill] sm:$0xff] }
 0x4b0   :  { %3504 = vmatprep.subr.bf16.mxu0 %v8895_v9  ;;  %3545 = vmatprep.subr.bf16.mxu1 %v8896_v36 }
 0x4b2   :  { %3505 = vmatpush1.bf16.msra.mxu0 %v8897_v43  ;;  %3546 = vmatpush1.bf16.msra.mxu1 %v8898_v11 }
 0x4b3   :  { %3506 = vmatprep.subr.bf16.mxu0 %v8899_v47  ;;  %3547 = vmatprep.subr.bf16.mxu1 %v8900_v42 }
 0x4b6   :  { %3507 = vmatpush1.bf16.msra.mxu0 %v8901_v20  ;;  %3548 = vmatpush1.bf16.msra.mxu1 %v8902_v19 }
 0x4b7   :  { %3508 = vmatprep.subr.bf16.mxu0 %v8903_v40  ;;  %3549 = vmatprep.subr.bf16.mxu1 %v8904_v2 }
 0x4ba   :  { %3509 = vmatpush1.bf16.msra.mxu0 %v8905_v33  ;;  %3550 = vmatpush1.bf16.msra.mxu1 %v8906_v50 }
 0x4bb   :  { %3510 = vmatprep.subr.bf16.mxu0 %v8907_v37  ;;  %3551 = vmatprep.subr.bf16.mxu1 %v8908_v8 }
 0x4be   :  { %3511 = vmatpush1.bf16.msra.mxu0 %v8909_v51  ;;  %3552 = vmatpush1.bf16.msra.mxu1 %v8910_v15 }
 0x4bf   :  { %3512 = vmatprep.subr.bf16.mxu0 %v8911_v4  ;;  %3553 = vmatprep.subr.bf16.mxu1 %v8912_v1 }
 0x4c2   :  { %3513 = vmatpush1.bf16.msra.mxu0 %v8999_v63  ;;  %3554 = vmatpush1.bf16.msra.mxu1 %v9000_v12 }
 0x4c3   :  { %3514 = vmatprep.subr.bf16.mxu0 %v9001_v62  ;;  %3555 = vmatprep.subr.bf16.mxu1 %v9002_v14 }
 0x4c6   :  { %3515 = vmatpush1.bf16.msra.mxu0 %v9003_v13  ;;  %3556 = vmatpush1.bf16.msra.mxu1 %v9004_v23 }
 0x4c7   :  { %3516 = vmatprep.subr.bf16.mxu0 %v9005_v61  ;;  %3557 = vmatprep.subr.bf16.mxu1 %v9006_v24 }
 0x4ca   :  { %3517 = vmatpush1.bf16.msra.mxu0 %v9007_v52  ;;  %3558 = vmatpush1.bf16.msra.mxu1 %v9008_v59 }
 0x4cb   :  { %3518 = vmatprep.subr.bf16.mxu0 %v9009_v54  ;;  %3559 = vmatprep.subr.bf16.mxu1 %v9010_v25 }
 0x4ce   :  { %3519 = vmatpush1.bf16.msra.mxu0 %v9011_v35  ;;  %3560 = vmatpush1.bf16.msra.mxu1 %v9012_v31 }
 0x4cf   :  { %3520 = vmatprep.subr.bf16.mxu0 %v9013_v22  ;;  %3561 = vmatprep.subr.bf16.mxu1 %v9014_v21 }
 0x4d2   :  { %3521 = vmatpush1.bf16.msra.mxu0 %v9015_v55  ;;  %3562 = vmatpush1.bf16.msra.mxu1 %v9016_v17 }
 0x4d3   :  { %3522 = vmatprep.subr.bf16.mxu0 %v9017_v7  ;;  %3563 = vmatprep.subr.bf16.mxu1 %v9096_v41 }
 0x4d6   :  { %3523 = vmatpush1.bf16.msra.mxu0 %v9097_v3  ;;  %3564 = vmatpush1.bf16.msra.mxu1 %v9098_v56 }
 0x4d7   :  { %3524 = vmatprep.subr.bf16.mxu0 %v9099_v26  ;;  %3565 = vmatprep.subr.bf16.mxu1 %v9100_v39 }
 0x4da   :  { %3525 = vmatpush1.bf16.msra.mxu0 %v9101_v27  ;;  %3566 = vmatpush1.bf16.msra.mxu1 %v9102_v48 }
 0x4db   :  { %3526 = vmatprep.subr.bf16.mxu0 %v9103_v44  ;;  %3567 = vmatprep.subr.bf16.mxu1 %v9104_v45  ;;  %v9187_v45 = vld [vmem:[#allocation148_spill] sm:$0xff]  ;;  %v9188_v44 = vld [vmem:[#allocation149_spill] sm:$0xff] }
 0x4de   :  { %3527 = vmatpush1.bf16.msra.mxu0 %v9105_v49  ;;  %3568 = vmatpush1.bf16.msra.mxu1 %v9106_v57  ;;  %v9186_v57 = vld [vmem:[#allocation147_spill] sm:$0xff] }
 0x4df   :  { %3528 = vmatprep.subr.bf16.mxu0 %v9107_v16  ;;  %3569 = vmatprep.subr.bf16.mxu1 %v9108_v46  ;;  %v9118_v16 = vld [vmem:[#allocation141_spill] sm:$0xff] }
 0x4e0   :  { %v9119_v46 = vld [vmem:[#allocation5_spill] sm:$0xff] }
 0x4e2   :  { %3529 = vmatpush1.bf16.msra.mxu0 %v9109_v10  ;;  %3570 = vmatpush1.bf16.msra.mxu1 %v9110_v6  ;;  %v9120_v10 = vld [vmem:[#allocation6_spill] sm:$0xff] }
 0x4e3   :  { %3530 = vmatprep.subr.bf16.mxu0 %v9111_v5  ;;  %3571 = vmatprep.subr.bf16.mxu1 %v9112_v28  ;;  %v9121_v28 = vld [vmem:[#allocation7_spill] sm:$0xff]  ;;  %v9130_v5 = vld [vmem:[#allocation16_spill] sm:$0xff]  ;;  %v9185_v6 = vld [vmem:[#allocation146_spill] sm:$0xff] }
 0x4e6   :  { %3531 = vmatpush1.bf16.msra.mxu0 %v9113_v60  ;;  %3572 = vmatpush1.bf16.msra.mxu1 %v9114_v29  ;;  %v9122_v60 = vld [vmem:[#allocation8_spill] sm:$0xff]  ;;  %v9123_v29 = vld [vmem:[#allocation9_spill] sm:$0xff] }
 0x4e7   :  { %3532 = vmatprep.subr.bf16.mxu0 %v9115_v30  ;;  %3573 = vmatprep.subr.bf16.mxu1 %v9116_v32  ;;  %v9124_v30 = vld [vmem:[#allocation10_spill] sm:$0xff]  ;;  %v9125_v32 = vld [vmem:[#allocation11_spill] sm:$0xff] }
 0x4ea   :  { %3533 = vmatpush1.bf16.msra.mxu0 %v9117_v38  ;;  %3574 = vmatpush1.bf16.msra.mxu1 %v9118_v16  ;;  %v9126_v38 = vld [vmem:[#allocation12_spill] sm:$0xff]  ;;  %v9127_v16 = vld [vmem:[#allocation13_spill] sm:$0xff] }
 0x4eb   :  { %3647 = vmatprep.subr.bf16.mxu0 %v9119_v46  ;;  %3688 = vmatprep.subr.bf16.mxu1 %v9120_v10  ;;  %v9128_v46 = vld [vmem:[#allocation14_spill] sm:$0xff]  ;;  %v9129_v10 = vld [vmem:[#allocation15_spill] sm:$0xff] }
 0x4ed   :  { %3535 = vmatmul.mubr.bf16.vlgmr.msra.gmra.mrb[60].mxu0 %v7660_v58  ;;  %3576 = vmatmul.mubr.bf16.vlgmr.msra.gmra.mrb[60].mxu1 %v7660_v58  ;;  %v9131_v58 = vld [vmem:[#allocation17_spill] sm:$0xff] }
 0x4ee   :  { %3648 = vmatpush1.bf16.msra.mxu0 %v9121_v28  ;;  %3689 = vmatpush1.bf16.msra.mxu1 %v9122_v60  ;;  %v9132_v28 = vld [vmem:[#allocation18_spill] sm:$0xff]  ;;  %v9133_v60 = vld [vmem:[#allocation19_spill] sm:$0xff] }
 0x4ef   :  { %3649 = vmatprep.subr.bf16.mxu0 %v9123_v29  ;;  %3690 = vmatprep.subr.bf16.mxu1 %v9124_v30  ;;  %v9134_v29 = vld [vmem:[#allocation20_spill] sm:$0xff]  ;;  %v9135_v30 = vld [vmem:[#allocation21_spill] sm:$0xff] }
 0x4f2   :  { %3650 = vmatpush1.bf16.msra.mxu0 %v9125_v32  ;;  %3691 = vmatpush1.bf16.msra.mxu1 %v9126_v38  ;;  %v9136_v32 = vld [vmem:[#allocation22_spill] sm:$0xff]  ;;  %v9137_v38 = vld [vmem:[#allocation23_spill] sm:$0xff] }
 0x4f3   :  { %3651 = vmatprep.subr.bf16.mxu0 %v9127_v16  ;;  %3692 = vmatprep.subr.bf16.mxu1 %v9128_v46  ;;  %v9138_v16 = vld [vmem:[#allocation24_spill] sm:$0xff]  ;;  %v9139_v46 = vld [vmem:[#allocation25_spill] sm:$0xff] }
 0x4f6   :  { %3652 = vmatpush1.bf16.msra.mxu0 %v9129_v10  ;;  %3693 = vmatpush1.bf16.msra.mxu1 %v9130_v5  ;;  %v9140_v10 = vld [vmem:[#allocation26_spill] sm:$0xff]  ;;  %v9141_v5 = vld [vmem:[#allocation27_spill] sm:$0xff] }
 0x4f7   :  { %3653 = vmatprep.subr.bf16.mxu0 %v9131_v58  ;;  %3694 = vmatprep.subr.bf16.mxu1 %v9132_v28  ;;  %v9142_v58 = vld [vmem:[#allocation28_spill] sm:$0xff]  ;;  %v9143_v28 = vld [vmem:[#allocation29_spill] sm:$0xff] }
 0x4fa   :  { %3654 = vmatpush1.bf16.msra.mxu0 %v9133_v60  ;;  %3695 = vmatpush1.bf16.msra.mxu1 %v9134_v29  ;;  %v9144_v60 = vld [vmem:[#allocation30_spill] sm:$0xff]  ;;  %v9145_v29 = vld [vmem:[#allocation31_spill] sm:$0xff] }
 0x4fb   :  { %3655 = vmatprep.subr.bf16.mxu0 %v9135_v30  ;;  %3696 = vmatprep.subr.bf16.mxu1 %v9136_v32  ;;  %v9146_v30 = vld [vmem:[#allocation32_spill] sm:$0xff]  ;;  %v9147_v32 = vld [vmem:[#allocation33_spill] sm:$0xff] }
 0x4fe   :  { %3656 = vmatpush1.bf16.msra.mxu0 %v9137_v38  ;;  %3697 = vmatpush1.bf16.msra.mxu1 %v9138_v16  ;;  %v9148_v38 = vld [vmem:[#allocation34_spill] sm:$0xff]  ;;  %v9149_v16 = vld [vmem:[#allocation35_spill] sm:$0xff] }
 0x4ff   :  { %3657 = vmatprep.subr.bf16.mxu0 %v9139_v46  ;;  %3698 = vmatprep.subr.bf16.mxu1 %v9140_v10  ;;  %v9150_v46 = vld [vmem:[#allocation36_spill] sm:$0xff]  ;;  %v9151_v10 = vld [vmem:[#allocation37_spill] sm:$0xff] }
 0x502   :  { %3658 = vmatpush1.bf16.msra.mxu0 %v9141_v5  ;;  %3699 = vmatpush1.bf16.msra.mxu1 %v9142_v58  ;;  %v9152_v5 = vld [vmem:[#allocation38_spill] sm:$0xff]  ;;  %v9153_v58 = vld [vmem:[#allocation39_spill] sm:$0xff] }
 0x503   :  { %3659 = vmatprep.subr.bf16.mxu0 %v9143_v28  ;;  %3700 = vmatprep.subr.bf16.mxu1 %v9144_v60  ;;  %v9154_v28 = vld [vmem:[#allocation40_spill] sm:$0xff]  ;;  %v9155_v60 = vld [vmem:[#allocation41_spill] sm:$0xff] }
 0x506   :  { %3660 = vmatpush1.bf16.msra.mxu0 %v9145_v29  ;;  %3701 = vmatpush1.bf16.msra.mxu1 %v9146_v30  ;;  %v9156_v29 = vld [vmem:[#allocation42_spill] sm:$0xff]  ;;  %v9157_v30 = vld [vmem:[#allocation43_spill] sm:$0xff] }
 0x507   :  { %3661 = vmatprep.subr.bf16.mxu0 %v9147_v32  ;;  %3702 = vmatprep.subr.bf16.mxu1 %v9148_v38  ;;  %v9158_v32 = vld [vmem:[#allocation44_spill] sm:$0xff]  ;;  %v9159_v38 = vld [vmem:[#allocation45_spill] sm:$0xff] }
 0x50a   :  { %3662 = vmatpush1.bf16.msra.mxu0 %v9149_v16  ;;  %3703 = vmatpush1.bf16.msra.mxu1 %v9150_v46  ;;  %v9160_v16 = vld [vmem:[#allocation46_spill] sm:$0xff]  ;;  %v9161_v46 = vld [vmem:[#allocation47_spill] sm:$0xff] }
 0x50b   :  { %3663 = vmatprep.subr.bf16.mxu0 %v9151_v10  ;;  %3704 = vmatprep.subr.bf16.mxu1 %v9152_v5  ;;  %v9162_v10 = vld [vmem:[#allocation48_spill] sm:$0xff]  ;;  %v9163_v5 = vld [vmem:[#allocation49_spill] sm:$0xff] }
 0x50e   :  { %3664 = vmatpush1.bf16.msra.mxu0 %v9153_v58  ;;  %3705 = vmatpush1.bf16.msra.mxu1 %v9154_v28  ;;  %v9164_v58 = vld [vmem:[#allocation50_spill] sm:$0xff]  ;;  %v9165_v28 = vld [vmem:[#allocation51_spill] sm:$0xff] }
 0x50f   :  { %3665 = vmatprep.subr.bf16.mxu0 %v9155_v60  ;;  %3706 = vmatprep.subr.bf16.mxu1 %v9156_v29  ;;  %v9166_v60 = vld [vmem:[#allocation52_spill] sm:$0xff]  ;;  %v9167_v29 = vld [vmem:[#allocation53_spill] sm:$0xff] }
 0x512   :  { %3666 = vmatpush1.bf16.msra.mxu0 %v9157_v30  ;;  %3707 = vmatpush1.bf16.msra.mxu1 %v9158_v32  ;;  %v9168_v30 = vld [vmem:[#allocation54_spill] sm:$0xff]  ;;  %v9169_v32 = vld [vmem:[#allocation55_spill] sm:$0xff] }
 0x513   :  { %3667 = vmatprep.subr.bf16.mxu0 %v9159_v38  ;;  %3708 = vmatprep.subr.bf16.mxu1 %v9160_v16  ;;  %v9170_v38 = vld [vmem:[#allocation56_spill] sm:$0xff]  ;;  %v9171_v16 = vld [vmem:[#allocation57_spill] sm:$0xff] }
 0x516   :  { %3668 = vmatpush1.bf16.msra.mxu0 %v9161_v46  ;;  %3709 = vmatpush1.bf16.msra.mxu1 %v9162_v10  ;;  %v9172_v46 = vld [vmem:[#allocation58_spill] sm:$0xff]  ;;  %v9173_v10 = vld [vmem:[#allocation59_spill] sm:$0xff] }
 0x517   :  { %3669 = vmatprep.subr.bf16.mxu0 %v9163_v5  ;;  %3710 = vmatprep.subr.bf16.mxu1 %v9164_v58  ;;  %v9174_v5 = vld [vmem:[#allocation60_spill] sm:$0xff]  ;;  %v9175_v58 = vld [vmem:[#allocation61_spill] sm:$0xff] }
 0x51a   :  { %3670 = vmatpush1.bf16.msra.mxu0 %v9165_v28  ;;  %3711 = vmatpush1.bf16.msra.mxu1 %v9166_v60  ;;  %v9176_v28 = vld [vmem:[#allocation62_spill] sm:$0xff]  ;;  %v9177_v60 = vld [vmem:[#allocation63_spill] sm:$0xff] }
 0x51b   :  { %3671 = vmatprep.subr.bf16.mxu0 %v9167_v29  ;;  %3712 = vmatprep.subr.bf16.mxu1 %v9168_v30  ;;  %v9178_v29 = vld [vmem:[#allocation64_spill] sm:$0xff]  ;;  %v9179_v30 = vld [vmem:[#allocation65_spill] sm:$0xff] }
 0x51e   :  { %3672 = vmatpush1.bf16.msra.mxu0 %v9169_v32  ;;  %3713 = vmatpush1.bf16.msra.mxu1 %v9170_v38  ;;  %v9180_v32 = vld [vmem:[#allocation66_spill] sm:$0xff]  ;;  %v9181_v38 = vld [vmem:[#allocation67_spill] sm:$0xff] }
 0x51f   :  { %3673 = vmatprep.subr.bf16.mxu0 %v9171_v16  ;;  %3714 = vmatprep.subr.bf16.mxu1 %v9172_v46  ;;  %v9182_v16 = vld [vmem:[#allocation68_spill] sm:$0xff]  ;;  %v9183_v46 = vld [vmem:[#allocation69_spill] sm:$0xff] }
 0x522   :  { %3674 = vmatpush1.bf16.msra.mxu0 %v9173_v10  ;;  %3715 = vmatpush1.bf16.msra.mxu1 %v9174_v5  ;;  %v9184_v10 = vld [vmem:[#allocation70_spill] sm:$0xff] }
 0x523   :  { %3675 = vmatprep.subr.bf16.mxu0 %v9175_v58  ;;  %3716 = vmatprep.subr.bf16.mxu1 %v9176_v28 }
 0x526   :  { %3676 = vmatpush1.bf16.msra.mxu0 %v9177_v60  ;;  %3717 = vmatpush1.bf16.msra.mxu1 %v9178_v29 }
 0x527   :  { %3677 = vmatprep.subr.bf16.mxu0 %v9179_v30  ;;  %3718 = vmatprep.subr.bf16.mxu1 %v9180_v32 }
 0x52a   :  { %3678 = vmatpush1.bf16.msra.mxu0 %v9181_v38  ;;  %3719 = vmatpush1.bf16.msra.mxu1 %v9182_v16 }
 0x52b   :  { %3729 = vmatprep.subr.bf16.mxu0 %v9183_v46  ;;  %3770 = vmatprep.subr.bf16.mxu1 %v9184_v10 }
 0x580   :  { %v3454_v5 = vpop.f32.mrb[56].mxu0  ;;  %v3495_v58 = vpop.f32.mrb[56].mxu1 }
 0x581   :  { %v3584_v28 = vadd.f32 %v9185_v6, %v3454_v5  ;;  %v3586_v60 = vadd.f32 %v9186_v57, %v3495_v58  ;;  %v3456_v49 = vpop.f32.mrb[57].mxu0  ;;  %v3497_v29 = vpop.f32.mrb[57].mxu1 }
 0x582   :  { %v3585_v30 = vadd.f32 %v9187_v45, %v3456_v49  ;;  %v3587_v32 = vadd.f32 %v9188_v44, %v3497_v29  ;;  %v3458_v48 = vpop.f32.mrb[58].mxu0  ;;  %v3499_v38 = vpop.f32.mrb[58].mxu1 }
 0x583   :  { %v3459_v27 = vpop.f32.mrb[59].mxu0  ;;  %v3500_v16 = vpop.f32.mrb[59].mxu1  ;;  %v3592_v39 = vsub.f32 0.0, %v3584_v28  ;;  %v3602_v46 = vsub.f32 0.0, %v3586_v60 }
 0x584   :  { %v3593_v26 = vsub.f32 0.0, %v3585_v30  ;;  %v3603_v10 = vsub.f32 0.0, %v3587_v32  ;;  %v9192_v30 = vld [vmem:[#allocation176_spill] sm:$0xff] }
 0x585   :  { %v3594_v56 = vmul.f32 1.442695, %v3592_v39  ;;  %v3604_v3 = vmul.f32 1.442695, %v3602_v46  ;;  %v9189_v39 = vld [vmem:[#allocation173_spill] sm:$0xff]  ;;  %v9190_v46 = vld [vmem:[#allocation174_spill] sm:$0xff] }
 0x586   :  { %v3596_v41 = vmul.f32 1.442695, %v3593_v26  ;;  %v3606_v6 = vmul.f32 1.442695, %v3603_v10  ;;  %v9191_v10 = vld [vmem:[#allocation175_spill] sm:$0xff] }
 0x587   :  { %5372 = vpow2.f32 %v3594_v56 }
 0x588   :  { %5374 = vpow2.f32 %v3604_v3 }
 0x589   :  { %5376 = vpow2.f32 %v3596_v41 }
 0x58a   :  { %5378 = vpow2.f32 %v3606_v6 }
 0x591   :  { %v5373_v57 = vpop.eup %5372 }
 0x592   :  { %v5375_v45 = vpop.eup %5374  ;;  %v3598_v48 = vadd.f32 1.0, %v5373_v57 }
 0x593   :  { %v5377_v49 = vpop.eup %5376  ;;  %v3608_v5 = vadd.f32 1.0, %v5375_v45 }
 0x594   :  { %v5379_v44 = vpop.eup %5378  ;;  %v3599_v27 = vadd.f32 1.0, %v5377_v49  ;;  %5380 = vrcp.f32 %v3598_v48 }
 0x595   :  { %v3609_v16 = vadd.f32 1.0, %v5379_v44  ;;  %5382 = vrcp.f32 %v3608_v5 }
 0x596   :  { %5384 = vrcp.f32 %v3599_v27 }
 0x597   :  { %5386 = vrcp.f32 %v3609_v16 }
 0x59e   :  { %v5381_v5 = vpop.eup %5380 }
 0x59f   :  { %v5383_v27 = vpop.eup %5382 }
 0x5c0   :  { %v3536_v28 = vpop.f32.mrb[60].mxu0  ;;  %v3577_v60 = vpop.f32.mrb[60].mxu1 }
 0x5c1   :  { %v3588_v26 = vadd.f32 %v9189_v39, %v3536_v28  ;;  %v3590_v56 = vadd.f32 %v9190_v46, %v3577_v60  ;;  %v3538_v3 = vpop.f32.mrb[61].mxu0  ;;  %v3579_v41 = vpop.f32.mrb[61].mxu1  ;;  %v3624_v46 = vmul.f32 %v5383_v27, %v7654_v53  ;;  %v9195_v27 = vld [vmem:[#allocation112_spill] sm:$0xff] }
 0x5c2   :  { %v3589_v29 = vadd.f32 %v9191_v10, %v3538_v3  ;;  %v3591_v32 = vadd.f32 %v9192_v30, %v3579_v41  ;;  %v3540_v38 = vpop.f32.mrb[62].mxu0  ;;  %v3581_v58 = vpop.f32.mrb[62].mxu1 }
 0x5c3   :  { %5388 = vtanh.f32 %v3588_v26  ;;  %v3614_v6 = vsub.f32 0.0, %v3590_v56  ;;  %v3541_v57 = vpop.f32.mrb[63].mxu0  ;;  %v3582_v45 = vpop.f32.mrb[63].mxu1 }
 0x5c4   :  { %5390 = vtanh.f32 %v3589_v29  ;;  %v3615_v49 = vsub.f32 0.0, %v3591_v32  ;;  %v5385_v28 = vpop.eup %5384 }
 0x5c5   :  { %v3616_v44 = vmul.f32 1.442695, %v3614_v6  ;;  %v5387_v16 = vpop.eup %5386 }
 0x5c6   :  { %v3618_v48 = vmul.f32 1.442695, %v3615_v49  ;;  %v3625_v26 = vmul.f32 %v5387_v16, %v7656_v18  ;;  %v9197_v16 = vld [vmem:[#allocation114_spill] sm:$0xff] }
 0x5c7   :  { %5392 = vpow2.f32 %v3616_v44 }
 0x5c8   :  { %5394 = vpow2.f32 %v3618_v48  ;;  %v9193_v48 = vld [vmem:[#allocation110_spill] sm:$0xff] }
 0x5cd   :  { %v5389_v60 = vpop.eup %5388 }
 0x5ce   :  { %v5391_v39 = vpop.eup %5390  ;;  %v3626_v3 = vmul.f32 %v5389_v60, %v5381_v5  ;;  %v9194_v5 = vld [vmem:[#allocation111_spill] sm:$0xff] }
 0x5cf   :  { %v3627_v56 = vmul.f32 %v5391_v39, %v5385_v28  ;;  %v9196_v28 = vld [vmem:[#allocation113_spill] sm:$0xff]  ;;  %v9198_v60 = vld [vmem:[#allocation115_spill] sm:$0xff]  ;;  %v9199_v39 = vld [vmem:[#allocation116_spill] sm:$0xff] }
 0x5d0   :  { %v7804_v41 = vadd.f32 %v3626_v3, %v3624_v46  ;;  %v9200_v46 = vld [vmem:[#allocation117_spill] sm:$0xff]  ;;  %v9201_v3 = vld [vmem:[#allocation118_spill] sm:$0xff] }
 0x5d1   :  { %v5393_v10 = vpop.eup %5392  ;;  %v7806_v29 = vadd.f32 %v3627_v56, %v3625_v26  ;;  %v9202_v26 = vld [vmem:[#allocation120_spill] sm:$0xff]  ;;  %v9203_v56 = vld [vmem:[#allocation121_spill] sm:$0xff] }
 0x5d2   :  { %v5395_v30 = vpop.eup %5394  ;;  %5396 = vtanh.f32 %v7804_v41  ;;  %v3620_v32 = vadd.f32 1.0, %v5393_v10  ;;  %v9204_v10 = vld [vmem:[#allocation122_spill] sm:$0xff] }
 0x5d3   :  { %5398 = vtanh.f32 %v7806_v29  ;;  %v3621_v38 = vadd.f32 1.0, %v5395_v30  ;;  %v9205_v30 = vld [vmem:[#allocation123_spill] sm:$0xff] }
 0x5d4   :  { %5400 = vrcp.f32 %v3620_v32  ;;  %v9206_v32 = vld [vmem:[#allocation124_spill] sm:$0xff] }
 0x5d5   :  { %5402 = vrcp.f32 %v3621_v38  ;;  %v9207_v38 = vld [vmem:[#allocation125_spill] sm:$0xff] }
 0x5dc   :  { %v5397_v58 = vpop.eup %5396 }
 0x5dd   :  { %v5399_v53 = vpop.eup %5398 }
 0x5de   :  { %v5401_v6 = vpop.eup %5400 }
 0x5df   :  { %v5403_v57 = vpop.eup %5402  ;;  %v3632_v18 = vmul.f32 %v5401_v6, %v5397_v58  ;;  %v9208_v58 = vld [vmem:[#allocation126_spill] sm:$0xff]  ;;  %v9210_v6 = vld [vmem:[#allocation132_spill] sm:$0xff] }
 0x5e0   :  { %v3633_v45 = vmul.f32 %v5403_v57, %v5399_v53  ;;  %v9209_v53 = vld [vmem:[#allocation128_spill] sm:$0xff]  ;;  %v9211_v57 = vld [vmem:[#allocation134_spill] sm:$0xff] }
 0x5e1   :  { %v7810_v44 = vpack.c.bf16 %v3632_v18, %v3632_v18  ;;  %v9212_v18 = vld [vmem:[#allocation135_spill] sm:$0xff] }
 0x5e2   :  { %v3646_v49 = vpack.c.bf16 %v3633_v45, %v3633_v45  ;;  %v9213_v45 = vld [vmem:[#allocation138_spill] sm:$0xff] }
 0x5e4   :  { %3679 = vmatprep.mubr.bf16.mxu0 %v3646_v49  ;;  %3720 = vmatprep.mubr.bf16.mxu1 %v3646_v49 }
 0x5e5   :  { %3680 = vmatmul.mubr.bf16.vlgmr.msra.gmra.mrb[64].mxu0 %v7810_v44  ;;  %3721 = vmatmul.mubr.bf16.vlgmr.msra.gmra.mrb[64].mxu1 %v7810_v44 }
 0x5e6   :  { %3730 = vmatpush1.bf16.msra.mxu0 %v8893_v34  ;;  %3771 = vmatpush1.bf16.msra.mxu1 %v8894_v0 }
 0x5e7   :  { %3761 = vmatprep.mubr.bf16.mxu0 %v3646_v49  ;;  %3802 = vmatprep.mubr.bf16.mxu1 %v3646_v49  ;;  %v9214_v49 = vld [vmem:[#allocation140_spill] sm:$0xff] }
 0x5e8   :  { %3731 = vmatprep.subr.bf16.mxu0 %v8895_v9  ;;  %3772 = vmatprep.subr.bf16.mxu1 %v8896_v36 }
 0x5ea   :  { %3732 = vmatpush1.bf16.msra.mxu0 %v8897_v43  ;;  %3773 = vmatpush1.bf16.msra.mxu1 %v8898_v11 }
 0x5eb   :  { %3733 = vmatprep.subr.bf16.mxu0 %v8899_v47  ;;  %3774 = vmatprep.subr.bf16.mxu1 %v8900_v42 }
 0x5ee   :  { %3734 = vmatpush1.bf16.msra.mxu0 %v8901_v20  ;;  %3775 = vmatpush1.bf16.msra.mxu1 %v8902_v19 }
 0x5ef   :  { %3735 = vmatprep.subr.bf16.mxu0 %v8903_v40  ;;  %3776 = vmatprep.subr.bf16.mxu1 %v8904_v2 }
 0x5f2   :  { %3736 = vmatpush1.bf16.msra.mxu0 %v8905_v33  ;;  %3777 = vmatpush1.bf16.msra.mxu1 %v8906_v50 }
 0x5f3   :  { %3737 = vmatprep.subr.bf16.mxu0 %v8907_v37  ;;  %3778 = vmatprep.subr.bf16.mxu1 %v8908_v8 }
 0x5f6   :  { %3738 = vmatpush1.bf16.msra.mxu0 %v8909_v51  ;;  %3779 = vmatpush1.bf16.msra.mxu1 %v8910_v15 }
 0x5f7   :  { %3739 = vmatprep.subr.bf16.mxu0 %v8911_v4  ;;  %3780 = vmatprep.subr.bf16.mxu1 %v8912_v1 }
 0x5fa   :  { %3740 = vmatpush1.bf16.msra.mxu0 %v8999_v63  ;;  %3781 = vmatpush1.bf16.msra.mxu1 %v9000_v12 }
 0x5fb   :  { %3741 = vmatprep.subr.bf16.mxu0 %v9001_v62  ;;  %3782 = vmatprep.subr.bf16.mxu1 %v9002_v14 }
 0x5fe   :  { %3742 = vmatpush1.bf16.msra.mxu0 %v9003_v13  ;;  %3783 = vmatpush1.bf16.msra.mxu1 %v9004_v23 }
 0x5ff   :  { %3743 = vmatprep.subr.bf16.mxu0 %v9005_v61  ;;  %3784 = vmatprep.subr.bf16.mxu1 %v9006_v24 }
 0x602   :  { %3744 = vmatpush1.bf16.msra.mxu0 %v9007_v52  ;;  %3785 = vmatpush1.bf16.msra.mxu1 %v9008_v59 }
 0x603   :  { %3745 = vmatprep.subr.bf16.mxu0 %v9009_v54  ;;  %3786 = vmatprep.subr.bf16.mxu1 %v9010_v25 }
 0x606   :  { %3746 = vmatpush1.bf16.msra.mxu0 %v9011_v35  ;;  %3787 = vmatpush1.bf16.msra.mxu1 %v9012_v31 }
 0x607   :  { %3747 = vmatprep.subr.bf16.mxu0 %v9013_v22  ;;  %3788 = vmatprep.subr.bf16.mxu1 %v9014_v21 }
 0x60a   :  { %3748 = vmatpush1.bf16.msra.mxu0 %v9015_v55  ;;  %3789 = vmatpush1.bf16.msra.mxu1 %v9016_v17 }
 0x60b   :  { %3749 = vmatprep.subr.bf16.mxu0 %v9017_v7  ;;  %3790 = vmatprep.subr.bf16.mxu1 %v9193_v48 }
 0x60e   :  { %3750 = vmatpush1.bf16.msra.mxu0 %v9194_v5  ;;  %3791 = vmatpush1.bf16.msra.mxu1 %v9195_v27 }
 0x60f   :  { %3751 = vmatprep.subr.bf16.mxu0 %v9196_v28  ;;  %3792 = vmatprep.subr.bf16.mxu1 %v9197_v16 }
 0x612   :  { %3752 = vmatpush1.bf16.msra.mxu0 %v9198_v60  ;;  %3793 = vmatpush1.bf16.msra.mxu1 %v9199_v39 }
 0x613   :  { %3753 = vmatprep.subr.bf16.mxu0 %v9200_v46  ;;  %3794 = vmatprep.subr.bf16.mxu1 %v9201_v3  ;;  %v9284_v3 = vld [vmem:[#allocation152_spill] sm:$0xff]  ;;  %v9285_v46 = vld [vmem:[#allocation153_spill] sm:$0xff] }
 0x616   :  { %3754 = vmatpush1.bf16.msra.mxu0 %v9202_v26  ;;  %3795 = vmatpush1.bf16.msra.mxu1 %v9203_v56  ;;  %v9283_v56 = vld [vmem:[#allocation151_spill] sm:$0xff] }
 0x617   :  { %3755 = vmatprep.subr.bf16.mxu0 %v9204_v10  ;;  %3796 = vmatprep.subr.bf16.mxu1 %v9205_v30  ;;  %v9215_v10 = vld [vmem:[#allocation141_spill] sm:$0xff] }
 0x618   :  { %v9216_v30 = vld [vmem:[#allocation5_spill] sm:$0xff] }
 0x61a   :  { %3756 = vmatpush1.bf16.msra.mxu0 %v9206_v32  ;;  %3797 = vmatpush1.bf16.msra.mxu1 %v9207_v38  ;;  %v9217_v32 = vld [vmem:[#allocation6_spill] sm:$0xff] }
 0x61b   :  { %3757 = vmatprep.subr.bf16.mxu0 %v9208_v58  ;;  %3798 = vmatprep.subr.bf16.mxu1 %v9209_v53  ;;  %v9218_v53 = vld [vmem:[#allocation7_spill] sm:$0xff]  ;;  %v9227_v58 = vld [vmem:[#allocation16_spill] sm:$0xff]  ;;  %v9282_v38 = vld [vmem:[#allocation150_spill] sm:$0xff] }
 0x61e   :  { %3758 = vmatpush1.bf16.msra.mxu0 %v9210_v6  ;;  %3799 = vmatpush1.bf16.msra.mxu1 %v9211_v57  ;;  %v9219_v6 = vld [vmem:[#allocation8_spill] sm:$0xff]  ;;  %v9220_v57 = vld [vmem:[#allocation9_spill] sm:$0xff] }
 0x61f   :  { %3759 = vmatprep.subr.bf16.mxu0 %v9212_v18  ;;  %3800 = vmatprep.subr.bf16.mxu1 %v9213_v45  ;;  %v9221_v18 = vld [vmem:[#allocation10_spill] sm:$0xff]  ;;  %v9222_v45 = vld [vmem:[#allocation11_spill] sm:$0xff] }
 0x622   :  { %3760 = vmatpush1.bf16.msra.mxu0 %v9214_v49  ;;  %3801 = vmatpush1.bf16.msra.mxu1 %v9215_v10  ;;  %v9223_v49 = vld [vmem:[#allocation12_spill] sm:$0xff]  ;;  %v9224_v10 = vld [vmem:[#allocation13_spill] sm:$0xff] }
 0x623   :  { %3874 = vmatprep.subr.bf16.mxu0 %v9216_v30  ;;  %3915 = vmatprep.subr.bf16.mxu1 %v9217_v32  ;;  %v9225_v30 = vld [vmem:[#allocation14_spill] sm:$0xff]  ;;  %v9226_v32 = vld [vmem:[#allocation15_spill] sm:$0xff] }
 0x625   :  { %3762 = vmatmul.mubr.bf16.vlgmr.msra.gmra.mrb[68].mxu0 %v7810_v44  ;;  %3803 = vmatmul.mubr.bf16.vlgmr.msra.gmra.mrb[68].mxu1 %v7810_v44  ;;  %v9228_v44 = vld [vmem:[#allocation17_spill] sm:$0xff] }
 0x626   :  { %3875 = vmatpush1.bf16.msra.mxu0 %v9218_v53  ;;  %3916 = vmatpush1.bf16.msra.mxu1 %v9219_v6  ;;  %v9229_v53 = vld [vmem:[#allocation18_spill] sm:$0xff]  ;;  %v9230_v6 = vld [vmem:[#allocation19_spill] sm:$0xff] }
 0x627   :  { %3876 = vmatprep.subr.bf16.mxu0 %v9220_v57  ;;  %3917 = vmatprep.subr.bf16.mxu1 %v9221_v18  ;;  %v9231_v57 = vld [vmem:[#allocation20_spill] sm:$0xff]  ;;  %v9232_v18 = vld [vmem:[#allocation21_spill] sm:$0xff] }
 0x62a   :  { %3877 = vmatpush1.bf16.msra.mxu0 %v9222_v45  ;;  %3918 = vmatpush1.bf16.msra.mxu1 %v9223_v49  ;;  %v9233_v45 = vld [vmem:[#allocation22_spill] sm:$0xff]  ;;  %v9234_v49 = vld [vmem:[#allocation23_spill] sm:$0xff] }
 0x62b   :  { %3878 = vmatprep.subr.bf16.mxu0 %v9224_v10  ;;  %3919 = vmatprep.subr.bf16.mxu1 %v9225_v30  ;;  %v9235_v10 = vld [vmem:[#allocation24_spill] sm:$0xff]  ;;  %v9236_v30 = vld [vmem:[#allocation25_spill] sm:$0xff] }
 0x62e   :  { %3879 = vmatpush1.bf16.msra.mxu0 %v9226_v32  ;;  %3920 = vmatpush1.bf16.msra.mxu1 %v9227_v58  ;;  %v9237_v32 = vld [vmem:[#allocation26_spill] sm:$0xff]  ;;  %v9238_v58 = vld [vmem:[#allocation27_spill] sm:$0xff] }
 0x62f   :  { %3880 = vmatprep.subr.bf16.mxu0 %v9228_v44  ;;  %3921 = vmatprep.subr.bf16.mxu1 %v9229_v53  ;;  %v9239_v44 = vld [vmem:[#allocation28_spill] sm:$0xff]  ;;  %v9240_v53 = vld [vmem:[#allocation29_spill] sm:$0xff] }
 0x632   :  { %3881 = vmatpush1.bf16.msra.mxu0 %v9230_v6  ;;  %3922 = vmatpush1.bf16.msra.mxu1 %v9231_v57  ;;  %v9241_v6 = vld [vmem:[#allocation30_spill] sm:$0xff]  ;;  %v9242_v57 = vld [vmem:[#allocation31_spill] sm:$0xff] }
 0x633   :  { %3882 = vmatprep.subr.bf16.mxu0 %v9232_v18  ;;  %3923 = vmatprep.subr.bf16.mxu1 %v9233_v45  ;;  %v9243_v18 = vld [vmem:[#allocation32_spill] sm:$0xff]  ;;  %v9244_v45 = vld [vmem:[#allocation33_spill] sm:$0xff] }
 0x636   :  { %3883 = vmatpush1.bf16.msra.mxu0 %v9234_v49  ;;  %3924 = vmatpush1.bf16.msra.mxu1 %v9235_v10  ;;  %v9245_v49 = vld [vmem:[#allocation34_spill] sm:$0xff]  ;;  %v9246_v10 = vld [vmem:[#allocation35_spill] sm:$0xff] }
 0x637   :  { %3884 = vmatprep.subr.bf16.mxu0 %v9236_v30  ;;  %3925 = vmatprep.subr.bf16.mxu1 %v9237_v32  ;;  %v9247_v30 = vld [vmem:[#allocation36_spill] sm:$0xff]  ;;  %v9248_v32 = vld [vmem:[#allocation37_spill] sm:$0xff] }
 0x63a   :  { %3885 = vmatpush1.bf16.msra.mxu0 %v9238_v58  ;;  %3926 = vmatpush1.bf16.msra.mxu1 %v9239_v44  ;;  %v9249_v58 = vld [vmem:[#allocation38_spill] sm:$0xff]  ;;  %v9250_v44 = vld [vmem:[#allocation39_spill] sm:$0xff] }
 0x63b   :  { %3886 = vmatprep.subr.bf16.mxu0 %v9240_v53  ;;  %3927 = vmatprep.subr.bf16.mxu1 %v9241_v6  ;;  %v9251_v53 = vld [vmem:[#allocation40_spill] sm:$0xff]  ;;  %v9252_v6 = vld [vmem:[#allocation41_spill] sm:$0xff] }
 0x63e   :  { %3887 = vmatpush1.bf16.msra.mxu0 %v9242_v57  ;;  %3928 = vmatpush1.bf16.msra.mxu1 %v9243_v18  ;;  %v9253_v57 = vld [vmem:[#allocation42_spill] sm:$0xff]  ;;  %v9254_v18 = vld [vmem:[#allocation43_spill] sm:$0xff] }
 0x63f   :  { %3888 = vmatprep.subr.bf16.mxu0 %v9244_v45  ;;  %3929 = vmatprep.subr.bf16.mxu1 %v9245_v49  ;;  %v9255_v45 = vld [vmem:[#allocation44_spill] sm:$0xff]  ;;  %v9256_v49 = vld [vmem:[#allocation45_spill] sm:$0xff] }
 0x642   :  { %3889 = vmatpush1.bf16.msra.mxu0 %v9246_v10  ;;  %3930 = vmatpush1.bf16.msra.mxu1 %v9247_v30  ;;  %v9257_v10 = vld [vmem:[#allocation46_spill] sm:$0xff]  ;;  %v9258_v30 = vld [vmem:[#allocation47_spill] sm:$0xff] }
 0x643   :  { %3890 = vmatprep.subr.bf16.mxu0 %v9248_v32  ;;  %3931 = vmatprep.subr.bf16.mxu1 %v9249_v58  ;;  %v9259_v32 = vld [vmem:[#allocation48_spill] sm:$0xff]  ;;  %v9260_v58 = vld [vmem:[#allocation49_spill] sm:$0xff] }
 0x646   :  { %3891 = vmatpush1.bf16.msra.mxu0 %v9250_v44  ;;  %3932 = vmatpush1.bf16.msra.mxu1 %v9251_v53  ;;  %v9261_v44 = vld [vmem:[#allocation50_spill] sm:$0xff]  ;;  %v9262_v53 = vld [vmem:[#allocation51_spill] sm:$0xff] }
 0x647   :  { %3892 = vmatprep.subr.bf16.mxu0 %v9252_v6  ;;  %3933 = vmatprep.subr.bf16.mxu1 %v9253_v57  ;;  %v9263_v6 = vld [vmem:[#allocation52_spill] sm:$0xff]  ;;  %v9264_v57 = vld [vmem:[#allocation53_spill] sm:$0xff] }
 0x64a   :  { %3893 = vmatpush1.bf16.msra.mxu0 %v9254_v18  ;;  %3934 = vmatpush1.bf16.msra.mxu1 %v9255_v45  ;;  %v9265_v18 = vld [vmem:[#allocation54_spill] sm:$0xff]  ;;  %v9266_v45 = vld [vmem:[#allocation55_spill] sm:$0xff] }
 0x64b   :  { %3894 = vmatprep.subr.bf16.mxu0 %v9256_v49  ;;  %3935 = vmatprep.subr.bf16.mxu1 %v9257_v10  ;;  %v9267_v49 = vld [vmem:[#allocation56_spill] sm:$0xff]  ;;  %v9268_v10 = vld [vmem:[#allocation57_spill] sm:$0xff] }
 0x64e   :  { %3895 = vmatpush1.bf16.msra.mxu0 %v9258_v30  ;;  %3936 = vmatpush1.bf16.msra.mxu1 %v9259_v32  ;;  %v9269_v30 = vld [vmem:[#allocation58_spill] sm:$0xff]  ;;  %v9270_v32 = vld [vmem:[#allocation59_spill] sm:$0xff] }
 0x64f   :  { %3896 = vmatprep.subr.bf16.mxu0 %v9260_v58  ;;  %3937 = vmatprep.subr.bf16.mxu1 %v9261_v44  ;;  %v9271_v58 = vld [vmem:[#allocation60_spill] sm:$0xff]  ;;  %v9272_v44 = vld [vmem:[#allocation61_spill] sm:$0xff] }
 0x652   :  { %3897 = vmatpush1.bf16.msra.mxu0 %v9262_v53  ;;  %3938 = vmatpush1.bf16.msra.mxu1 %v9263_v6  ;;  %v9273_v53 = vld [vmem:[#allocation62_spill] sm:$0xff]  ;;  %v9274_v6 = vld [vmem:[#allocation63_spill] sm:$0xff] }
 0x653   :  { %3898 = vmatprep.subr.bf16.mxu0 %v9264_v57  ;;  %3939 = vmatprep.subr.bf16.mxu1 %v9265_v18  ;;  %v9275_v57 = vld [vmem:[#allocation64_spill] sm:$0xff]  ;;  %v9276_v18 = vld [vmem:[#allocation65_spill] sm:$0xff] }
 0x656   :  { %3899 = vmatpush1.bf16.msra.mxu0 %v9266_v45  ;;  %3940 = vmatpush1.bf16.msra.mxu1 %v9267_v49  ;;  %v9277_v45 = vld [vmem:[#allocation66_spill] sm:$0xff]  ;;  %v9278_v49 = vld [vmem:[#allocation67_spill] sm:$0xff] }
 0x657   :  { %3900 = vmatprep.subr.bf16.mxu0 %v9268_v10  ;;  %3941 = vmatprep.subr.bf16.mxu1 %v9269_v30  ;;  %v9279_v10 = vld [vmem:[#allocation68_spill] sm:$0xff]  ;;  %v9280_v30 = vld [vmem:[#allocation69_spill] sm:$0xff] }
 0x65a   :  { %3901 = vmatpush1.bf16.msra.mxu0 %v9270_v32  ;;  %3942 = vmatpush1.bf16.msra.mxu1 %v9271_v58  ;;  %v9281_v32 = vld [vmem:[#allocation70_spill] sm:$0xff] }
 0x65b   :  { %3902 = vmatprep.subr.bf16.mxu0 %v9272_v44  ;;  %3943 = vmatprep.subr.bf16.mxu1 %v9273_v53 }
 0x65e   :  { %3903 = vmatpush1.bf16.msra.mxu0 %v9274_v6  ;;  %3944 = vmatpush1.bf16.msra.mxu1 %v9275_v57 }
 0x65f   :  { %3904 = vmatprep.subr.bf16.mxu0 %v9276_v18  ;;  %3945 = vmatprep.subr.bf16.mxu1 %v9277_v45 }
 0x662   :  { %3905 = vmatpush1.bf16.msra.mxu0 %v9278_v49  ;;  %3946 = vmatpush1.bf16.msra.mxu1 %v9279_v10 }
 0x663   :  { %3956 = vmatprep.subr.bf16.mxu0 %v9280_v30  ;;  %3997 = vmatprep.subr.bf16.mxu1 %v9281_v32 }
 0x6b8   :  { %v3681_v58 = vpop.f32.mrb[64].mxu0  ;;  %v3722_v44 = vpop.f32.mrb[64].mxu1 }
 0x6b9   :  { %v3811_v53 = vadd.f32 %v9282_v38, %v3681_v58  ;;  %v3813_v6 = vadd.f32 %v9283_v56, %v3722_v44  ;;  %v3683_v26 = vpop.f32.mrb[65].mxu0  ;;  %v3724_v57 = vpop.f32.mrb[65].mxu1 }
 0x6ba   :  { %v3812_v18 = vadd.f32 %v9284_v3, %v3683_v26  ;;  %v3814_v45 = vadd.f32 %v9285_v46, %v3724_v57  ;;  %v3685_v39 = vpop.f32.mrb[66].mxu0  ;;  %v3726_v49 = vpop.f32.mrb[66].mxu1 }
 0x6bb   :  { %v3686_v60 = vpop.f32.mrb[67].mxu0  ;;  %v3727_v10 = vpop.f32.mrb[67].mxu1  ;;  %v3819_v16 = vsub.f32 0.0, %v3811_v53  ;;  %v3829_v30 = vsub.f32 0.0, %v3813_v6 }
 0x6bc   :  { %v3820_v28 = vsub.f32 0.0, %v3812_v18  ;;  %v3830_v32 = vsub.f32 0.0, %v3814_v45  ;;  %v9289_v18 = vld [vmem:[#allocation180_spill] sm:$0xff] }
 0x6bd   :  { %v3821_v27 = vmul.f32 1.442695, %v3819_v16  ;;  %v3831_v5 = vmul.f32 1.442695, %v3829_v30  ;;  %v9286_v16 = vld [vmem:[#allocation177_spill] sm:$0xff]  ;;  %v9287_v30 = vld [vmem:[#allocation178_spill] sm:$0xff] }
 0x6be   :  { %v3823_v48 = vmul.f32 1.442695, %v3820_v28  ;;  %v3833_v38 = vmul.f32 1.442695, %v3830_v32  ;;  %v9288_v32 = vld [vmem:[#allocation179_spill] sm:$0xff] }
 0x6bf   :  { %5404 = vpow2.f32 %v3821_v27 }
 0x6c0   :  { %5406 = vpow2.f32 %v3831_v5 }
 0x6c1   :  { %5408 = vpow2.f32 %v3823_v48 }
 0x6c2   :  { %5410 = vpow2.f32 %v3833_v38 }
 0x6c9   :  { %v5405_v56 = vpop.eup %5404 }
 0x6ca   :  { %v5407_v3 = vpop.eup %5406  ;;  %v3825_v39 = vadd.f32 1.0, %v5405_v56 }
 0x6cb   :  { %v5409_v26 = vpop.eup %5408  ;;  %v3835_v58 = vadd.f32 1.0, %v5407_v3 }
 0x6cc   :  { %v5411_v46 = vpop.eup %5410  ;;  %v3826_v60 = vadd.f32 1.0, %v5409_v26  ;;  %5412 = vrcp.f32 %v3825_v39 }
 0x6cd   :  { %v3836_v10 = vadd.f32 1.0, %v5411_v46  ;;  %5414 = vrcp.f32 %v3835_v58 }
 0x6ce   :  { %5416 = vrcp.f32 %v3826_v60 }
 0x6cf   :  { %5418 = vrcp.f32 %v3836_v10 }
 0x6d6   :  { %v5413_v58 = vpop.eup %5412 }
 0x6d7   :  { %v5415_v60 = vpop.eup %5414 }
 0x6f8   :  { %v3763_v53 = vpop.f32.mrb[68].mxu0  ;;  %v3804_v6 = vpop.f32.mrb[68].mxu1 }
 0x6f9   :  { %v3815_v28 = vadd.f32 %v9286_v16, %v3763_v53  ;;  %v3817_v27 = vadd.f32 %v9287_v30, %v3804_v6  ;;  %v3765_v5 = vpop.f32.mrb[69].mxu0  ;;  %v3806_v48 = vpop.f32.mrb[69].mxu1  ;;  %v3851_v30 = vmul.f32 %v5415_v60, %v7804_v41  ;;  %v9292_v60 = vld [vmem:[#allocation112_spill] sm:$0xff] }
 0x6fa   :  { %v3816_v57 = vadd.f32 %v9288_v32, %v3765_v5  ;;  %v3818_v45 = vadd.f32 %v9289_v18, %v3806_v48  ;;  %v3767_v49 = vpop.f32.mrb[70].mxu0  ;;  %v3808_v44 = vpop.f32.mrb[70].mxu1 }
 0x6fb   :  { %5420 = vtanh.f32 %v3815_v28  ;;  %v3841_v38 = vsub.f32 0.0, %v3817_v27  ;;  %v3768_v56 = vpop.f32.mrb[71].mxu0  ;;  %v3809_v3 = vpop.f32.mrb[71].mxu1 }
 0x6fc   :  { %5422 = vtanh.f32 %v3816_v57  ;;  %v3842_v26 = vsub.f32 0.0, %v3818_v45  ;;  %v5417_v53 = vpop.eup %5416 }
 0x6fd   :  { %v3843_v46 = vmul.f32 1.442695, %v3841_v38  ;;  %v5419_v10 = vpop.eup %5418 }
 0x6fe   :  { %v3845_v39 = vmul.f32 1.442695, %v3842_v26  ;;  %v3852_v28 = vmul.f32 %v5419_v10, %v7806_v29  ;;  %v9294_v10 = vld [vmem:[#allocation114_spill] sm:$0xff] }
 0x6ff   :  { %5424 = vpow2.f32 %v3843_v46 }
 0x700   :  { %5426 = vpow2.f32 %v3845_v39  ;;  %v9290_v39 = vld [vmem:[#allocation110_spill] sm:$0xff] }
 0x705   :  { %v5421_v6 = vpop.eup %5420 }
 0x706   :  { %v5423_v16 = vpop.eup %5422  ;;  %v3853_v5 = vmul.f32 %v5421_v6, %v5413_v58  ;;  %v9291_v58 = vld [vmem:[#allocation111_spill] sm:$0xff] }
 0x707   :  { %v3854_v27 = vmul.f32 %v5423_v16, %v5417_v53  ;;  %v9293_v53 = vld [vmem:[#allocation113_spill] sm:$0xff]  ;;  %v9295_v6 = vld [vmem:[#allocation115_spill] sm:$0xff]  ;;  %v9296_v16 = vld [vmem:[#allocation116_spill] sm:$0xff] }
 0x708   :  { %v7954_v48 = vadd.f32 %v3853_v5, %v3851_v30  ;;  %v9297_v30 = vld [vmem:[#allocation117_spill] sm:$0xff]  ;;  %v9298_v5 = vld [vmem:[#allocation118_spill] sm:$0xff] }
 0x709   :  { %v5425_v32 = vpop.eup %5424  ;;  %v7956_v57 = vadd.f32 %v3854_v27, %v3852_v28  ;;  %v9299_v28 = vld [vmem:[#allocation120_spill] sm:$0xff]  ;;  %v9300_v27 = vld [vmem:[#allocation121_spill] sm:$0xff] }
 0x70a   :  { %v5427_v18 = vpop.eup %5426  ;;  %5428 = vtanh.f32 %v7954_v48  ;;  %v3847_v45 = vadd.f32 1.0, %v5425_v32  ;;  %v9301_v32 = vld [vmem:[#allocation122_spill] sm:$0xff] }
 0x70b   :  { %5430 = vtanh.f32 %v7956_v57  ;;  %v3848_v49 = vadd.f32 1.0, %v5427_v18  ;;  %v9302_v18 = vld [vmem:[#allocation123_spill] sm:$0xff] }
 0x70c   :  { %5432 = vrcp.f32 %v3847_v45  ;;  %v9303_v45 = vld [vmem:[#allocation124_spill] sm:$0xff] }
 0x70d   :  { %5434 = vrcp.f32 %v3848_v49  ;;  %v9304_v49 = vld [vmem:[#allocation125_spill] sm:$0xff] }
 0x714   :  { %v5429_v44 = vpop.eup %5428 }
 0x715   :  { %v5431_v41 = vpop.eup %5430 }
 0x716   :  { %v5433_v38 = vpop.eup %5432 }
 0x717   :  { %v5435_v56 = vpop.eup %5434  ;;  %v3859_v29 = vmul.f32 %v5433_v38, %v5429_v44  ;;  %v9305_v44 = vld [vmem:[#allocation126_spill] sm:$0xff]  ;;  %v9307_v38 = vld [vmem:[#allocation132_spill] sm:$0xff] }
 0x718   :  { %v3860_v3 = vmul.f32 %v5435_v56, %v5431_v41  ;;  %v9306_v41 = vld [vmem:[#allocation128_spill] sm:$0xff]  ;;  %v9308_v56 = vld [vmem:[#allocation134_spill] sm:$0xff] }
 0x719   :  { %v7960_v46 = vpack.c.bf16 %v3859_v29, %v3859_v29  ;;  %v9309_v29 = vld [vmem:[#allocation135_spill] sm:$0xff] }
 0x71a   :  { %v3873_v26 = vpack.c.bf16 %v3860_v3, %v3860_v3  ;;  %v9310_v3 = vld [vmem:[#allocation138_spill] sm:$0xff] }
 0x71c   :  { %3906 = vmatprep.mubr.bf16.mxu0 %v3873_v26  ;;  %3947 = vmatprep.mubr.bf16.mxu1 %v3873_v26 }
 0x71d   :  { %3907 = vmatmul.mubr.bf16.vlgmr.msra.gmra.mrb[72].mxu0 %v7960_v46  ;;  %3948 = vmatmul.mubr.bf16.vlgmr.msra.gmra.mrb[72].mxu1 %v7960_v46 }
 0x71e   :  { %3957 = vmatpush1.bf16.msra.mxu0 %v8893_v34  ;;  %3998 = vmatpush1.bf16.msra.mxu1 %v8894_v0 }
 0x71f   :  { %3988 = vmatprep.mubr.bf16.mxu0 %v3873_v26  ;;  %4029 = vmatprep.mubr.bf16.mxu1 %v3873_v26  ;;  %v9311_v26 = vld [vmem:[#allocation140_spill] sm:$0xff] }
 0x720   :  { %3958 = vmatprep.subr.bf16.mxu0 %v8895_v9  ;;  %3999 = vmatprep.subr.bf16.mxu1 %v8896_v36 }
 0x722   :  { %3959 = vmatpush1.bf16.msra.mxu0 %v8897_v43  ;;  %4000 = vmatpush1.bf16.msra.mxu1 %v8898_v11 }
 0x723   :  { %3960 = vmatprep.subr.bf16.mxu0 %v8899_v47  ;;  %4001 = vmatprep.subr.bf16.mxu1 %v8900_v42 }
 0x726   :  { %3961 = vmatpush1.bf16.msra.mxu0 %v8901_v20  ;;  %4002 = vmatpush1.bf16.msra.mxu1 %v8902_v19 }
 0x727   :  { %3962 = vmatprep.subr.bf16.mxu0 %v8903_v40  ;;  %4003 = vmatprep.subr.bf16.mxu1 %v8904_v2 }
 0x72a   :  { %3963 = vmatpush1.bf16.msra.mxu0 %v8905_v33  ;;  %4004 = vmatpush1.bf16.msra.mxu1 %v8906_v50 }
 0x72b   :  { %3964 = vmatprep.subr.bf16.mxu0 %v8907_v37  ;;  %4005 = vmatprep.subr.bf16.mxu1 %v8908_v8 }
 0x72e   :  { %3965 = vmatpush1.bf16.msra.mxu0 %v8909_v51  ;;  %4006 = vmatpush1.bf16.msra.mxu1 %v8910_v15 }
 0x72f   :  { %3966 = vmatprep.subr.bf16.mxu0 %v8911_v4  ;;  %4007 = vmatprep.subr.bf16.mxu1 %v8912_v1 }
 0x732   :  { %3967 = vmatpush1.bf16.msra.mxu0 %v8999_v63  ;;  %4008 = vmatpush1.bf16.msra.mxu1 %v9000_v12 }
 0x733   :  { %3968 = vmatprep.subr.bf16.mxu0 %v9001_v62  ;;  %4009 = vmatprep.subr.bf16.mxu1 %v9002_v14 }
 0x736   :  { %3969 = vmatpush1.bf16.msra.mxu0 %v9003_v13  ;;  %4010 = vmatpush1.bf16.msra.mxu1 %v9004_v23 }
 0x737   :  { %3970 = vmatprep.subr.bf16.mxu0 %v9005_v61  ;;  %4011 = vmatprep.subr.bf16.mxu1 %v9006_v24 }
 0x73a   :  { %3971 = vmatpush1.bf16.msra.mxu0 %v9007_v52  ;;  %4012 = vmatpush1.bf16.msra.mxu1 %v9008_v59 }
 0x73b   :  { %3972 = vmatprep.subr.bf16.mxu0 %v9009_v54  ;;  %4013 = vmatprep.subr.bf16.mxu1 %v9010_v25 }
 0x73e   :  { %3973 = vmatpush1.bf16.msra.mxu0 %v9011_v35  ;;  %4014 = vmatpush1.bf16.msra.mxu1 %v9012_v31 }
 0x73f   :  { %3974 = vmatprep.subr.bf16.mxu0 %v9013_v22  ;;  %4015 = vmatprep.subr.bf16.mxu1 %v9014_v21 }
 0x742   :  { %3975 = vmatpush1.bf16.msra.mxu0 %v9015_v55  ;;  %4016 = vmatpush1.bf16.msra.mxu1 %v9016_v17 }
 0x743   :  { %3976 = vmatprep.subr.bf16.mxu0 %v9017_v7  ;;  %4017 = vmatprep.subr.bf16.mxu1 %v9290_v39 }
 0x746   :  { %3977 = vmatpush1.bf16.msra.mxu0 %v9291_v58  ;;  %4018 = vmatpush1.bf16.msra.mxu1 %v9292_v60 }
 0x747   :  { %3978 = vmatprep.subr.bf16.mxu0 %v9293_v53  ;;  %4019 = vmatprep.subr.bf16.mxu1 %v9294_v10 }
 0x74a   :  { %3979 = vmatpush1.bf16.msra.mxu0 %v9295_v6  ;;  %4020 = vmatpush1.bf16.msra.mxu1 %v9296_v16 }
 0x74b   :  { %3980 = vmatprep.subr.bf16.mxu0 %v9297_v30  ;;  %4021 = vmatprep.subr.bf16.mxu1 %v9298_v5  ;;  %v9381_v5 = vld [vmem:[#allocation156_spill] sm:$0xff]  ;;  %v9382_v30 = vld [vmem:[#allocation157_spill] sm:$0xff] }
 0x74e   :  { %3981 = vmatpush1.bf16.msra.mxu0 %v9299_v28  ;;  %4022 = vmatpush1.bf16.msra.mxu1 %v9300_v27  ;;  %v9380_v27 = vld [vmem:[#allocation155_spill] sm:$0xff] }
 0x74f   :  { %3982 = vmatprep.subr.bf16.mxu0 %v9301_v32  ;;  %4023 = vmatprep.subr.bf16.mxu1 %v9302_v18  ;;  %v9312_v32 = vld [vmem:[#allocation141_spill] sm:$0xff] }
 0x750   :  { %v9313_v18 = vld [vmem:[#allocation5_spill] sm:$0xff] }
 0x752   :  { %3983 = vmatpush1.bf16.msra.mxu0 %v9303_v45  ;;  %4024 = vmatpush1.bf16.msra.mxu1 %v9304_v49  ;;  %v9314_v45 = vld [vmem:[#allocation6_spill] sm:$0xff] }
 0x753   :  { %3984 = vmatprep.subr.bf16.mxu0 %v9305_v44  ;;  %4025 = vmatprep.subr.bf16.mxu1 %v9306_v41  ;;  %v9315_v41 = vld [vmem:[#allocation7_spill] sm:$0xff]  ;;  %v9324_v44 = vld [vmem:[#allocation16_spill] sm:$0xff]  ;;  %v9379_v49 = vld [vmem:[#allocation154_spill] sm:$0xff] }
 0x756   :  { %3985 = vmatpush1.bf16.msra.mxu0 %v9307_v38  ;;  %4026 = vmatpush1.bf16.msra.mxu1 %v9308_v56  ;;  %v9316_v38 = vld [vmem:[#allocation8_spill] sm:$0xff]  ;;  %v9317_v56 = vld [vmem:[#allocation9_spill] sm:$0xff] }
 0x757   :  { %3986 = vmatprep.subr.bf16.mxu0 %v9309_v29  ;;  %4027 = vmatprep.subr.bf16.mxu1 %v9310_v3  ;;  %v9318_v29 = vld [vmem:[#allocation10_spill] sm:$0xff]  ;;  %v9319_v3 = vld [vmem:[#allocation11_spill] sm:$0xff] }
 0x75a   :  { %3987 = vmatpush1.bf16.msra.mxu0 %v9311_v26  ;;  %4028 = vmatpush1.bf16.msra.mxu1 %v9312_v32  ;;  %v9320_v26 = vld [vmem:[#allocation12_spill] sm:$0xff]  ;;  %v9321_v32 = vld [vmem:[#allocation13_spill] sm:$0xff] }
 0x75b   :  { %4101 = vmatprep.subr.bf16.mxu0 %v9313_v18  ;;  %4142 = vmatprep.subr.bf16.mxu1 %v9314_v45  ;;  %v9322_v18 = vld [vmem:[#allocation14_spill] sm:$0xff]  ;;  %v9323_v45 = vld [vmem:[#allocation15_spill] sm:$0xff] }
 0x75d   :  { %3989 = vmatmul.mubr.bf16.vlgmr.msra.gmra.mrb[76].mxu0 %v7960_v46  ;;  %4030 = vmatmul.mubr.bf16.vlgmr.msra.gmra.mrb[76].mxu1 %v7960_v46  ;;  %v9325_v46 = vld [vmem:[#allocation17_spill] sm:$0xff] }
 0x75e   :  { %4102 = vmatpush1.bf16.msra.mxu0 %v9315_v41  ;;  %4143 = vmatpush1.bf16.msra.mxu1 %v9316_v38  ;;  %v9326_v41 = vld [vmem:[#allocation18_spill] sm:$0xff]  ;;  %v9327_v38 = vld [vmem:[#allocation19_spill] sm:$0xff] }
 0x75f   :  { %4103 = vmatprep.subr.bf16.mxu0 %v9317_v56  ;;  %4144 = vmatprep.subr.bf16.mxu1 %v9318_v29  ;;  %v9328_v56 = vld [vmem:[#allocation20_spill] sm:$0xff]  ;;  %v9329_v29 = vld [vmem:[#allocation21_spill] sm:$0xff] }
 0x762   :  { %4104 = vmatpush1.bf16.msra.mxu0 %v9319_v3  ;;  %4145 = vmatpush1.bf16.msra.mxu1 %v9320_v26  ;;  %v9330_v3 = vld [vmem:[#allocation22_spill] sm:$0xff]  ;;  %v9331_v26 = vld [vmem:[#allocation23_spill] sm:$0xff] }
 0x763   :  { %4105 = vmatprep.subr.bf16.mxu0 %v9321_v32  ;;  %4146 = vmatprep.subr.bf16.mxu1 %v9322_v18  ;;  %v9332_v32 = vld [vmem:[#allocation24_spill] sm:$0xff]  ;;  %v9333_v18 = vld [vmem:[#allocation25_spill] sm:$0xff] }
 0x766   :  { %4106 = vmatpush1.bf16.msra.mxu0 %v9323_v45  ;;  %4147 = vmatpush1.bf16.msra.mxu1 %v9324_v44  ;;  %v9334_v45 = vld [vmem:[#allocation26_spill] sm:$0xff]  ;;  %v9335_v44 = vld [vmem:[#allocation27_spill] sm:$0xff] }
 0x767   :  { %4107 = vmatprep.subr.bf16.mxu0 %v9325_v46  ;;  %4148 = vmatprep.subr.bf16.mxu1 %v9326_v41  ;;  %v9336_v46 = vld [vmem:[#allocation28_spill] sm:$0xff]  ;;  %v9337_v41 = vld [vmem:[#allocation29_spill] sm:$0xff] }
 0x76a   :  { %4108 = vmatpush1.bf16.msra.mxu0 %v9327_v38  ;;  %4149 = vmatpush1.bf16.msra.mxu1 %v9328_v56  ;;  %v9338_v38 = vld [vmem:[#allocation30_spill] sm:$0xff]  ;;  %v9339_v56 = vld [vmem:[#allocation31_spill] sm:$0xff] }
 0x76b   :  { %4109 = vmatprep.subr.bf16.mxu0 %v9329_v29  ;;  %4150 = vmatprep.subr.bf16.mxu1 %v9330_v3  ;;  %v9340_v29 = vld [vmem:[#allocation32_spill] sm:$0xff]  ;;  %v9341_v3 = vld [vmem:[#allocation33_spill] sm:$0xff] }
 0x76e   :  { %4110 = vmatpush1.bf16.msra.mxu0 %v9331_v26  ;;  %4151 = vmatpush1.bf16.msra.mxu1 %v9332_v32  ;;  %v9342_v26 = vld [vmem:[#allocation34_spill] sm:$0xff]  ;;  %v9343_v32 = vld [vmem:[#allocation35_spill] sm:$0xff] }
 0x76f   :  { %4111 = vmatprep.subr.bf16.mxu0 %v9333_v18  ;;  %4152 = vmatprep.subr.bf16.mxu1 %v9334_v45  ;;  %v9344_v18 = vld [vmem:[#allocation36_spill] sm:$0xff]  ;;  %v9345_v45 = vld [vmem:[#allocation37_spill] sm:$0xff] }
 0x772   :  { %4112 = vmatpush1.bf16.msra.mxu0 %v9335_v44  ;;  %4153 = vmatpush1.bf16.msra.mxu1 %v9336_v46  ;;  %v9346_v44 = vld [vmem:[#allocation38_spill] sm:$0xff]  ;;  %v9347_v46 = vld [vmem:[#allocation39_spill] sm:$0xff] }
 0x773   :  { %4113 = vmatprep.subr.bf16.mxu0 %v9337_v41  ;;  %4154 = vmatprep.subr.bf16.mxu1 %v9338_v38  ;;  %v9348_v41 = vld [vmem:[#allocation40_spill] sm:$0xff]  ;;  %v9349_v38 = vld [vmem:[#allocation41_spill] sm:$0xff] }
 0x776   :  { %4114 = vmatpush1.bf16.msra.mxu0 %v9339_v56  ;;  %4155 = vmatpush1.bf16.msra.mxu1 %v9340_v29  ;;  %v9350_v56 = vld [vmem:[#allocation42_spill] sm:$0xff]  ;;  %v9351_v29 = vld [vmem:[#allocation43_spill] sm:$0xff] }
 0x777   :  { %4115 = vmatprep.subr.bf16.mxu0 %v9341_v3  ;;  %4156 = vmatprep.subr.bf16.mxu1 %v9342_v26  ;;  %v9352_v3 = vld [vmem:[#allocation44_spill] sm:$0xff]  ;;  %v9353_v26 = vld [vmem:[#allocation45_spill] sm:$0xff] }
 0x77a   :  { %4116 = vmatpush1.bf16.msra.mxu0 %v9343_v32  ;;  %4157 = vmatpush1.bf16.msra.mxu1 %v9344_v18  ;;  %v9354_v32 = vld [vmem:[#allocation46_spill] sm:$0xff]  ;;  %v9355_v18 = vld [vmem:[#allocation47_spill] sm:$0xff] }
 0x77b   :  { %4117 = vmatprep.subr.bf16.mxu0 %v9345_v45  ;;  %4158 = vmatprep.subr.bf16.mxu1 %v9346_v44  ;;  %v9356_v45 = vld [vmem:[#allocation48_spill] sm:$0xff]  ;;  %v9357_v44 = vld [vmem:[#allocation49_spill] sm:$0xff] }
 0x77e   :  { %4118 = vmatpush1.bf16.msra.mxu0 %v9347_v46  ;;  %4159 = vmatpush1.bf16.msra.mxu1 %v9348_v41  ;;  %v9358_v46 = vld [vmem:[#allocation50_spill] sm:$0xff]  ;;  %v9359_v41 = vld [vmem:[#allocation51_spill] sm:$0xff] }
 0x77f   :  { %4119 = vmatprep.subr.bf16.mxu0 %v9349_v38  ;;  %4160 = vmatprep.subr.bf16.mxu1 %v9350_v56  ;;  %v9360_v38 = vld [vmem:[#allocation52_spill] sm:$0xff]  ;;  %v9361_v56 = vld [vmem:[#allocation53_spill] sm:$0xff] }
 0x782   :  { %4120 = vmatpush1.bf16.msra.mxu0 %v9351_v29  ;;  %4161 = vmatpush1.bf16.msra.mxu1 %v9352_v3  ;;  %v9362_v29 = vld [vmem:[#allocation54_spill] sm:$0xff]  ;;  %v9363_v3 = vld [vmem:[#allocation55_spill] sm:$0xff] }
 0x783   :  { %4121 = vmatprep.subr.bf16.mxu0 %v9353_v26  ;;  %4162 = vmatprep.subr.bf16.mxu1 %v9354_v32  ;;  %v9364_v26 = vld [vmem:[#allocation56_spill] sm:$0xff]  ;;  %v9365_v32 = vld [vmem:[#allocation57_spill] sm:$0xff] }
 0x786   :  { %4122 = vmatpush1.bf16.msra.mxu0 %v9355_v18  ;;  %4163 = vmatpush1.bf16.msra.mxu1 %v9356_v45  ;;  %v9366_v18 = vld [vmem:[#allocation58_spill] sm:$0xff]  ;;  %v9367_v45 = vld [vmem:[#allocation59_spill] sm:$0xff] }
 0x787   :  { %4123 = vmatprep.subr.bf16.mxu0 %v9357_v44  ;;  %4164 = vmatprep.subr.bf16.mxu1 %v9358_v46  ;;  %v9368_v44 = vld [vmem:[#allocation60_spill] sm:$0xff]  ;;  %v9369_v46 = vld [vmem:[#allocation61_spill] sm:$0xff] }
 0x78a   :  { %4124 = vmatpush1.bf16.msra.mxu0 %v9359_v41  ;;  %4165 = vmatpush1.bf16.msra.mxu1 %v9360_v38  ;;  %v9370_v41 = vld [vmem:[#allocation62_spill] sm:$0xff]  ;;  %v9371_v38 = vld [vmem:[#allocation63_spill] sm:$0xff] }
 0x78b   :  { %4125 = vmatprep.subr.bf16.mxu0 %v9361_v56  ;;  %4166 = vmatprep.subr.bf16.mxu1 %v9362_v29  ;;  %v9372_v56 = vld [vmem:[#allocation64_spill] sm:$0xff]  ;;  %v9373_v29 = vld [vmem:[#allocation65_spill] sm:$0xff] }
 0x78e   :  { %4126 = vmatpush1.bf16.msra.mxu0 %v9363_v3  ;;  %4167 = vmatpush1.bf16.msra.mxu1 %v9364_v26  ;;  %v9374_v3 = vld [vmem:[#allocation66_spill] sm:$0xff]  ;;  %v9375_v26 = vld [vmem:[#allocation67_spill] sm:$0xff] }
 0x78f   :  { %4127 = vmatprep.subr.bf16.mxu0 %v9365_v32  ;;  %4168 = vmatprep.subr.bf16.mxu1 %v9366_v18  ;;  %v9376_v32 = vld [vmem:[#allocation68_spill] sm:$0xff]  ;;  %v9377_v18 = vld [vmem:[#allocation69_spill] sm:$0xff] }
 0x792   :  { %4128 = vmatpush1.bf16.msra.mxu0 %v9367_v45  ;;  %4169 = vmatpush1.bf16.msra.mxu1 %v9368_v44  ;;  %v9378_v45 = vld [vmem:[#allocation70_spill] sm:$0xff] }
 0x793   :  { %4129 = vmatprep.subr.bf16.mxu0 %v9369_v46  ;;  %4170 = vmatprep.subr.bf16.mxu1 %v9370_v41 }
 0x796   :  { %4130 = vmatpush1.bf16.msra.mxu0 %v9371_v38  ;;  %4171 = vmatpush1.bf16.msra.mxu1 %v9372_v56 }
 0x797   :  { %4131 = vmatprep.subr.bf16.mxu0 %v9373_v29  ;;  %4172 = vmatprep.subr.bf16.mxu1 %v9374_v3 }
 0x79a   :  { %4132 = vmatpush1.bf16.msra.mxu0 %v9375_v26  ;;  %4173 = vmatpush1.bf16.msra.mxu1 %v9376_v32 }
 0x79b   :  { %4183 = vmatprep.subr.bf16.mxu0 %v9377_v18  ;;  %4224 = vmatprep.subr.bf16.mxu1 %v9378_v45 }
 0x7f0   :  { %v3908_v44 = vpop.f32.mrb[72].mxu0  ;;  %v3949_v46 = vpop.f32.mrb[72].mxu1 }
 0x7f1   :  { %v4038_v41 = vadd.f32 %v9379_v49, %v3908_v44  ;;  %v4040_v38 = vadd.f32 %v9380_v27, %v3949_v46  ;;  %v3910_v28 = vpop.f32.mrb[73].mxu0  ;;  %v3951_v56 = vpop.f32.mrb[73].mxu1 }
 0x7f2   :  { %v4039_v29 = vadd.f32 %v9381_v5, %v3910_v28  ;;  %v4041_v3 = vadd.f32 %v9382_v30, %v3951_v56  ;;  %v3912_v16 = vpop.f32.mrb[74].mxu0  ;;  %v3953_v26 = vpop.f32.mrb[74].mxu1 }
 0x7f3   :  { %v3913_v6 = vpop.f32.mrb[75].mxu0  ;;  %v3954_v32 = vpop.f32.mrb[75].mxu1  ;;  %v4046_v10 = vsub.f32 0.0, %v4038_v41  ;;  %v4056_v18 = vsub.f32 0.0, %v4040_v38 }
 0x7f4   :  { %v4047_v53 = vsub.f32 0.0, %v4039_v29  ;;  %v4057_v45 = vsub.f32 0.0, %v4041_v3  ;;  %v9386_v29 = vld [vmem:[#allocation184_spill] sm:$0xff] }
 0x7f5   :  { %v4048_v60 = vmul.f32 1.442695, %v4046_v10  ;;  %v4058_v58 = vmul.f32 1.442695, %v4056_v18  ;;  %v9383_v10 = vld [vmem:[#allocation181_spill] sm:$0xff]  ;;  %v9384_v18 = vld [vmem:[#allocation182_spill] sm:$0xff] }
 0x7f6   :  { %v4050_v39 = vmul.f32 1.442695, %v4047_v53  ;;  %v4060_v49 = vmul.f32 1.442695, %v4057_v45  ;;  %v9385_v45 = vld [vmem:[#allocation183_spill] sm:$0xff] }
 0x7f7   :  { %5436 = vpow2.f32 %v4048_v60 }
 0x7f8   :  { %5438 = vpow2.f32 %v4058_v58 }
 0x7f9   :  { %5440 = vpow2.f32 %v4050_v39 }
 0x7fa   :  { %5442 = vpow2.f32 %v4060_v49 }
 0x801   :  { %v5437_v27 = vpop.eup %5436 }
 0x802   :  { %v5439_v5 = vpop.eup %5438  ;;  %v4052_v16 = vadd.f32 1.0, %v5437_v27 }
 0x803   :  { %v5441_v28 = vpop.eup %5440  ;;  %v4062_v44 = vadd.f32 1.0, %v5439_v5 }
 0x804   :  { %v5443_v30 = vpop.eup %5442  ;;  %v4053_v6 = vadd.f32 1.0, %v5441_v28  ;;  %5444 = vrcp.f32 %v4052_v16 }
 0x805   :  { %v4063_v32 = vadd.f32 1.0, %v5443_v30  ;;  %5446 = vrcp.f32 %v4062_v44 }
 0x806   :  { %5448 = vrcp.f32 %v4053_v6 }
 0x807   :  { %5450 = vrcp.f32 %v4063_v32 }
 0x80e   :  { %v5445_v44 = vpop.eup %5444 }
 0x80f   :  { %v5447_v6 = vpop.eup %5446 }
 0x830   :  { %v3990_v41 = vpop.f32.mrb[76].mxu0  ;;  %v4031_v38 = vpop.f32.mrb[76].mxu1 }
 0x831   :  { %v4042_v53 = vadd.f32 %v9383_v10, %v3990_v41  ;;  %v4044_v60 = vadd.f32 %v9384_v18, %v4031_v38  ;;  %v3992_v58 = vpop.f32.mrb[77].mxu0  ;;  %v4033_v39 = vpop.f32.mrb[77].mxu1  ;;  %v4078_v18 = vmul.f32 %v5447_v6, %v7954_v48  ;;  %v9389_v6 = vld [vmem:[#allocation112_spill] sm:$0xff] }
 0x832   :  { %v4043_v56 = vadd.f32 %v9385_v45, %v3992_v58  ;;  %v4045_v3 = vadd.f32 %v9386_v29, %v4033_v39  ;;  %v3994_v26 = vpop.f32.mrb[78].mxu0  ;;  %v4035_v46 = vpop.f32.mrb[78].mxu1 }
 0x833   :  { %5452 = vtanh.f32 %v4042_v53  ;;  %v4068_v49 = vsub.f32 0.0, %v4044_v60  ;;  %v3995_v27 = vpop.f32.mrb[79].mxu0  ;;  %v4036_v5 = vpop.f32.mrb[79].mxu1 }
 0x834   :  { %5454 = vtanh.f32 %v4043_v56  ;;  %v4069_v28 = vsub.f32 0.0, %v4045_v3  ;;  %v5449_v41 = vpop.eup %5448 }
 0x835   :  { %v4070_v30 = vmul.f32 1.442695, %v4068_v49  ;;  %v5451_v32 = vpop.eup %5450 }
 0x836   :  { %v4072_v16 = vmul.f32 1.442695, %v4069_v28  ;;  %v4079_v53 = vmul.f32 %v5451_v32, %v7956_v57  ;;  %v9391_v32 = vld [vmem:[#allocation114_spill] sm:$0xff] }
 0x837   :  { %5456 = vpow2.f32 %v4070_v30 }
 0x838   :  { %5458 = vpow2.f32 %v4072_v16  ;;  %v9387_v16 = vld [vmem:[#allocation110_spill] sm:$0xff] }
 0x83d   :  { %v5453_v38 = vpop.eup %5452 }
 0x83e   :  { %v5455_v10 = vpop.eup %5454  ;;  %v4080_v58 = vmul.f32 %v5453_v38, %v5445_v44  ;;  %v9388_v44 = vld [vmem:[#allocation111_spill] sm:$0xff] }
 0x83f   :  { %v4081_v60 = vmul.f32 %v5455_v10, %v5449_v41  ;;  %v9390_v41 = vld [vmem:[#allocation113_spill] sm:$0xff]  ;;  %v9392_v38 = vld [vmem:[#allocation115_spill] sm:$0xff]  ;;  %v9393_v10 = vld [vmem:[#allocation116_spill] sm:$0xff] }
 0x840   :  { %v8104_v39 = vadd.f32 %v4080_v58, %v4078_v18  ;;  %v9394_v18 = vld [vmem:[#allocation117_spill] sm:$0xff]  ;;  %v9395_v58 = vld [vmem:[#allocation118_spill] sm:$0xff] }
 0x841   :  { %v5457_v45 = vpop.eup %5456  ;;  %v8106_v56 = vadd.f32 %v4081_v60, %v4079_v53  ;;  %v9396_v53 = vld [vmem:[#allocation120_spill] sm:$0xff]  ;;  %v9397_v60 = vld [vmem:[#allocation121_spill] sm:$0xff] }
 0x842   :  { %v5459_v29 = vpop.eup %5458  ;;  %5460 = vtanh.f32 %v8104_v39  ;;  %v4074_v3 = vadd.f32 1.0, %v5457_v45  ;;  %v9398_v45 = vld [vmem:[#allocation122_spill] sm:$0xff] }
 0x843   :  { %5462 = vtanh.f32 %v8106_v56  ;;  %v4075_v26 = vadd.f32 1.0, %v5459_v29  ;;  %v9399_v29 = vld [vmem:[#allocation123_spill] sm:$0xff] }
 0x844   :  { %5464 = vrcp.f32 %v4074_v3  ;;  %v9400_v3 = vld [vmem:[#allocation124_spill] sm:$0xff] }
 0x845   :  { %5466 = vrcp.f32 %v4075_v26  ;;  %v9401_v26 = vld [vmem:[#allocation125_spill] sm:$0xff] }
 0x84c   :  { %v5461_v46 = vpop.eup %5460 }
 0x84d   :  { %v5463_v48 = vpop.eup %5462 }
 0x84e   :  { %v5465_v49 = vpop.eup %5464 }
 0x84f   :  { %v5467_v27 = vpop.eup %5466  ;;  %v4086_v57 = vmul.f32 %v5465_v49, %v5461_v46  ;;  %v9402_v46 = vld [vmem:[#allocation126_spill] sm:$0xff]  ;;  %v9404_v49 = vld [vmem:[#allocation132_spill] sm:$0xff] }
 0x850   :  { %v4087_v5 = vmul.f32 %v5467_v27, %v5463_v48  ;;  %v9403_v48 = vld [vmem:[#allocation128_spill] sm:$0xff]  ;;  %v9405_v27 = vld [vmem:[#allocation134_spill] sm:$0xff] }
 0x851   :  { %v8110_v30 = vpack.c.bf16 %v4086_v57, %v4086_v57  ;;  %v9406_v57 = vld [vmem:[#allocation135_spill] sm:$0xff] }
 0x852   :  { %v4100_v28 = vpack.c.bf16 %v4087_v5, %v4087_v5  ;;  %v9407_v5 = vld [vmem:[#allocation138_spill] sm:$0xff] }
 0x854   :  { %4133 = vmatprep.mubr.bf16.mxu0 %v4100_v28  ;;  %4174 = vmatprep.mubr.bf16.mxu1 %v4100_v28 }
 0x855   :  { %4134 = vmatmul.mubr.bf16.vlgmr.msra.gmra.mrb[80].mxu0 %v8110_v30  ;;  %4175 = vmatmul.mubr.bf16.vlgmr.msra.gmra.mrb[80].mxu1 %v8110_v30 }
 0x856   :  { %4184 = vmatpush1.bf16.msra.mxu0 %v8893_v34  ;;  %4225 = vmatpush1.bf16.msra.mxu1 %v8894_v0 }
 0x857   :  { %4215 = vmatprep.mubr.bf16.mxu0 %v4100_v28  ;;  %4256 = vmatprep.mubr.bf16.mxu1 %v4100_v28  ;;  %v9408_v28 = vld [vmem:[#allocation140_spill] sm:$0xff] }
 0x858   :  { %4185 = vmatprep.subr.bf16.mxu0 %v8895_v9  ;;  %4226 = vmatprep.subr.bf16.mxu1 %v8896_v36 }
 0x85a   :  { %4186 = vmatpush1.bf16.msra.mxu0 %v8897_v43  ;;  %4227 = vmatpush1.bf16.msra.mxu1 %v8898_v11 }
 0x85b   :  { %4187 = vmatprep.subr.bf16.mxu0 %v8899_v47  ;;  %4228 = vmatprep.subr.bf16.mxu1 %v8900_v42 }
 0x85e   :  { %4188 = vmatpush1.bf16.msra.mxu0 %v8901_v20  ;;  %4229 = vmatpush1.bf16.msra.mxu1 %v8902_v19 }
 0x85f   :  { %4189 = vmatprep.subr.bf16.mxu0 %v8903_v40  ;;  %4230 = vmatprep.subr.bf16.mxu1 %v8904_v2 }
 0x862   :  { %4190 = vmatpush1.bf16.msra.mxu0 %v8905_v33  ;;  %4231 = vmatpush1.bf16.msra.mxu1 %v8906_v50 }
 0x863   :  { %4191 = vmatprep.subr.bf16.mxu0 %v8907_v37  ;;  %4232 = vmatprep.subr.bf16.mxu1 %v8908_v8 }
 0x866   :  { %4192 = vmatpush1.bf16.msra.mxu0 %v8909_v51  ;;  %4233 = vmatpush1.bf16.msra.mxu1 %v8910_v15 }
 0x867   :  { %4193 = vmatprep.subr.bf16.mxu0 %v8911_v4  ;;  %4234 = vmatprep.subr.bf16.mxu1 %v8912_v1 }
 0x86a   :  { %4194 = vmatpush1.bf16.msra.mxu0 %v8999_v63  ;;  %4235 = vmatpush1.bf16.msra.mxu1 %v9000_v12 }
 0x86b   :  { %4195 = vmatprep.subr.bf16.mxu0 %v9001_v62  ;;  %4236 = vmatprep.subr.bf16.mxu1 %v9002_v14 }
 0x86e   :  { %4196 = vmatpush1.bf16.msra.mxu0 %v9003_v13  ;;  %4237 = vmatpush1.bf16.msra.mxu1 %v9004_v23 }
 0x86f   :  { %4197 = vmatprep.subr.bf16.mxu0 %v9005_v61  ;;  %4238 = vmatprep.subr.bf16.mxu1 %v9006_v24 }
 0x872   :  { %4198 = vmatpush1.bf16.msra.mxu0 %v9007_v52  ;;  %4239 = vmatpush1.bf16.msra.mxu1 %v9008_v59 }
 0x873   :  { %4199 = vmatprep.subr.bf16.mxu0 %v9009_v54  ;;  %4240 = vmatprep.subr.bf16.mxu1 %v9010_v25 }
 0x876   :  { %4200 = vmatpush1.bf16.msra.mxu0 %v9011_v35  ;;  %4241 = vmatpush1.bf16.msra.mxu1 %v9012_v31 }
 0x877   :  { %4201 = vmatprep.subr.bf16.mxu0 %v9013_v22  ;;  %4242 = vmatprep.subr.bf16.mxu1 %v9014_v21 }
 0x87a   :  { %4202 = vmatpush1.bf16.msra.mxu0 %v9015_v55  ;;  %4243 = vmatpush1.bf16.msra.mxu1 %v9016_v17 }
 0x87b   :  { %4203 = vmatprep.subr.bf16.mxu0 %v9017_v7  ;;  %4244 = vmatprep.subr.bf16.mxu1 %v9387_v16 }
 0x87e   :  { %4204 = vmatpush1.bf16.msra.mxu0 %v9388_v44  ;;  %4245 = vmatpush1.bf16.msra.mxu1 %v9389_v6 }
 0x87f   :  { %4205 = vmatprep.subr.bf16.mxu0 %v9390_v41  ;;  %4246 = vmatprep.subr.bf16.mxu1 %v9391_v32 }
 0x882   :  { %4206 = vmatpush1.bf16.msra.mxu0 %v9392_v38  ;;  %4247 = vmatpush1.bf16.msra.mxu1 %v9393_v10 }
 0x883   :  { %4207 = vmatprep.subr.bf16.mxu0 %v9394_v18  ;;  %4248 = vmatprep.subr.bf16.mxu1 %v9395_v58  ;;  %v9478_v58 = vld [vmem:[#allocation160_spill] sm:$0xff]  ;;  %v9479_v18 = vld [vmem:[#allocation161_spill] sm:$0xff] }
 0x886   :  { %4208 = vmatpush1.bf16.msra.mxu0 %v9396_v53  ;;  %4249 = vmatpush1.bf16.msra.mxu1 %v9397_v60  ;;  %v9477_v60 = vld [vmem:[#allocation159_spill] sm:$0xff] }
 0x887   :  { %4209 = vmatprep.subr.bf16.mxu0 %v9398_v45  ;;  %4250 = vmatprep.subr.bf16.mxu1 %v9399_v29  ;;  %v9409_v45 = vld [vmem:[#allocation141_spill] sm:$0xff] }
 0x888   :  { %v9410_v29 = vld [vmem:[#allocation5_spill] sm:$0xff] }
 0x88a   :  { %4210 = vmatpush1.bf16.msra.mxu0 %v9400_v3  ;;  %4251 = vmatpush1.bf16.msra.mxu1 %v9401_v26  ;;  %v9411_v3 = vld [vmem:[#allocation6_spill] sm:$0xff] }
 0x88b   :  { %4211 = vmatprep.subr.bf16.mxu0 %v9402_v46  ;;  %4252 = vmatprep.subr.bf16.mxu1 %v9403_v48  ;;  %v9412_v48 = vld [vmem:[#allocation7_spill] sm:$0xff]  ;;  %v9421_v46 = vld [vmem:[#allocation16_spill] sm:$0xff]  ;;  %v9476_v26 = vld [vmem:[#allocation158_spill] sm:$0xff] }
 0x88e   :  { %4212 = vmatpush1.bf16.msra.mxu0 %v9404_v49  ;;  %4253 = vmatpush1.bf16.msra.mxu1 %v9405_v27  ;;  %v9413_v49 = vld [vmem:[#allocation8_spill] sm:$0xff]  ;;  %v9414_v27 = vld [vmem:[#allocation9_spill] sm:$0xff] }
 0x88f   :  { %4213 = vmatprep.subr.bf16.mxu0 %v9406_v57  ;;  %4254 = vmatprep.subr.bf16.mxu1 %v9407_v5  ;;  %v9415_v57 = vld [vmem:[#allocation10_spill] sm:$0xff]  ;;  %v9416_v5 = vld [vmem:[#allocation11_spill] sm:$0xff] }
 0x892   :  { %4214 = vmatpush1.bf16.msra.mxu0 %v9408_v28  ;;  %4255 = vmatpush1.bf16.msra.mxu1 %v9409_v45  ;;  %v9417_v28 = vld [vmem:[#allocation12_spill] sm:$0xff]  ;;  %v9418_v45 = vld [vmem:[#allocation13_spill] sm:$0xff] }
 0x893   :  { %4328 = vmatprep.subr.bf16.mxu0 %v9410_v29  ;;  %4369 = vmatprep.subr.bf16.mxu1 %v9411_v3  ;;  %v9419_v29 = vld [vmem:[#allocation14_spill] sm:$0xff]  ;;  %v9420_v3 = vld [vmem:[#allocation15_spill] sm:$0xff] }
 0x895   :  { %4216 = vmatmul.mubr.bf16.vlgmr.msra.gmra.mrb[84].mxu0 %v8110_v30  ;;  %4257 = vmatmul.mubr.bf16.vlgmr.msra.gmra.mrb[84].mxu1 %v8110_v30  ;;  %v9422_v30 = vld [vmem:[#allocation17_spill] sm:$0xff] }
 0x896   :  { %4329 = vmatpush1.bf16.msra.mxu0 %v9412_v48  ;;  %4370 = vmatpush1.bf16.msra.mxu1 %v9413_v49  ;;  %v9423_v48 = vld [vmem:[#allocation18_spill] sm:$0xff]  ;;  %v9424_v49 = vld [vmem:[#allocation19_spill] sm:$0xff] }
 0x897   :  { %4330 = vmatprep.subr.bf16.mxu0 %v9414_v27  ;;  %4371 = vmatprep.subr.bf16.mxu1 %v9415_v57  ;;  %v9425_v27 = vld [vmem:[#allocation20_spill] sm:$0xff]  ;;  %v9426_v57 = vld [vmem:[#allocation21_spill] sm:$0xff] }
 0x89a   :  { %4331 = vmatpush1.bf16.msra.mxu0 %v9416_v5  ;;  %4372 = vmatpush1.bf16.msra.mxu1 %v9417_v28  ;;  %v9427_v5 = vld [vmem:[#allocation22_spill] sm:$0xff]  ;;  %v9428_v28 = vld [vmem:[#allocation23_spill] sm:$0xff] }
 0x89b   :  { %4332 = vmatprep.subr.bf16.mxu0 %v9418_v45  ;;  %4373 = vmatprep.subr.bf16.mxu1 %v9419_v29  ;;  %v9429_v45 = vld [vmem:[#allocation24_spill] sm:$0xff]  ;;  %v9430_v29 = vld [vmem:[#allocation25_spill] sm:$0xff] }
 0x89e   :  { %4333 = vmatpush1.bf16.msra.mxu0 %v9420_v3  ;;  %4374 = vmatpush1.bf16.msra.mxu1 %v9421_v46  ;;  %v9431_v3 = vld [vmem:[#allocation26_spill] sm:$0xff]  ;;  %v9432_v46 = vld [vmem:[#allocation27_spill] sm:$0xff] }
 0x89f   :  { %4334 = vmatprep.subr.bf16.mxu0 %v9422_v30  ;;  %4375 = vmatprep.subr.bf16.mxu1 %v9423_v48  ;;  %v9433_v30 = vld [vmem:[#allocation28_spill] sm:$0xff]  ;;  %v9434_v48 = vld [vmem:[#allocation29_spill] sm:$0xff] }
 0x8a2   :  { %4335 = vmatpush1.bf16.msra.mxu0 %v9424_v49  ;;  %4376 = vmatpush1.bf16.msra.mxu1 %v9425_v27  ;;  %v9435_v49 = vld [vmem:[#allocation30_spill] sm:$0xff]  ;;  %v9436_v27 = vld [vmem:[#allocation31_spill] sm:$0xff] }
 0x8a3   :  { %4336 = vmatprep.subr.bf16.mxu0 %v9426_v57  ;;  %4377 = vmatprep.subr.bf16.mxu1 %v9427_v5  ;;  %v9437_v57 = vld [vmem:[#allocation32_spill] sm:$0xff]  ;;  %v9438_v5 = vld [vmem:[#allocation33_spill] sm:$0xff] }
 0x8a6   :  { %4337 = vmatpush1.bf16.msra.mxu0 %v9428_v28  ;;  %4378 = vmatpush1.bf16.msra.mxu1 %v9429_v45  ;;  %v9439_v28 = vld [vmem:[#allocation34_spill] sm:$0xff]  ;;  %v9440_v45 = vld [vmem:[#allocation35_spill] sm:$0xff] }
 0x8a7   :  { %4338 = vmatprep.subr.bf16.mxu0 %v9430_v29  ;;  %4379 = vmatprep.subr.bf16.mxu1 %v9431_v3  ;;  %v9441_v29 = vld [vmem:[#allocation36_spill] sm:$0xff]  ;;  %v9442_v3 = vld [vmem:[#allocation37_spill] sm:$0xff] }
 0x8aa   :  { %4339 = vmatpush1.bf16.msra.mxu0 %v9432_v46  ;;  %4380 = vmatpush1.bf16.msra.mxu1 %v9433_v30  ;;  %v9443_v46 = vld [vmem:[#allocation38_spill] sm:$0xff]  ;;  %v9444_v30 = vld [vmem:[#allocation39_spill] sm:$0xff] }
 0x8ab   :  { %4340 = vmatprep.subr.bf16.mxu0 %v9434_v48  ;;  %4381 = vmatprep.subr.bf16.mxu1 %v9435_v49  ;;  %v9445_v48 = vld [vmem:[#allocation40_spill] sm:$0xff]  ;;  %v9446_v49 = vld [vmem:[#allocation41_spill] sm:$0xff] }
 0x8ae   :  { %4341 = vmatpush1.bf16.msra.mxu0 %v9436_v27  ;;  %4382 = vmatpush1.bf16.msra.mxu1 %v9437_v57  ;;  %v9447_v27 = vld [vmem:[#allocation42_spill] sm:$0xff]  ;;  %v9448_v57 = vld [vmem:[#allocation43_spill] sm:$0xff] }
 0x8af   :  { %4342 = vmatprep.subr.bf16.mxu0 %v9438_v5  ;;  %4383 = vmatprep.subr.bf16.mxu1 %v9439_v28  ;;  %v9449_v5 = vld [vmem:[#allocation44_spill] sm:$0xff]  ;;  %v9450_v28 = vld [vmem:[#allocation45_spill] sm:$0xff] }
 0x8b2   :  { %4343 = vmatpush1.bf16.msra.mxu0 %v9440_v45  ;;  %4384 = vmatpush1.bf16.msra.mxu1 %v9441_v29  ;;  %v9451_v45 = vld [vmem:[#allocation46_spill] sm:$0xff]  ;;  %v9452_v29 = vld [vmem:[#allocation47_spill] sm:$0xff] }
 0x8b3   :  { %4344 = vmatprep.subr.bf16.mxu0 %v9442_v3  ;;  %4385 = vmatprep.subr.bf16.mxu1 %v9443_v46  ;;  %v9453_v3 = vld [vmem:[#allocation48_spill] sm:$0xff]  ;;  %v9454_v46 = vld [vmem:[#allocation49_spill] sm:$0xff] }
 0x8b6   :  { %4345 = vmatpush1.bf16.msra.mxu0 %v9444_v30  ;;  %4386 = vmatpush1.bf16.msra.mxu1 %v9445_v48  ;;  %v9455_v30 = vld [vmem:[#allocation50_spill] sm:$0xff]  ;;  %v9456_v48 = vld [vmem:[#allocation51_spill] sm:$0xff] }
 0x8b7   :  { %4346 = vmatprep.subr.bf16.mxu0 %v9446_v49  ;;  %4387 = vmatprep.subr.bf16.mxu1 %v9447_v27  ;;  %v9457_v49 = vld [vmem:[#allocation52_spill] sm:$0xff]  ;;  %v9458_v27 = vld [vmem:[#allocation53_spill] sm:$0xff] }
 0x8ba   :  { %4347 = vmatpush1.bf16.msra.mxu0 %v9448_v57  ;;  %4388 = vmatpush1.bf16.msra.mxu1 %v9449_v5  ;;  %v9459_v57 = vld [vmem:[#allocation54_spill] sm:$0xff]  ;;  %v9460_v5 = vld [vmem:[#allocation55_spill] sm:$0xff] }
 0x8bb   :  { %4348 = vmatprep.subr.bf16.mxu0 %v9450_v28  ;;  %4389 = vmatprep.subr.bf16.mxu1 %v9451_v45  ;;  %v9461_v28 = vld [vmem:[#allocation56_spill] sm:$0xff]  ;;  %v9462_v45 = vld [vmem:[#allocation57_spill] sm:$0xff] }
 0x8be   :  { %4349 = vmatpush1.bf16.msra.mxu0 %v9452_v29  ;;  %4390 = vmatpush1.bf16.msra.mxu1 %v9453_v3  ;;  %v9463_v29 = vld [vmem:[#allocation58_spill] sm:$0xff]  ;;  %v9464_v3 = vld [vmem:[#allocation59_spill] sm:$0xff] }
 0x8bf   :  { %4350 = vmatprep.subr.bf16.mxu0 %v9454_v46  ;;  %4391 = vmatprep.subr.bf16.mxu1 %v9455_v30  ;;  %v9465_v46 = vld [vmem:[#allocation60_spill] sm:$0xff]  ;;  %v9466_v30 = vld [vmem:[#allocation61_spill] sm:$0xff] }
 0x8c2   :  { %4351 = vmatpush1.bf16.msra.mxu0 %v9456_v48  ;;  %4392 = vmatpush1.bf16.msra.mxu1 %v9457_v49  ;;  %v9467_v48 = vld [vmem:[#allocation62_spill] sm:$0xff]  ;;  %v9468_v49 = vld [vmem:[#allocation63_spill] sm:$0xff] }
 0x8c3   :  { %4352 = vmatprep.subr.bf16.mxu0 %v9458_v27  ;;  %4393 = vmatprep.subr.bf16.mxu1 %v9459_v57  ;;  %v9469_v27 = vld [vmem:[#allocation64_spill] sm:$0xff]  ;;  %v9470_v57 = vld [vmem:[#allocation65_spill] sm:$0xff] }
 0x8c6   :  { %4353 = vmatpush1.bf16.msra.mxu0 %v9460_v5  ;;  %4394 = vmatpush1.bf16.msra.mxu1 %v9461_v28  ;;  %v9471_v5 = vld [vmem:[#allocation66_spill] sm:$0xff]  ;;  %v9472_v28 = vld [vmem:[#allocation67_spill] sm:$0xff] }
 0x8c7   :  { %4354 = vmatprep.subr.bf16.mxu0 %v9462_v45  ;;  %4395 = vmatprep.subr.bf16.mxu1 %v9463_v29  ;;  %v9473_v45 = vld [vmem:[#allocation68_spill] sm:$0xff]  ;;  %v9474_v29 = vld [vmem:[#allocation69_spill] sm:$0xff] }
 0x8ca   :  { %4355 = vmatpush1.bf16.msra.mxu0 %v9464_v3  ;;  %4396 = vmatpush1.bf16.msra.mxu1 %v9465_v46  ;;  %v9475_v3 = vld [vmem:[#allocation70_spill] sm:$0xff] }
 0x8cb   :  { %4356 = vmatprep.subr.bf16.mxu0 %v9466_v30  ;;  %4397 = vmatprep.subr.bf16.mxu1 %v9467_v48 }
 0x8ce   :  { %4357 = vmatpush1.bf16.msra.mxu0 %v9468_v49  ;;  %4398 = vmatpush1.bf16.msra.mxu1 %v9469_v27 }
 0x8cf   :  { %4358 = vmatprep.subr.bf16.mxu0 %v9470_v57  ;;  %4399 = vmatprep.subr.bf16.mxu1 %v9471_v5 }
 0x8d2   :  { %4359 = vmatpush1.bf16.msra.mxu0 %v9472_v28  ;;  %4400 = vmatpush1.bf16.msra.mxu1 %v9473_v45 }
 0x8d3   :  { %4410 = vmatprep.subr.bf16.mxu0 %v9474_v29  ;;  %4451 = vmatprep.subr.bf16.mxu1 %v9475_v3 }
 0x928   :  { %v4135_v46 = vpop.f32.mrb[80].mxu0  ;;  %v4176_v30 = vpop.f32.mrb[80].mxu1 }
 0x929   :  { %v4265_v48 = vadd.f32 %v9476_v26, %v4135_v46  ;;  %v4267_v49 = vadd.f32 %v9477_v60, %v4176_v30  ;;  %v4137_v53 = vpop.f32.mrb[81].mxu0  ;;  %v4178_v27 = vpop.f32.mrb[81].mxu1 }
 0x92a   :  { %v4266_v57 = vadd.f32 %v9478_v58, %v4137_v53  ;;  %v4268_v5 = vadd.f32 %v9479_v18, %v4178_v27  ;;  %v4139_v10 = vpop.f32.mrb[82].mxu0  ;;  %v4180_v28 = vpop.f32.mrb[82].mxu1  ;;  %v9481_v27 = vld [vmem:[#allocation186_spill] sm:$0xff] }
 0x92b   :  { %v4140_v38 = vpop.f32.mrb[83].mxu0  ;;  %v4181_v45 = vpop.f32.mrb[83].mxu1  ;;  %v4273_v32 = vsub.f32 0.0, %v4265_v48  ;;  %v4283_v29 = vsub.f32 0.0, %v4267_v49  ;;  %v9483_v28 = vld [vmem:[#allocation188_spill] sm:$0xff] }
 0x92c   :  { %v4274_v41 = vsub.f32 0.0, %v4266_v57  ;;  %v4284_v3 = vsub.f32 0.0, %v4268_v5  ;;  %v9482_v57 = vld [vmem:[#allocation187_spill] sm:$0xff] }
 0x92d   :  { %v4275_v6 = vmul.f32 1.442695, %v4273_v32  ;;  %v4285_v44 = vmul.f32 1.442695, %v4283_v29  ;;  %v9480_v32 = vld [vmem:[#allocation185_spill] sm:$0xff] }
 0x92e   :  { %v4277_v16 = vmul.f32 1.442695, %v4274_v41  ;;  %v4287_v26 = vmul.f32 1.442695, %v4284_v3 }
 0x92f   :  { %5468 = vpow2.f32 %v4275_v6 }
 0x930   :  { %5470 = vpow2.f32 %v4285_v44 }
 0x931   :  { %5472 = vpow2.f32 %v4277_v16 }
 0x932   :  { %5474 = vpow2.f32 %v4287_v26 }
 0x939   :  { %v5469_v60 = vpop.eup %5468 }
 0x93a   :  { %v5471_v58 = vpop.eup %5470  ;;  %v4279_v10 = vadd.f32 1.0, %v5469_v60 }
 0x93b   :  { %v5473_v53 = vpop.eup %5472  ;;  %v4289_v46 = vadd.f32 1.0, %v5471_v58 }
 0x93c   :  { %v5475_v18 = vpop.eup %5474  ;;  %v4280_v38 = vadd.f32 1.0, %v5473_v53  ;;  %5476 = vrcp.f32 %v4279_v10 }
 0x93d   :  { %v4290_v30 = vadd.f32 1.0, %v5475_v18  ;;  %5478 = vrcp.f32 %v4289_v46 }
 0x93e   :  { %5480 = vrcp.f32 %v4280_v38 }
 0x93f   :  { %5482 = vrcp.f32 %v4290_v30 }
 0x946   :  { %v5477_v46 = vpop.eup %5476 }
 0x947   :  { %v5479_v38 = vpop.eup %5478 }
 0x968   :  { %v4217_v48 = vpop.f32.mrb[84].mxu0  ;;  %v4258_v49 = vpop.f32.mrb[84].mxu1 }
 0x969   :  { %v4269_v41 = vadd.f32 %v9480_v32, %v4217_v48  ;;  %v4271_v6 = vadd.f32 %v9481_v27, %v4258_v49  ;;  %v4219_v44 = vpop.f32.mrb[85].mxu0  ;;  %v4260_v16 = vpop.f32.mrb[85].mxu1  ;;  %v4305_v27 = vmul.f32 %v5479_v38, %v8104_v39  ;;  %v9507_v38 = vld [vmem:[#allocation162_spill] sm:$0xff] }
 0x96a   :  { %v4270_v5 = vadd.f32 %v9482_v57, %v4219_v44  ;;  %v4272_v45 = vadd.f32 %v9483_v28, %v4260_v16  ;;  %v4221_v29 = vpop.f32.mrb[86].mxu0  ;;  %v4262_v3 = vpop.f32.mrb[86].mxu1 }
 0x96b   :  { %5484 = vtanh.f32 %v4269_v41  ;;  %v4295_v26 = vsub.f32 0.0, %v4271_v6  ;;  %v4222_v60 = vpop.f32.mrb[87].mxu0  ;;  %v4263_v58 = vpop.f32.mrb[87].mxu1 }
 0x96c   :  { %5486 = vtanh.f32 %v4270_v5  ;;  %v4296_v53 = vsub.f32 0.0, %v4272_v45  ;;  %v5481_v48 = vpop.eup %5480 }
 0x96d   :  { %v4297_v18 = vmul.f32 1.442695, %v4295_v26  ;;  %v5483_v30 = vpop.eup %5482 }
 0x96e   :  { %v4299_v10 = vmul.f32 1.442695, %v4296_v53  ;;  %v4306_v41 = vmul.f32 %v5483_v30, %v8106_v56  ;;  %v9508_v30 = vld [vmem:[#allocation163_spill] sm:$0xff] }
 0x96f   :  { %5488 = vpow2.f32 %v4297_v18 }
 0x970   :  { %5490 = vpow2.f32 %v4299_v10 }
 0x975   :  { %v5485_v49 = vpop.eup %5484 }
 0x976   :  { %v5487_v32 = vpop.eup %5486  ;;  %v4307_v44 = vmul.f32 %v5485_v49, %v5477_v46 }
 0x977   :  { %v4308_v6 = vmul.f32 %v5487_v32, %v5481_v48 }
 0x978   :  { %v8254_v16 = vadd.f32 %v4307_v44, %v4305_v27  ;;  %v9509_v44 = vld [vmem:[#allocation164_spill] sm:$0xff] }
 0x979   :  { %v5489_v57 = vpop.eup %5488  ;;  %v8256_v5 = vadd.f32 %v4308_v6, %v4306_v41  ;;  %v9510_v6 = vld [vmem:[#allocation165_spill] sm:$0xff] }
 0x97a   :  { %v5491_v28 = vpop.eup %5490  ;;  %5492 = vtanh.f32 %v8254_v16  ;;  %v4301_v45 = vadd.f32 1.0, %v5489_v57 }
 0x97b   :  { %5494 = vtanh.f32 %v8256_v5  ;;  %v4302_v29 = vadd.f32 1.0, %v5491_v28 }
 0x97c   :  { %5496 = vrcp.f32 %v4301_v45 }
 0x97d   :  { %5498 = vrcp.f32 %v4302_v29 }
 0x984   :  { %v5493_v3 = vpop.eup %5492 }
 0x985   :  { %v5495_v39 = vpop.eup %5494 }
 0x986   :  { %v5497_v26 = vpop.eup %5496 }
 0x987   :  { %v5499_v60 = vpop.eup %5498  ;;  %v4313_v56 = vmul.f32 %v5497_v26, %v5493_v3 }
 0x988   :  { %v4314_v58 = vmul.f32 %v5499_v60, %v5495_v39 }
 0x989   :  { %v8260_v18 = vpack.c.bf16 %v4313_v56, %v4313_v56 }
 0x98a   :  { %v4327_v53 = vpack.c.bf16 %v4314_v58, %v4314_v58 }
 0x98c   :  { %4360 = vmatprep.mubr.bf16.mxu0 %v4327_v53  ;;  %4401 = vmatprep.mubr.bf16.mxu1 %v4327_v53 }
 0x98d   :  { %4361 = vmatmul.mubr.bf16.vlgmr.msra.gmra.mrb[88].mxu0 %v8260_v18  ;;  %4402 = vmatmul.mubr.bf16.vlgmr.msra.gmra.mrb[88].mxu1 %v8260_v18 }
 0x98e   :  { %4411 = vmatpush1.bf16.msra.mxu0 %v8893_v34  ;;  %4452 = vmatpush1.bf16.msra.mxu1 %v8894_v0  ;;  %v9484_v34 = vld [vmem:[#allocation110_spill] sm:$0xff]  ;;  %v9485_v0 = vld [vmem:[#allocation111_spill] sm:$0xff] }
 0x98f   :  { %4442 = vmatprep.mubr.bf16.mxu0 %v4327_v53  ;;  %4483 = vmatprep.mubr.bf16.mxu1 %v4327_v53 }
 0x990   :  { %4412 = vmatprep.subr.bf16.mxu0 %v8895_v9  ;;  %4453 = vmatprep.subr.bf16.mxu1 %v8896_v36  ;;  %v9486_v9 = vld [vmem:[#allocation112_spill] sm:$0xff]  ;;  %v9487_v36 = vld [vmem:[#allocation113_spill] sm:$0xff] }
 0x992   :  { %4413 = vmatpush1.bf16.msra.mxu0 %v8897_v43  ;;  %4454 = vmatpush1.bf16.msra.mxu1 %v8898_v11  ;;  %v9488_v43 = vld [vmem:[#allocation114_spill] sm:$0xff]  ;;  %v9489_v11 = vld [vmem:[#allocation115_spill] sm:$0xff] }
 0x993   :  { %4414 = vmatprep.subr.bf16.mxu0 %v8899_v47  ;;  %4455 = vmatprep.subr.bf16.mxu1 %v8900_v42  ;;  %v9490_v47 = vld [vmem:[#allocation116_spill] sm:$0xff]  ;;  %v9491_v42 = vld [vmem:[#allocation117_spill] sm:$0xff] }
 0x996   :  { %4415 = vmatpush1.bf16.msra.mxu0 %v8901_v20  ;;  %4456 = vmatpush1.bf16.msra.mxu1 %v8902_v19  ;;  %v9492_v20 = vld [vmem:[#allocation118_spill] sm:$0xff]  ;;  %v9493_v19 = vld [vmem:[#allocation120_spill] sm:$0xff] }
 0x997   :  { %4416 = vmatprep.subr.bf16.mxu0 %v8903_v40  ;;  %4457 = vmatprep.subr.bf16.mxu1 %v8904_v2  ;;  %v9494_v40 = vld [vmem:[#allocation121_spill] sm:$0xff]  ;;  %v9495_v2 = vld [vmem:[#allocation122_spill] sm:$0xff] }
 0x99a   :  { %4417 = vmatpush1.bf16.msra.mxu0 %v8905_v33  ;;  %4458 = vmatpush1.bf16.msra.mxu1 %v8906_v50  ;;  %v9496_v33 = vld [vmem:[#allocation123_spill] sm:$0xff]  ;;  %v9497_v50 = vld [vmem:[#allocation124_spill] sm:$0xff] }
 0x99b   :  { %4418 = vmatprep.subr.bf16.mxu0 %v8907_v37  ;;  %4459 = vmatprep.subr.bf16.mxu1 %v8908_v8  ;;  %v9498_v37 = vld [vmem:[#allocation125_spill] sm:$0xff]  ;;  %v9499_v8 = vld [vmem:[#allocation126_spill] sm:$0xff] }
 0x99e   :  { %4419 = vmatpush1.bf16.msra.mxu0 %v8909_v51  ;;  %4460 = vmatpush1.bf16.msra.mxu1 %v8910_v15  ;;  %v9500_v51 = vld [vmem:[#allocation128_spill] sm:$0xff] }
 0x99f   :  { %4420 = vmatprep.subr.bf16.mxu0 %v8911_v4  ;;  %4461 = vmatprep.subr.bf16.mxu1 %v8912_v1  ;;  %v9501_v15 = vld [vmem:[#allocation132_spill] sm:$0xff]  ;;  %v9502_v4 = vld [vmem:[#allocation134_spill] sm:$0xff]  ;;  %v9503_v1 = vld [vmem:[#allocation135_spill] sm:$0xff] }
 0x9a2   :  { %4421 = vmatpush1.bf16.msra.mxu0 %v8999_v63  ;;  %4462 = vmatpush1.bf16.msra.mxu1 %v9000_v12  ;;  %v9504_v63 = vld [vmem:[#allocation138_spill] sm:$0xff]  ;;  %v9505_v12 = vld [vmem:[#allocation140_spill] sm:$0xff] }
 0x9a3   :  { %4422 = vmatprep.subr.bf16.mxu0 %v9001_v62  ;;  %4463 = vmatprep.subr.bf16.mxu1 %v9002_v14  ;;  %v9506_v62 = vld [vmem:[#allocation141_spill] sm:$0xff] }
 0x9a4   :  { %v5260_v14 = vld [vmem:[%s8396_s4 + $0x40] sm:$0xff]  }
 0x9a6   :  { %4423 = vmatpush1.bf16.msra.mxu0 %v9003_v13  ;;  %4464 = vmatpush1.bf16.msra.mxu1 %v9004_v23  ;;  %v5261_v13 = vld [vmem:[%s8396_s4] sm:$0xff]   ;;  %v5262_v23 = vld [vmem:[%s8396_s4 + $0x48] sm:$0xff]  }
 0x9a7   :  { %4424 = vmatprep.subr.bf16.mxu0 %v9005_v61  ;;  %4465 = vmatprep.subr.bf16.mxu1 %v9006_v24  ;;  %v5263_v61 = vld [vmem:[%s8396_s4 + $0x8] sm:$0xff]   ;;  %v5264_v24 = vld [vmem:[%s8396_s4 + $0x50] sm:$0xff]  }
 0x9aa   :  { %4425 = vmatpush1.bf16.msra.mxu0 %v9007_v52  ;;  %4466 = vmatpush1.bf16.msra.mxu1 %v9008_v59  ;;  %v5265_v52 = vld [vmem:[%s8396_s4 + $0x10] sm:$0xff]   ;;  %v5266_v59 = vld [vmem:[%s8396_s4 + $0x58] sm:$0xff]  }
 0x9ab   :  { %4426 = vmatprep.subr.bf16.mxu0 %v9009_v54  ;;  %4467 = vmatprep.subr.bf16.mxu1 %v9010_v25  ;;  %v5267_v54 = vld [vmem:[%s8396_s4 + $0x18] sm:$0xff]   ;;  %v5268_v25 = vld [vmem:[%s8396_s4 + $0x60] sm:$0xff]  }
 0x9ae   :  { %4427 = vmatpush1.bf16.msra.mxu0 %v9011_v35  ;;  %4468 = vmatpush1.bf16.msra.mxu1 %v9012_v31  ;;  %v5269_v35 = vld [vmem:[%s8396_s4 + $0x20] sm:$0xff]   ;;  %v5270_v31 = vld [vmem:[%s8396_s4 + $0x68] sm:$0xff]  }
 0x9af   :  { %4428 = vmatprep.subr.bf16.mxu0 %v9013_v22  ;;  %4469 = vmatprep.subr.bf16.mxu1 %v9014_v21  ;;  %v5271_v22 = vld [vmem:[%s8396_s4 + $0x28] sm:$0xff]   ;;  %v5272_v21 = vld [vmem:[%s8396_s4 + $0x70] sm:$0xff]  }
 0x9b2   :  { %4429 = vmatpush1.bf16.msra.mxu0 %v9015_v55  ;;  %4470 = vmatpush1.bf16.msra.mxu1 %v9016_v17  ;;  %v5273_v55 = vld [vmem:[%s8396_s4 + $0x30] sm:$0xff]   ;;  %v5274_v17 = vld [vmem:[%s8396_s4 + $0x78] sm:$0xff]  }
 0x9b3   :  { %4430 = vmatprep.subr.bf16.mxu0 %v9017_v7  ;;  %4471 = vmatprep.subr.bf16.mxu1 %v9484_v34  ;;  %v5275_v7 = vld [vmem:[%s8396_s4 + $0x38] sm:$0xff]  }
 0x9b6   :  { %4431 = vmatpush1.bf16.msra.mxu0 %v9485_v0  ;;  %4472 = vmatpush1.bf16.msra.mxu1 %v9486_v9 }
 0x9b7   :  { %4432 = vmatprep.subr.bf16.mxu0 %v9487_v36  ;;  %4473 = vmatprep.subr.bf16.mxu1 %v9488_v43 }
 0x9ba   :  { %4433 = vmatpush1.bf16.msra.mxu0 %v9489_v11  ;;  %4474 = vmatpush1.bf16.msra.mxu1 %v9490_v47 }
 0x9bb   :  { %4434 = vmatprep.subr.bf16.mxu0 %v9491_v42  ;;  %4475 = vmatprep.subr.bf16.mxu1 %v9492_v20 }
 0x9be   :  { %4435 = vmatpush1.bf16.msra.mxu0 %v9493_v19  ;;  %4476 = vmatpush1.bf16.msra.mxu1 %v9494_v40 }
 0x9bf   :  { %4436 = vmatprep.subr.bf16.mxu0 %v9495_v2  ;;  %4477 = vmatprep.subr.bf16.mxu1 %v9496_v33  ;;  %v9511_v2 = vld [vmem:[#allocation189_spill] sm:$0xff] }
 0x9c2   :  { %4437 = vmatpush1.bf16.msra.mxu0 %v9497_v50  ;;  %4478 = vmatpush1.bf16.msra.mxu1 %v9498_v37  ;;  %v9512_v50 = vld [vmem:[#allocation190_spill] sm:$0xff] }
 0x9c3   :  { %4438 = vmatprep.subr.bf16.mxu0 %v9499_v8  ;;  %4479 = vmatprep.subr.bf16.mxu1 %v9500_v51 }
 0x9c6   :  { %4439 = vmatpush1.bf16.msra.mxu0 %v9501_v15  ;;  %4480 = vmatpush1.bf16.msra.mxu1 %v9502_v4  ;;  %v9513_v15 = vld [vmem:[#allocation191_spill] sm:$0xff] }
 0x9c7   :  { %4440 = vmatprep.subr.bf16.mxu0 %v9503_v1  ;;  %4481 = vmatprep.subr.bf16.mxu1 %v9504_v63  ;;  %v9514_v1 = vld [vmem:[#allocation192_spill] sm:$0xff] }
 0x9ca   :  { %4441 = vmatpush1.bf16.msra.mxu0 %v9505_v12  ;;  %4482 = vmatpush1.bf16.msra.mxu1 %v9506_v62 }
 0x9cb   :  { %5092 = vmatprep.subr.bf16.mxu0 %v5260_v14 }
 0x9cd   :  { %4443 = vmatmul.mubr.bf16.vlgmr.msra.gmra.mrb[92].mxu0 %v8260_v18  ;;  %4484 = vmatmul.mubr.bf16.vlgmr.msra.gmra.mrb[92].mxu1 %v8260_v18 }
 0x9ce   :  { %5093 = vmatpush3.bf16.msra.mxu0 %v5261_v13 }
 0x9cf   :  { %5094 = vmatprep.subr.bf16.mxu0 %v5262_v23 }
 0x9d2   :  { %5095 = vmatpush3.bf16.msra.mxu0 %v5263_v61 }
 0x9d3   :  { %5096 = vmatprep.subr.bf16.mxu0 %v5264_v24 }
 0x9d6   :  { %5097 = vmatpush3.bf16.msra.mxu0 %v5265_v52 }
 0x9d7   :  { %5098 = vmatprep.subr.bf16.mxu0 %v5266_v59 }
 0x9da   :  { %5099 = vmatpush3.bf16.msra.mxu0 %v5267_v54 }
 0x9db   :  { %5100 = vmatprep.subr.bf16.mxu0 %v5268_v25 }
 0x9de   :  { %5101 = vmatpush3.bf16.msra.mxu0 %v5269_v35 }
 0x9df   :  { %5102 = vmatprep.subr.bf16.mxu0 %v5270_v31 }
 0x9e2   :  { %5103 = vmatpush3.bf16.msra.mxu0 %v5271_v22 }
 0x9e3   :  { %5104 = vmatprep.subr.bf16.mxu0 %v5272_v21 }
 0x9e6   :  { %5105 = vmatpush3.bf16.msra.mxu0 %v5273_v55 }
 0x9e7   :  { %5106 = vmatprep.subr.bf16.mxu0 %v5274_v17 }
 0x9ea   :  { %5107 = vmatpush3.bf16.msra.mxu0 %v5275_v7 }
 0xa60   :  { %v4362_v10 = vpop.f32.mrb[88].mxu0  ;;  %v4403_v46 = vpop.f32.mrb[88].mxu1 }
 0xa61   :  { %v4492_v48 = vadd.f32 %v9507_v38, %v4362_v10  ;;  %v4494_v49 = vadd.f32 %v9508_v30, %v4403_v46  ;;  %v4364_v32 = vpop.f32.mrb[89].mxu0  ;;  %v4405_v27 = vpop.f32.mrb[89].mxu1 }
 0xa62   :  { %v4493_v41 = vadd.f32 %v9509_v44, %v4364_v32  ;;  %v4495_v57 = vadd.f32 %v9510_v6, %v4405_v27  ;;  %v4366_v28 = vpop.f32.mrb[90].mxu0  ;;  %v4407_v45 = vpop.f32.mrb[90].mxu1 }
 0xa63   :  { %v4367_v29 = vpop.f32.mrb[91].mxu0  ;;  %v4408_v3 = vpop.f32.mrb[91].mxu1  ;;  %v4500_v39 = vsub.f32 0.0, %v4492_v48  ;;  %v4510_v26 = vsub.f32 0.0, %v4494_v49  ;;  %v5075_v45 = vld [vmem:[%s8397_s5] ss:$0 sm:$0xff] }
 0xa64   :  { %v4501_v60 = vsub.f32 0.0, %v4493_v41  ;;  %v4511_v56 = vsub.f32 0.0, %v4495_v57 }
 0xa65   :  { %v4502_v58 = vmul.f32 1.442695, %v4500_v39  ;;  %v4512_v53 = vmul.f32 1.442695, %v4510_v26 }
 0xa66   :  { %v4504_v18 = vmul.f32 1.442695, %v4501_v60  ;;  %v4514_v34 = vmul.f32 1.442695, %v4511_v56 }
 0xa67   :  { %5500 = vpow2.f32 %v4502_v58 }
 0xa68   :  { %5502 = vpow2.f32 %v4512_v53 }
 0xa69   :  { %5504 = vpow2.f32 %v4504_v18 }
 0xa6a   :  { %5506 = vpow2.f32 %v4514_v34 }
 0xa71   :  { %v5501_v0 = vpop.eup %5500 }
 0xa72   :  { %v5503_v9 = vpop.eup %5502  ;;  %v4506_v11 = vadd.f32 1.0, %v5501_v0 }
 0xa73   :  { %v5505_v36 = vpop.eup %5504  ;;  %v4516_v47 = vadd.f32 1.0, %v5503_v9 }
 0xa74   :  { %v5507_v43 = vpop.eup %5506  ;;  %v4507_v42 = vadd.f32 1.0, %v5505_v36  ;;  %5508 = vrcp.f32 %v4506_v11 }
 0xa75   :  { %v4517_v20 = vadd.f32 1.0, %v5507_v43  ;;  %5510 = vrcp.f32 %v4516_v47 }
 0xa76   :  { %5512 = vrcp.f32 %v4507_v42 }
 0xa77   :  { %5514 = vrcp.f32 %v4517_v20 }
 0xa7e   :  { %v5509_v59 = vpop.eup %5508 }
 0xa7f   :  { %v5511_v54 = vpop.eup %5510 }
 0xa80   :  { %v5513_v25 = vpop.eup %5512  ;;  %v4532_v21 = vmul.f32 %v5511_v54, %v8254_v16 }
 0xa81   :  { %v5515_v35 = vpop.eup %5514 }
 0xa82   :  { %v4533_v17 = vmul.f32 %v5515_v35, %v8256_v5 }
 0xaa0   :  { %v4444_v19 = vpop.f32.mrb[92].mxu0  ;;  %v4485_v40 = vpop.f32.mrb[92].mxu1 }
 0xaa1   :  { %v4496_v33 = vadd.f32 %v9511_v2, %v4444_v19  ;;  %v4498_v37 = vadd.f32 %v9512_v50, %v4485_v40  ;;  %v4446_v8 = vpop.f32.mrb[93].mxu0  ;;  %v4487_v51 = vpop.f32.mrb[93].mxu1 }
 0xaa2   :  { %v4497_v4 = vadd.f32 %v9513_v15, %v4446_v8  ;;  %v4499_v63 = vadd.f32 %v9514_v1, %v4487_v51  ;;  %v4448_v12 = vpop.f32.mrb[94].mxu0  ;;  %v4489_v62 = vpop.f32.mrb[94].mxu1 }
 0xaa3   :  { %5516 = vtanh.f32 %v4496_v33  ;;  %v4522_v14 = vsub.f32 0.0, %v4498_v37  ;;  %v4449_v13 = vpop.f32.mrb[95].mxu0  ;;  %v4490_v23 = vpop.f32.mrb[95].mxu1 }
 0xaa4   :  { %5518 = vtanh.f32 %v4497_v4  ;;  %v4523_v61 = vsub.f32 0.0, %v4499_v63 }
 0xaa5   :  { %v4524_v24 = vmul.f32 1.442695, %v4522_v14 }
 0xaa6   :  { %v4526_v52 = vmul.f32 1.442695, %v4523_v61 }
 0xaa7   :  { %5520 = vpow2.f32 %v4524_v24 }
 0xaa8   :  { %5522 = vpow2.f32 %v4526_v52 }
 0xaad   :  { %v5517_v31 = vpop.eup %5516 }
 0xaae   :  { %v5519_v22 = vpop.eup %5518  ;;  %v4534_v55 = vmul.f32 %v5517_v31, %v5509_v59 }
 0xaaf   :  { %v4535_v7 = vmul.f32 %v5519_v22, %v5513_v25 }
 0xab0   :  { %v4536_v10 = vadd.f32 %v4534_v55, %v4532_v21 }
 0xab1   :  { %v5521_v46 = vpop.eup %5520  ;;  %v4537_v38 = vadd.f32 %v4535_v7, %v4533_v17 }
 0xab2   :  { %v5523_v48 = vpop.eup %5522  ;;  %5524 = vtanh.f32 %v4536_v10  ;;  %v4528_v30 = vadd.f32 1.0, %v5521_v46 }
 0xab3   :  { %5526 = vtanh.f32 %v4537_v38  ;;  %v4529_v49 = vadd.f32 1.0, %v5523_v48 }
 0xab4   :  { %5528 = vrcp.f32 %v4528_v30 }
 0xab5   :  { %5530 = vrcp.f32 %v4529_v49 }
 0xabc   :  { %v5525_v32 = vpop.eup %5524 }
 0xabd   :  { %v5527_v27 = vpop.eup %5526 }
 0xabe   :  { %v5529_v44 = vpop.eup %5528 }
 0xabf   :  { %v5531_v41 = vpop.eup %5530  ;;  %v4540_v6 = vmul.f32 %v5529_v44, %v5525_v32 }
 0xac0   :  { %v4541_v16 = vmul.f32 %v5531_v41, %v5527_v27 }
 0xac1   :  { %v4549_v28 = vpack.c.bf16 %v4540_v6, %v4540_v6 }
 0xac2   :  { %v4550_v57 = vpack.c.bf16 %v4541_v16, %v4541_v16 }
 0xac4   :  { %4718 = vmatprep.mubr.bf16.mxu0 %v4550_v57 }
 0xac5   :  { %4719 = vmatmul.mubr.bf16.vlgmr.msra.gmra.mrb[96].mxu0 %v4549_v28 }
 0xb98   :  { %v5108_v5 = vpop.f32.mrb[96].mxu0 }
 0xb99   :  { %v5109_v29 = vpop.f32.mrb[97].mxu0 }
 0xb9a   :  { %v5110_v3 = vadd.f32 %v5109_v29, %v5108_v5  ;;  %v5111_v39 = vpop.f32.mrb[98].mxu0 }
 0xb9b   :  { %v5112_v26 = vpop.f32.mrb[99].mxu0 }
 0xb9c   :  { %v4721_v60 = vadd.f32 %v5110_v3, %v5075_v45 }
 0xb9e   :  { %v4726_v56 = vsub.f32 0.0, %v4721_v60 }
 0xba0   :  { %v4727_v58 = vmul.f32 1.442695, %v4726_v56 }
 0xba2   :  { %5532 = vpow2.f32 %v4727_v58 }
 0xbac   :  { %v5533_v53 = vpop.eup %5532 }
 0xbad   :  { %v4729_v18 = vadd.f32 1.0, %v5533_v53 }
 0xbaf   :  { %5534 = vrcp.f32 %v4729_v18 }
 0xbb9   :  { %v5535_v34 = vpop.eup %5534 }
 0xbba   :  { %4731 = vst [vmem:[%s8398_s6] sm:$0xff] %v5535_v34 }

</bundles_post_ra>
